<compile_context>
chip_gen: v7x
topology: tpu7x:2x2x1
jax: 0.10.0
libtpu: 0.0.40
codegen_flags: <defaults>
</compile_context>

<pallas_src>
import math

import jax
import jax.numpy as jnp
from jax import lax
from jax.experimental import pallas as pl
from jax.experimental.pallas import tpu as pltpu

# ---------------- small ViT configuration (consistent with the module) -------
IMG = 16          # img_size
PATCH = 4         # patch_size
IN_C = 3          # in_c
EMBED = 32        # embed_dim
DEPTH = 2         # depth
HEADS = 4         # num_heads
MLP_RATIO = 4.0
NUM_CLASSES = 10
B = 2

EPS = 1e-6
GRID_HW = IMG // PATCH
NUM_PATCHES = GRID_HW * GRID_HW
N_TOK = NUM_PATCHES + 1                 # tokens per image (+ cls)
HEAD_DIM = EMBED // HEADS
MLP_HIDDEN = int(EMBED * MLP_RATIO)
TOT = B * N_TOK                         # 34 flat tokens (B cls rows first)
WIDE = HEADS * TOT                      # 136: per-head key axis on lanes
PATCH_DIM = IN_C * PATCH * PATCH        # 48
SCALE = HEAD_DIM ** (-0.5)
NEG = -1e30                             # additive mask (kept in f32 only)


# ----------------------------- in-kernel helpers ------------------------------
def _bf16(v):
    return v.astype(jnp.bfloat16)


def _layernorm(x, w, b):
    mu = jnp.mean(x, axis=-1, keepdims=True)
    var = jnp.mean((x - mu) * (x - mu), axis=-1, keepdims=True)
    return (x - mu) * lax.rsqrt(var + EPS) * w + b


def _gelu_exact(x):
    # PyTorch nn.GELU default: exact erf formulation
    return 0.5 * x * (1.0 + lax.erf(x * (1.0 / math.sqrt(2.0))))


def _dot(a, b):
    return jnp.dot(a, b, preferred_element_type=jnp.float32)


def _dot_t(a, b):
    # contract the last dim of both operands: (M, K) x (N, K) -> (M, N)
    return lax.dot_general(a, b, (((1,), (1,)), ((), ())),
                           preferred_element_type=jnp.float32)


# ----------------------------- the fused kernel -------------------------------
def _vit_kernel(patches_ref, convw_ref, fconst_ref, abias_ref, rep_ref,
                mmask_ref, wsmall_ref, w1_ref, w2_ref, vecs_ref, b1_ref,
                headw_ref, o_ref):
    # ---- patch embed; cls token + positional embedding folded into the
    #      per-token bias rows of fconst (the B leading patch rows are zero) ---
    x = _dot(_bf16(patches_ref[...]), convw_ref[...]) + fconst_ref[0:TOT, :]

    abias = abias_ref[...]            # (TOT, WIDE)   additive same-batch mask
    rep = rep_ref[...]                # (WIDE, TOT)   bf16 0/1 token replication
    mmask = mmask_ref[...]            # (WIDE, EMBED) f32 0/1 head-block mask
    mmask_bf = _bf16(mmask)           # reused as the per-head denominator gatherer

    for d in range(DEPTH):            # static unroll over transformer blocks
        vv = vecs_ref[d]              # (9, EMBED) packed f32 LN / bias rows
        ln1w, ln1b = vv[0:1], vv[1:2]
        bq, bk, bv = vv[2:3], vv[3:4], vv[4:5]   # bq has 1/sqrt(dh) pre-folded
        bproj = vv[5:6]
        ln2w, ln2b, b2 = vv[6:7], vv[7:8], vv[8:9]

        # -------- attention branch (block-diagonal "wide" formulation) -------
        xn = _layernorm(x, ln1w, ln1b)
        xn_bf = _bf16(xn)
        q = _dot(xn_bf, wsmall_ref[d, 0]) + bq                 # (TOT, D), pre-scaled
        xr_bf = _bf16(_dot(rep, xn_bf))                        # (WIDE, D) replicated tokens
        kt = (_dot(xr_bf, wsmall_ref[d, 1]) + bk) * mmask      # (WIDE, D) block-diag keys
        vt = (_dot(xr_bf, wsmall_ref[d, 2]) + bv) * mmask      # (WIDE, D) block-diag values

        s = _dot_t(_bf16(q), _bf16(kt)) + abias                # (TOT, WIDE) f32 scores
        s = s - jnp.max(s, axis=-1, keepdims=True)             # global row max (valid per head)
        p = jnp.exp(s)
        p_bf = _bf16(p)
        o_un = _dot(p_bf, _bf16(vt))                           # (TOT, D) un-normalised out
        z = _dot(p_bf, mmask_bf)                               # (TOT, D) per-head denominators
        o = o_un * pl.reciprocal(z, approx=True)
        x = x + _dot(_bf16(o), wsmall_ref[d, 3]) + bproj       # single K=D output projection

        # -------- MLP branch ----------
        xn2 = _layernorm(x, ln2w, ln2b)
        h1 = _dot(_bf16(xn2), w1_ref[d]) + b1_ref[d]
        h1 = _gelu_exact(h1)
        x = x + _dot(_bf16(h1), w2_ref[d]) + b2

    # ---- head: LayerNorm only the B cls rows (rows 0..B-1), classifier ----
    cls_tok = x[0:B, :]
    clsn = _layernorm(cls_tok,
                      fconst_ref[TOT:TOT + 1, :],
                      fconst_ref[TOT + 1:TOT + 2, :])
    o_ref[...] = (_dot(_bf16(clsn), headw_ref[...])
                  + fconst_ref[TOT + 2:TOT + 3, 0:NUM_CLASSES])


# ----------------------------- one-time parameter prep -------------------------
def prepare_params(params):
    """One-time packing / casting / layout transforms of the weights into the
    12 kernel operands.  Runs once at init, never inside the jitted forward."""
    f32, bf16 = jnp.float32, jnp.bfloat16

    conv_w = params['conv_w'].reshape(EMBED, PATCH_DIM).T.astype(bf16)      # (48, 32)

    # per-token bias: cls rows -> cls_token + pos[0]; patch rows -> conv_b + pos[1:]
    pos = params['pos_embed'][0]                                            # (N_TOK, D)
    cls_rows = jnp.broadcast_to(params['cls_token'][0, 0] + pos[0], (B, EMBED))
    patch_rows = jnp.tile(params['conv_b'][None, :] + pos[1:], (B, 1))
    tok_bias = jnp.concatenate([cls_rows, patch_rows], axis=0).astype(f32)  # (34, 32)

    head_b = jnp.zeros((1, EMBED), f32).at[:, :NUM_CLASSES].set(params['head_b'])
    fconst = jnp.concatenate(
        [tok_bias,
         params['norm_w'].reshape(1, EMBED).astype(f32),
         params['norm_b'].reshape(1, EMBED).astype(f32),
         head_b], axis=0)                                                    # (37, 32)

    # wide block-diagonal attention constants
    bid = jnp.concatenate([jnp.arange(B), jnp.repeat(jnp.arange(B), NUM_PATCHES)])
    base = jnp.where(bid[:, None] == bid[None, :], 0.0, NEG).astype(f32)     # (34, 34)
    abias = jnp.tile(base, (1, HEADS))                                       # (34, 136)
    rep = jnp.tile(jnp.eye(TOT, dtype=f32), (HEADS, 1)).astype(bf16)         # (136, 34)
    row_head = jnp.repeat(jnp.arange(HEADS), TOT)                            # (136,)
    col_head = jnp.repeat(jnp.arange(HEADS), HEAD_DIM)                       # (32,)
    mmask = (row_head[:, None] == col_head[None, :]).astype(f32)             # (136, 32)

    wsmall, w1s, w2s, vecs, b1s = [], [], [], [], []
    for blk in params['blocks']:
        # torch qkv column layout: [ q(head0..H) | k(head0..H) | v(head0..H) ]
        wq = blk['qkv_w'][:, 0:EMBED] * SCALE            # fold 1/sqrt(dh) into q
        wk = blk['qkv_w'][:, EMBED:2 * EMBED]
        wv = blk['qkv_w'][:, 2 * EMBED:3 * EMBED]
        bq = blk['qkv_b'][:, 0:EMBED] * SCALE
        bk = blk['qkv_b'][:, EMBED:2 * EMBED]
        bv = blk['qkv_b'][:, 2 * EMBED:3 * EMBED]
        wsmall.append(jnp.stack([wq, wk, wv, blk['proj_w']], axis=0))
        w1s.append(blk['fc1_w'])
        w2s.append(blk['fc2_w'])
        vecs.append(jnp.concatenate(
            [blk['ln1_w'], blk['ln1_b'], bq, bk, bv, blk['proj_b'],
             blk['ln2_w'], blk['ln2_b'], blk['fc2_b']], axis=0))
        b1s.append(blk['fc1_b'])

    wsmall = jnp.stack(wsmall, 0).astype(bf16)                    # (DEPTH, 4, 32, 32)
    w1s = jnp.stack(w1s, 0).astype(bf16)                          # (DEPTH, 32, 128)
    w2s = jnp.stack(w2s, 0).astype(bf16)                          # (DEPTH, 128, 32)
    vecs = jnp.stack(vecs, 0).astype(f32)                         # (DEPTH, 9, 32)
    b1s = jnp.stack(b1s, 0).reshape(DEPTH, 1, MLP_HIDDEN).astype(f32)   # (DEPTH,1,128)
    head_w = params['head_w'].astype(bf16)                        # (32, 10)

    return (conv_w, fconst, abias, rep, mmask, wsmall, w1s, w2s, vecs, b1s, head_w)


# ----------------------------- jitted forward ---------------------------------
@jax.jit
def vit_forward(x, prep):
    if x.shape != (B, IN_C, IMG, IMG):
        raise ValueError(f"expected input of shape {(B, IN_C, IMG, IMG)}, got {x.shape}")

    # per-input layout glue only: NCHW -> (B*P, C*ph*pw) patch rows; B zero rows
    # are prepended so the cls/pos embedding comes out of the same matmul bias.
    patches = x.reshape(B, IN_C, GRID_HW, PATCH, GRID_HW, PATCH)
    patches = patches.transpose(0, 2, 4, 1, 3, 5).reshape(B * NUM_PATCHES, PATCH_DIM)
    patches_ext = jnp.concatenate(
        [jnp.zeros((B, PATCH_DIM), jnp.float32), patches], axis=0)          # (TOT, 48)

    vmem = pl.BlockSpec(memory_space=pltpu.MemorySpace.VMEM)
    return pl.pallas_call(
        _vit_kernel,
        out_shape=jax.ShapeDtypeStruct((B, NUM_CLASSES), jnp.float32),
        in_specs=[vmem] * (1 + len(prep)),
        out_specs=vmem,
    )(patches_ext, *prep)


# ----------------------------- pure-JAX f32 reference --------------------------
def vit_reference(x, params):
    Bsz = x.shape[0]
    gh = IMG // PATCH
    patches = x.reshape(Bsz, IN_C, gh, PATCH, gh, PATCH)
    patches = patches.transpose(0, 2, 4, 1, 3, 5).reshape(Bsz, gh * gh, PATCH_DIM)
    wmat = params['conv_w'].reshape(EMBED, PATCH_DIM).T
    tok = patches @ wmat + params['conv_b']
    cls = jnp.broadcast_to(params['cls_token'], (Bsz, 1, EMBED))
    xt = jnp.concatenate([cls, tok], axis=1) + params['pos_embed']

    def ln(v, w, b):
        mu = v.mean(-1, keepdims=True)
        var = ((v - mu) ** 2).mean(-1, keepdims=True)
        return (v - mu) / jnp.sqrt(var + EPS) * w + b

    for blk in params['blocks']:
        xn = ln(xt, blk['ln1_w'], blk['ln1_b'])
        qkv = xn @ blk['qkv_w'] + blk['qkv_b']
        qkv = qkv.reshape(Bsz, N_TOK, 3, HEADS, HEAD_DIM).transpose(2, 0, 3, 1, 4)
        q, k, v = qkv[0], qkv[1], qkv[2]
        s = (q @ jnp.swapaxes(k, -1, -2)) * SCALE
        s = s - s.max(-1, keepdims=True)
        p = jnp.exp(s)
        p = p / p.sum(-1, keepdims=True)
        o = (p @ v).transpose(0, 2, 1, 3).reshape(Bsz, N_TOK, EMBED)
        xt = xt + o @ blk['proj_w'] + blk['proj_b']
        xn2 = ln(xt, blk['ln2_w'], blk['ln2_b'])
        h1 = xn2 @ blk['fc1_w'] + blk['fc1_b']
        h1 = 0.5 * h1 * (1.0 + lax.erf(h1 * (1.0 / math.sqrt(2.0))))
        xt = xt + h1 @ blk['fc2_w'] + blk['fc2_b']
    xn = ln(xt, params['norm_w'], params['norm_b'])
    return xn[:, 0, :] @ params['head_w'] + params['head_b']


# ----------------------------- parameter init ---------------------------------
def init_params(key):
    keys = jax.random.split(key, 4 + DEPTH)
    params = {}
    fan_out = EMBED * PATCH * PATCH
    params['conv_w'] = (jax.random.normal(keys[0], (EMBED, IN_C, PATCH, PATCH),
                                          jnp.float32)
                        * math.sqrt(2.0 / fan_out))
    params['conv_b'] = jnp.zeros((EMBED,), jnp.float32)
    params['cls_token'] = jax.random.normal(
        keys[1], (1, 1, EMBED), jnp.float32) * 0.02
    params['pos_embed'] = jax.random.normal(
        keys[2], (1, N_TOK, EMBED), jnp.float32) * 0.02
    params['norm_w'] = jnp.ones((1, EMBED), jnp.float32)
    params['norm_b'] = jnp.zeros((1, EMBED), jnp.float32)
    params['head_w'] = jax.random.normal(
        keys[3], (EMBED, NUM_CLASSES), jnp.float32) * 0.01
    params['head_b'] = jnp.zeros((1, NUM_CLASSES), jnp.float32)

    blocks = []
    for i in range(DEPTH):
        bk = jax.random.split(keys[4 + i], 4)
        blocks.append({
            'ln1_w': jnp.ones((1, EMBED), jnp.float32),
            'ln1_b': jnp.zeros((1, EMBED), jnp.float32),
            'qkv_w': jax.random.normal(bk[0], (EMBED, 3 * EMBED),
                                       jnp.float32) * 0.01,
            'qkv_b': jnp.zeros((1, 3 * EMBED), jnp.float32),   # qkv_bias=True
            'proj_w': jax.random.normal(bk[1], (EMBED, EMBED),
                                        jnp.float32) * 0.01,
            'proj_b': jnp.zeros((1, EMBED), jnp.float32),
            'ln2_w': jnp.ones((1, EMBED), jnp.float32),
            'ln2_b': jnp.zeros((1, EMBED), jnp.float32),
            'fc1_w': jax.random.normal(bk[2], (EMBED, MLP_HIDDEN),
                                       jnp.float32) * 0.01,
            'fc1_b': jnp.zeros((1, MLP_HIDDEN), jnp.float32),
            'fc2_w': jax.random.normal(bk[3], (MLP_HIDDEN, EMBED),
                                       jnp.float32) * 0.01,
            'fc2_b': jnp.zeros((1, EMBED), jnp.float32),
        })
    params['blocks'] = blocks
    return params


# ----------------------------- main --------------------------------------------
if __name__ == "__main__":
    key = jax.random.PRNGKey(0)
    kp, kx = jax.random.split(key)
    params = init_params(kp)
    prep = prepare_params(params)          # one-time weight packing, NOT per call
    x = jax.random.normal(kx, (B, IN_C, IMG, IMG), jnp.float32)   # NCHW

    logits = vit_forward(x, prep)
    jax.block_until_ready(logits)
    assert logits.shape == (B, NUM_CLASSES)
    assert bool(jnp.all(jnp.isfinite(logits)))

    ref = vit_reference(x, params)
    err = float(jnp.max(jnp.abs(logits - ref)))
    # bf16 MXU operands + approx reciprocal -> expect ~1e-3 absolute deviation
    assert err < 5e-2, f"mismatch vs f32 reference: {err}"
    print("KERNEL_OK")
</pallas_src>

<mosaic_0001>
module attributes {stable_mosaic.version = 11 : i64} {
  func.func @_vit_kernel(%arg0: memref<34x48xf32, #tpu.memory_space<vmem>>, %arg1: memref<48x32xbf16, #tpu.memory_space<vmem>>, %arg2: memref<37x32xf32, #tpu.memory_space<vmem>>, %arg3: memref<34x136xf32, #tpu.memory_space<vmem>>, %arg4: memref<136x34xbf16, #tpu.memory_space<vmem>>, %arg5: memref<136x32xf32, #tpu.memory_space<vmem>>, %arg6: memref<2x4x32x32xbf16, #tpu.memory_space<vmem>>, %arg7: memref<2x32x128xbf16, #tpu.memory_space<vmem>>, %arg8: memref<2x128x32xbf16, #tpu.memory_space<vmem>>, %arg9: memref<2x9x32xf32, #tpu.memory_space<vmem>>, %arg10: memref<2x1x128xf32, #tpu.memory_space<vmem>>, %arg11: memref<32x10xbf16, #tpu.memory_space<vmem>>, %arg12: memref<2x10xf32, #tpu.memory_space<vmem>>) attributes {dimension_semantics = [], scalar_prefetch = 0 : i64, scratch_operands = 0 : i64, tpu.core_type = #tpu.core_type<tc>} {
    %c0 = arith.constant 0 : index
    %c0_0 = arith.constant 0 : index
    %0 = vector.load %arg0[%c0, %c0_0] : memref<34x48xf32, #tpu.memory_space<vmem>>, vector<34x48xf32>
    %1 = arith.truncf %0 : vector<34x48xf32> to vector<34x48xbf16>
    %c0_1 = arith.constant 0 : index
    %c0_2 = arith.constant 0 : index
    %2 = vector.load %arg1[%c0_1, %c0_2] : memref<48x32xbf16, #tpu.memory_space<vmem>>, vector<48x32xbf16>
    %cst = arith.constant dense<0.000000e+00> : vector<34x32xf32>
    %3 = tpu.matmul %1, %2, %cst {dimension_numbers = #tpu.dot_dimension_numbers<[1], [0], [0], [1], [0, 0, 1, 1], [], []>} : vector<34x48xbf16>, vector<48x32xbf16>, vector<34x32xf32> -> vector<34x32xf32>
    %c0_3 = arith.constant 0 : index
    %c0_4 = arith.constant 0 : index
    %4 = vector.load %arg2[%c0_3, %c0_4] : memref<37x32xf32, #tpu.memory_space<vmem>>, vector<34x32xf32>
    %5 = arith.addf %3, %4 : vector<34x32xf32>
    %c0_5 = arith.constant 0 : index
    %c0_6 = arith.constant 0 : index
    %6 = vector.load %arg3[%c0_5, %c0_6] : memref<34x136xf32, #tpu.memory_space<vmem>>, vector<34x136xf32>
    %c0_7 = arith.constant 0 : index
    %c0_8 = arith.constant 0 : index
    %7 = vector.load %arg4[%c0_7, %c0_8] : memref<136x34xbf16, #tpu.memory_space<vmem>>, vector<136x34xbf16>
    %c0_9 = arith.constant 0 : index
    %c0_10 = arith.constant 0 : index
    %8 = vector.load %arg5[%c0_9, %c0_10] : memref<136x32xf32, #tpu.memory_space<vmem>>, vector<136x32xf32>
    %9 = arith.truncf %8 : vector<136x32xf32> to vector<136x32xbf16>
    %c0_11 = arith.constant 0 : index
    %c0_12 = arith.constant 0 : index
    %c0_13 = arith.constant 0 : index
    %10 = vector.load %arg9[%c0_11, %c0_12, %c0_13] : memref<2x9x32xf32, #tpu.memory_space<vmem>>, vector<1x9x32xf32>
    %11 = vector.shape_cast %10 : vector<1x9x32xf32> to vector<9x32xf32>
    %12 = vector.extract_strided_slice %11 {offsets = [0, 0], sizes = [1, 32], strides = [1, 1]} : vector<9x32xf32> to vector<1x32xf32>
    %13 = vector.extract_strided_slice %11 {offsets = [1, 0], sizes = [1, 32], strides = [1, 1]} : vector<9x32xf32> to vector<1x32xf32>
    %14 = vector.extract_strided_slice %11 {offsets = [2, 0], sizes = [1, 32], strides = [1, 1]} : vector<9x32xf32> to vector<1x32xf32>
    %15 = vector.extract_strided_slice %11 {offsets = [3, 0], sizes = [1, 32], strides = [1, 1]} : vector<9x32xf32> to vector<1x32xf32>
    %16 = vector.extract_strided_slice %11 {offsets = [4, 0], sizes = [1, 32], strides = [1, 1]} : vector<9x32xf32> to vector<1x32xf32>
    %17 = vector.extract_strided_slice %11 {offsets = [5, 0], sizes = [1, 32], strides = [1, 1]} : vector<9x32xf32> to vector<1x32xf32>
    %18 = vector.extract_strided_slice %11 {offsets = [6, 0], sizes = [1, 32], strides = [1, 1]} : vector<9x32xf32> to vector<1x32xf32>
    %19 = vector.extract_strided_slice %11 {offsets = [7, 0], sizes = [1, 32], strides = [1, 1]} : vector<9x32xf32> to vector<1x32xf32>
    %20 = vector.extract_strided_slice %11 {offsets = [8, 0], sizes = [1, 32], strides = [1, 1]} : vector<9x32xf32> to vector<1x32xf32>
    %cst_14 = arith.constant dense<0.000000e+00> : vector<34xf32>
    %21 = vector.multi_reduction <add>, %5, %cst_14 [1] : vector<34x32xf32> to vector<34xf32>
    %22 = vector.shape_cast %21 : vector<34xf32> to vector<34x1xf32>
    %cst_15 = arith.constant 3.200000e+01 : f32
    %23 = vector.broadcast %cst_15 : f32 to vector<34x1xf32>
    %24 = arith.divf %22, %23 : vector<34x1xf32>
    %25 = vector.broadcast %24 : vector<34x1xf32> to vector<34x32xf32>
    %26 = arith.subf %5, %25 : vector<34x32xf32>
    %27 = vector.broadcast %24 : vector<34x1xf32> to vector<34x32xf32>
    %28 = arith.subf %5, %27 : vector<34x32xf32>
    %29 = arith.mulf %26, %28 : vector<34x32xf32>
    %cst_16 = arith.constant dense<0.000000e+00> : vector<34xf32>
    %30 = vector.multi_reduction <add>, %29, %cst_16 [1] : vector<34x32xf32> to vector<34xf32>
    %31 = vector.shape_cast %30 : vector<34xf32> to vector<34x1xf32>
    %cst_17 = arith.constant 3.200000e+01 : f32
    %32 = vector.broadcast %cst_17 : f32 to vector<34x1xf32>
    %33 = arith.divf %31, %32 : vector<34x1xf32>
    %34 = vector.broadcast %24 : vector<34x1xf32> to vector<34x32xf32>
    %35 = arith.subf %5, %34 : vector<34x32xf32>
    %cst_18 = arith.constant 9.99999997E-7 : f32
    %36 = vector.broadcast %cst_18 : f32 to vector<34x1xf32>
    %37 = arith.addf %33, %36 : vector<34x1xf32>
    %38 = math.rsqrt %37 : vector<34x1xf32>
    %39 = vector.broadcast %38 : vector<34x1xf32> to vector<34x32xf32>
    %40 = arith.mulf %35, %39 : vector<34x32xf32>
    %41 = vector.broadcast %12 : vector<1x32xf32> to vector<34x32xf32>
    %42 = arith.mulf %40, %41 : vector<34x32xf32>
    %43 = vector.broadcast %13 : vector<1x32xf32> to vector<34x32xf32>
    %44 = arith.addf %42, %43 : vector<34x32xf32>
    %45 = arith.truncf %44 : vector<34x32xf32> to vector<34x32xbf16>
    %c0_19 = arith.constant 0 : index
    %c0_20 = arith.constant 0 : index
    %c0_21 = arith.constant 0 : index
    %c0_22 = arith.constant 0 : index
    %46 = vector.load %arg6[%c0_19, %c0_20, %c0_21, %c0_22] : memref<2x4x32x32xbf16, #tpu.memory_space<vmem>>, vector<1x1x32x32xbf16>
    %47 = vector.shape_cast %46 : vector<1x1x32x32xbf16> to vector<32x32xbf16>
    %cst_23 = arith.constant dense<0.000000e+00> : vector<34x32xf32>
    %48 = tpu.matmul %45, %47, %cst_23 {dimension_numbers = #tpu.dot_dimension_numbers<[1], [0], [0], [1], [0, 0, 1, 1], [], []>} : vector<34x32xbf16>, vector<32x32xbf16>, vector<34x32xf32> -> vector<34x32xf32>
    %49 = vector.broadcast %14 : vector<1x32xf32> to vector<34x32xf32>
    %50 = arith.addf %48, %49 : vector<34x32xf32>
    %cst_24 = arith.constant dense<0.000000e+00> : vector<136x32xf32>
    %51 = tpu.matmul %7, %45, %cst_24 {dimension_numbers = #tpu.dot_dimension_numbers<[1], [0], [0], [1], [0, 0, 1, 1], [], []>} : vector<136x34xbf16>, vector<34x32xbf16>, vector<136x32xf32> -> vector<136x32xf32>
    %52 = arith.truncf %51 : vector<136x32xf32> to vector<136x32xbf16>
    %c0_25 = arith.constant 0 : index
    %c1 = arith.constant 1 : index
    %c0_26 = arith.constant 0 : index
    %c0_27 = arith.constant 0 : index
    %53 = vector.load %arg6[%c0_25, %c1, %c0_26, %c0_27] : memref<2x4x32x32xbf16, #tpu.memory_space<vmem>>, vector<1x1x32x32xbf16>
    %54 = vector.shape_cast %53 : vector<1x1x32x32xbf16> to vector<32x32xbf16>
    %cst_28 = arith.constant dense<0.000000e+00> : vector<136x32xf32>
    %55 = tpu.matmul %52, %54, %cst_28 {dimension_numbers = #tpu.dot_dimension_numbers<[1], [0], [0], [1], [0, 0, 1, 1], [], []>} : vector<136x32xbf16>, vector<32x32xbf16>, vector<136x32xf32> -> vector<136x32xf32>
    %56 = vector.broadcast %15 : vector<1x32xf32> to vector<136x32xf32>
    %57 = arith.addf %55, %56 : vector<136x32xf32>
    %58 = arith.mulf %57, %8 : vector<136x32xf32>
    %c0_29 = arith.constant 0 : index
    %c2 = arith.constant 2 : index
    %c0_30 = arith.constant 0 : index
    %c0_31 = arith.constant 0 : index
    %59 = vector.load %arg6[%c0_29, %c2, %c0_30, %c0_31] : memref<2x4x32x32xbf16, #tpu.memory_space<vmem>>, vector<1x1x32x32xbf16>
    %60 = vector.shape_cast %59 : vector<1x1x32x32xbf16> to vector<32x32xbf16>
    %cst_32 = arith.constant dense<0.000000e+00> : vector<136x32xf32>
    %61 = tpu.matmul %52, %60, %cst_32 {dimension_numbers = #tpu.dot_dimension_numbers<[1], [0], [0], [1], [0, 0, 1, 1], [], []>} : vector<136x32xbf16>, vector<32x32xbf16>, vector<136x32xf32> -> vector<136x32xf32>
    %62 = vector.broadcast %16 : vector<1x32xf32> to vector<136x32xf32>
    %63 = arith.addf %61, %62 : vector<136x32xf32>
    %64 = arith.mulf %63, %8 : vector<136x32xf32>
    %65 = arith.truncf %50 : vector<34x32xf32> to vector<34x32xbf16>
    %66 = arith.truncf %58 : vector<136x32xf32> to vector<136x32xbf16>
    %cst_33 = arith.constant dense<0.000000e+00> : vector<34x136xf32>
    %67 = tpu.matmul %65, %66, %cst_33 {dimension_numbers = #tpu.dot_dimension_numbers<[1], [1], [0], [0], [0, 0, 1, 0], [], []>} : vector<34x32xbf16>, vector<136x32xbf16>, vector<34x136xf32> -> vector<34x136xf32>
    %68 = arith.addf %67, %6 : vector<34x136xf32>
    %cst_34 = arith.constant dense<0xFF800000> : vector<34xf32>
    %69 = vector.multi_reduction <maximumf>, %68, %cst_34 [1] : vector<34x136xf32> to vector<34xf32>
    %70 = vector.shape_cast %69 : vector<34xf32> to vector<34x1xf32>
    %71 = vector.broadcast %70 : vector<34x1xf32> to vector<34x136xf32>
    %72 = arith.subf %68, %71 : vector<34x136xf32>
    %73 = math.exp %72 : vector<34x136xf32>
    %74 = arith.truncf %73 : vector<34x136xf32> to vector<34x136xbf16>
    %75 = arith.truncf %64 : vector<136x32xf32> to vector<136x32xbf16>
    %cst_35 = arith.constant dense<0.000000e+00> : vector<34x32xf32>
    %76 = tpu.matmul %74, %75, %cst_35 {dimension_numbers = #tpu.dot_dimension_numbers<[1], [0], [0], [1], [0, 0, 1, 1], [], []>} : vector<34x136xbf16>, vector<136x32xbf16>, vector<34x32xf32> -> vector<34x32xf32>
    %cst_36 = arith.constant dense<0.000000e+00> : vector<34x32xf32>
    %77 = tpu.matmul %74, %9, %cst_36 {dimension_numbers = #tpu.dot_dimension_numbers<[1], [0], [0], [1], [0, 0, 1, 1], [], []>} : vector<34x136xbf16>, vector<136x32xbf16>, vector<34x32xf32> -> vector<34x32xf32>
    %78 = tpu.reciprocal %77 {approx = true} : vector<34x32xf32> -> vector<34x32xf32>
    %79 = arith.mulf %76, %78 : vector<34x32xf32>
    %80 = arith.truncf %79 : vector<34x32xf32> to vector<34x32xbf16>
    %c0_37 = arith.constant 0 : index
    %c3 = arith.constant 3 : index
    %c0_38 = arith.constant 0 : index
    %c0_39 = arith.constant 0 : index
    %81 = vector.load %arg6[%c0_37, %c3, %c0_38, %c0_39] : memref<2x4x32x32xbf16, #tpu.memory_space<vmem>>, vector<1x1x32x32xbf16>
    %82 = vector.shape_cast %81 : vector<1x1x32x32xbf16> to vector<32x32xbf16>
    %cst_40 = arith.constant dense<0.000000e+00> : vector<34x32xf32>
    %83 = tpu.matmul %80, %82, %cst_40 {dimension_numbers = #tpu.dot_dimension_numbers<[1], [0], [0], [1], [0, 0, 1, 1], [], []>} : vector<34x32xbf16>, vector<32x32xbf16>, vector<34x32xf32> -> vector<34x32xf32>
    %84 = arith.addf %5, %83 : vector<34x32xf32>
    %85 = vector.broadcast %17 : vector<1x32xf32> to vector<34x32xf32>
    %86 = arith.addf %84, %85 : vector<34x32xf32>
    %cst_41 = arith.constant dense<0.000000e+00> : vector<34xf32>
    %87 = vector.multi_reduction <add>, %86, %cst_41 [1] : vector<34x32xf32> to vector<34xf32>
    %88 = vector.shape_cast %87 : vector<34xf32> to vector<34x1xf32>
    %cst_42 = arith.constant 3.200000e+01 : f32
    %89 = vector.broadcast %cst_42 : f32 to vector<34x1xf32>
    %90 = arith.divf %88, %89 : vector<34x1xf32>
    %91 = vector.broadcast %90 : vector<34x1xf32> to vector<34x32xf32>
    %92 = arith.subf %86, %91 : vector<34x32xf32>
    %93 = vector.broadcast %90 : vector<34x1xf32> to vector<34x32xf32>
    %94 = arith.subf %86, %93 : vector<34x32xf32>
    %95 = arith.mulf %92, %94 : vector<34x32xf32>
    %cst_43 = arith.constant dense<0.000000e+00> : vector<34xf32>
    %96 = vector.multi_reduction <add>, %95, %cst_43 [1] : vector<34x32xf32> to vector<34xf32>
    %97 = vector.shape_cast %96 : vector<34xf32> to vector<34x1xf32>
    %cst_44 = arith.constant 3.200000e+01 : f32
    %98 = vector.broadcast %cst_44 : f32 to vector<34x1xf32>
    %99 = arith.divf %97, %98 : vector<34x1xf32>
    %100 = vector.broadcast %90 : vector<34x1xf32> to vector<34x32xf32>
    %101 = arith.subf %86, %100 : vector<34x32xf32>
    %cst_45 = arith.constant 9.99999997E-7 : f32
    %102 = vector.broadcast %cst_45 : f32 to vector<34x1xf32>
    %103 = arith.addf %99, %102 : vector<34x1xf32>
    %104 = math.rsqrt %103 : vector<34x1xf32>
    %105 = vector.broadcast %104 : vector<34x1xf32> to vector<34x32xf32>
    %106 = arith.mulf %101, %105 : vector<34x32xf32>
    %107 = vector.broadcast %18 : vector<1x32xf32> to vector<34x32xf32>
    %108 = arith.mulf %106, %107 : vector<34x32xf32>
    %109 = vector.broadcast %19 : vector<1x32xf32> to vector<34x32xf32>
    %110 = arith.addf %108, %109 : vector<34x32xf32>
    %111 = arith.truncf %110 : vector<34x32xf32> to vector<34x32xbf16>
    %c0_46 = arith.constant 0 : index
    %c0_47 = arith.constant 0 : index
    %c0_48 = arith.constant 0 : index
    %112 = vector.load %arg7[%c0_46, %c0_47, %c0_48] : memref<2x32x128xbf16, #tpu.memory_space<vmem>>, vector<1x32x128xbf16>
    %113 = vector.shape_cast %112 : vector<1x32x128xbf16> to vector<32x128xbf16>
    %cst_49 = arith.constant dense<0.000000e+00> : vector<34x128xf32>
    %114 = tpu.matmul %111, %113, %cst_49 {dimension_numbers = #tpu.dot_dimension_numbers<[1], [0], [0], [1], [0, 0, 1, 1], [], []>} : vector<34x32xbf16>, vector<32x128xbf16>, vector<34x128xf32> -> vector<34x128xf32>
    %c0_50 = arith.constant 0 : index
    %c0_51 = arith.constant 0 : index
    %c0_52 = arith.constant 0 : index
    %115 = vector.load %arg10[%c0_50, %c0_51, %c0_52] : memref<2x1x128xf32, #tpu.memory_space<vmem>>, vector<1x1x128xf32>
    %116 = vector.shape_cast %115 : vector<1x1x128xf32> to vector<1x128xf32>
    %117 = vector.broadcast %116 : vector<1x128xf32> to vector<34x128xf32>
    %118 = arith.addf %114, %117 : vector<34x128xf32>
    %cst_53 = arith.constant 5.000000e-01 : f32
    %119 = vector.broadcast %cst_53 : f32 to vector<34x128xf32>
    %120 = arith.mulf %119, %118 : vector<34x128xf32>
    %cst_54 = arith.constant 0.707106769 : f32
    %121 = vector.broadcast %cst_54 : f32 to vector<34x128xf32>
    %122 = arith.mulf %118, %121 : vector<34x128xf32>
    %123 = math.erf %122 : vector<34x128xf32>
    %cst_55 = arith.constant 1.000000e+00 : f32
    %124 = vector.broadcast %cst_55 : f32 to vector<34x128xf32>
    %125 = arith.addf %124, %123 : vector<34x128xf32>
    %126 = arith.mulf %120, %125 : vector<34x128xf32>
    %127 = arith.truncf %126 : vector<34x128xf32> to vector<34x128xbf16>
    %c0_56 = arith.constant 0 : index
    %c0_57 = arith.constant 0 : index
    %c0_58 = arith.constant 0 : index
    %128 = vector.load %arg8[%c0_56, %c0_57, %c0_58] : memref<2x128x32xbf16, #tpu.memory_space<vmem>>, vector<1x128x32xbf16>
    %129 = vector.shape_cast %128 : vector<1x128x32xbf16> to vector<128x32xbf16>
    %cst_59 = arith.constant dense<0.000000e+00> : vector<34x32xf32>
    %130 = tpu.matmul %127, %129, %cst_59 {dimension_numbers = #tpu.dot_dimension_numbers<[1], [0], [0], [1], [0, 0, 1, 1], [], []>} : vector<34x128xbf16>, vector<128x32xbf16>, vector<34x32xf32> -> vector<34x32xf32>
    %131 = arith.addf %86, %130 : vector<34x32xf32>
    %132 = vector.broadcast %20 : vector<1x32xf32> to vector<34x32xf32>
    %133 = arith.addf %131, %132 : vector<34x32xf32>
    %c1_60 = arith.constant 1 : index
    %c0_61 = arith.constant 0 : index
    %c0_62 = arith.constant 0 : index
    %134 = vector.load %arg9[%c1_60, %c0_61, %c0_62] : memref<2x9x32xf32, #tpu.memory_space<vmem>>, vector<1x9x32xf32>
    %135 = vector.shape_cast %134 : vector<1x9x32xf32> to vector<9x32xf32>
    %136 = vector.extract_strided_slice %135 {offsets = [0, 0], sizes = [1, 32], strides = [1, 1]} : vector<9x32xf32> to vector<1x32xf32>
    %137 = vector.extract_strided_slice %135 {offsets = [1, 0], sizes = [1, 32], strides = [1, 1]} : vector<9x32xf32> to vector<1x32xf32>
    %138 = vector.extract_strided_slice %135 {offsets = [2, 0], sizes = [1, 32], strides = [1, 1]} : vector<9x32xf32> to vector<1x32xf32>
    %139 = vector.extract_strided_slice %135 {offsets = [3, 0], sizes = [1, 32], strides = [1, 1]} : vector<9x32xf32> to vector<1x32xf32>
    %140 = vector.extract_strided_slice %135 {offsets = [4, 0], sizes = [1, 32], strides = [1, 1]} : vector<9x32xf32> to vector<1x32xf32>
    %141 = vector.extract_strided_slice %135 {offsets = [5, 0], sizes = [1, 32], strides = [1, 1]} : vector<9x32xf32> to vector<1x32xf32>
    %142 = vector.extract_strided_slice %135 {offsets = [6, 0], sizes = [1, 32], strides = [1, 1]} : vector<9x32xf32> to vector<1x32xf32>
    %143 = vector.extract_strided_slice %135 {offsets = [7, 0], sizes = [1, 32], strides = [1, 1]} : vector<9x32xf32> to vector<1x32xf32>
    %144 = vector.extract_strided_slice %135 {offsets = [8, 0], sizes = [1, 32], strides = [1, 1]} : vector<9x32xf32> to vector<1x32xf32>
    %cst_63 = arith.constant dense<0.000000e+00> : vector<34xf32>
    %145 = vector.multi_reduction <add>, %133, %cst_63 [1] : vector<34x32xf32> to vector<34xf32>
    %146 = vector.shape_cast %145 : vector<34xf32> to vector<34x1xf32>
    %cst_64 = arith.constant 3.200000e+01 : f32
    %147 = vector.broadcast %cst_64 : f32 to vector<34x1xf32>
    %148 = arith.divf %146, %147 : vector<34x1xf32>
    %149 = vector.broadcast %148 : vector<34x1xf32> to vector<34x32xf32>
    %150 = arith.subf %133, %149 : vector<34x32xf32>
    %151 = vector.broadcast %148 : vector<34x1xf32> to vector<34x32xf32>
    %152 = arith.subf %133, %151 : vector<34x32xf32>
    %153 = arith.mulf %150, %152 : vector<34x32xf32>
    %cst_65 = arith.constant dense<0.000000e+00> : vector<34xf32>
    %154 = vector.multi_reduction <add>, %153, %cst_65 [1] : vector<34x32xf32> to vector<34xf32>
    %155 = vector.shape_cast %154 : vector<34xf32> to vector<34x1xf32>
    %cst_66 = arith.constant 3.200000e+01 : f32
    %156 = vector.broadcast %cst_66 : f32 to vector<34x1xf32>
    %157 = arith.divf %155, %156 : vector<34x1xf32>
    %158 = vector.broadcast %148 : vector<34x1xf32> to vector<34x32xf32>
    %159 = arith.subf %133, %158 : vector<34x32xf32>
    %cst_67 = arith.constant 9.99999997E-7 : f32
    %160 = vector.broadcast %cst_67 : f32 to vector<34x1xf32>
    %161 = arith.addf %157, %160 : vector<34x1xf32>
    %162 = math.rsqrt %161 : vector<34x1xf32>
    %163 = vector.broadcast %162 : vector<34x1xf32> to vector<34x32xf32>
    %164 = arith.mulf %159, %163 : vector<34x32xf32>
    %165 = vector.broadcast %136 : vector<1x32xf32> to vector<34x32xf32>
    %166 = arith.mulf %164, %165 : vector<34x32xf32>
    %167 = vector.broadcast %137 : vector<1x32xf32> to vector<34x32xf32>
    %168 = arith.addf %166, %167 : vector<34x32xf32>
    %169 = arith.truncf %168 : vector<34x32xf32> to vector<34x32xbf16>
    %c1_68 = arith.constant 1 : index
    %c0_69 = arith.constant 0 : index
    %c0_70 = arith.constant 0 : index
    %c0_71 = arith.constant 0 : index
    %170 = vector.load %arg6[%c1_68, %c0_69, %c0_70, %c0_71] : memref<2x4x32x32xbf16, #tpu.memory_space<vmem>>, vector<1x1x32x32xbf16>
    %171 = vector.shape_cast %170 : vector<1x1x32x32xbf16> to vector<32x32xbf16>
    %cst_72 = arith.constant dense<0.000000e+00> : vector<34x32xf32>
    %172 = tpu.matmul %169, %171, %cst_72 {dimension_numbers = #tpu.dot_dimension_numbers<[1], [0], [0], [1], [0, 0, 1, 1], [], []>} : vector<34x32xbf16>, vector<32x32xbf16>, vector<34x32xf32> -> vector<34x32xf32>
    %173 = vector.broadcast %138 : vector<1x32xf32> to vector<34x32xf32>
    %174 = arith.addf %172, %173 : vector<34x32xf32>
    %cst_73 = arith.constant dense<0.000000e+00> : vector<136x32xf32>
    %175 = tpu.matmul %7, %169, %cst_73 {dimension_numbers = #tpu.dot_dimension_numbers<[1], [0], [0], [1], [0, 0, 1, 1], [], []>} : vector<136x34xbf16>, vector<34x32xbf16>, vector<136x32xf32> -> vector<136x32xf32>
    %176 = arith.truncf %175 : vector<136x32xf32> to vector<136x32xbf16>
    %c1_74 = arith.constant 1 : index
    %c1_75 = arith.constant 1 : index
    %c0_76 = arith.constant 0 : index
    %c0_77 = arith.constant 0 : index
    %177 = vector.load %arg6[%c1_74, %c1_75, %c0_76, %c0_77] : memref<2x4x32x32xbf16, #tpu.memory_space<vmem>>, vector<1x1x32x32xbf16>
    %178 = vector.shape_cast %177 : vector<1x1x32x32xbf16> to vector<32x32xbf16>
    %cst_78 = arith.constant dense<0.000000e+00> : vector<136x32xf32>
    %179 = tpu.matmul %176, %178, %cst_78 {dimension_numbers = #tpu.dot_dimension_numbers<[1], [0], [0], [1], [0, 0, 1, 1], [], []>} : vector<136x32xbf16>, vector<32x32xbf16>, vector<136x32xf32> -> vector<136x32xf32>
    %180 = vector.broadcast %139 : vector<1x32xf32> to vector<136x32xf32>
    %181 = arith.addf %179, %180 : vector<136x32xf32>
    %182 = arith.mulf %181, %8 : vector<136x32xf32>
    %c1_79 = arith.constant 1 : index
    %c2_80 = arith.constant 2 : index
    %c0_81 = arith.constant 0 : index
    %c0_82 = arith.constant 0 : index
    %183 = vector.load %arg6[%c1_79, %c2_80, %c0_81, %c0_82] : memref<2x4x32x32xbf16, #tpu.memory_space<vmem>>, vector<1x1x32x32xbf16>
    %184 = vector.shape_cast %183 : vector<1x1x32x32xbf16> to vector<32x32xbf16>
    %cst_83 = arith.constant dense<0.000000e+00> : vector<136x32xf32>
    %185 = tpu.matmul %176, %184, %cst_83 {dimension_numbers = #tpu.dot_dimension_numbers<[1], [0], [0], [1], [0, 0, 1, 1], [], []>} : vector<136x32xbf16>, vector<32x32xbf16>, vector<136x32xf32> -> vector<136x32xf32>
    %186 = vector.broadcast %140 : vector<1x32xf32> to vector<136x32xf32>
    %187 = arith.addf %185, %186 : vector<136x32xf32>
    %188 = arith.mulf %187, %8 : vector<136x32xf32>
    %189 = arith.truncf %174 : vector<34x32xf32> to vector<34x32xbf16>
    %190 = arith.truncf %182 : vector<136x32xf32> to vector<136x32xbf16>
    %cst_84 = arith.constant dense<0.000000e+00> : vector<34x136xf32>
    %191 = tpu.matmul %189, %190, %cst_84 {dimension_numbers = #tpu.dot_dimension_numbers<[1], [1], [0], [0], [0, 0, 1, 0], [], []>} : vector<34x32xbf16>, vector<136x32xbf16>, vector<34x136xf32> -> vector<34x136xf32>
    %192 = arith.addf %191, %6 : vector<34x136xf32>
    %cst_85 = arith.constant dense<0xFF800000> : vector<34xf32>
    %193 = vector.multi_reduction <maximumf>, %192, %cst_85 [1] : vector<34x136xf32> to vector<34xf32>
    %194 = vector.shape_cast %193 : vector<34xf32> to vector<34x1xf32>
    %195 = vector.broadcast %194 : vector<34x1xf32> to vector<34x136xf32>
    %196 = arith.subf %192, %195 : vector<34x136xf32>
    %197 = math.exp %196 : vector<34x136xf32>
    %198 = arith.truncf %197 : vector<34x136xf32> to vector<34x136xbf16>
    %199 = arith.truncf %188 : vector<136x32xf32> to vector<136x32xbf16>
    %cst_86 = arith.constant dense<0.000000e+00> : vector<34x32xf32>
    %200 = tpu.matmul %198, %199, %cst_86 {dimension_numbers = #tpu.dot_dimension_numbers<[1], [0], [0], [1], [0, 0, 1, 1], [], []>} : vector<34x136xbf16>, vector<136x32xbf16>, vector<34x32xf32> -> vector<34x32xf32>
    %cst_87 = arith.constant dense<0.000000e+00> : vector<34x32xf32>
    %201 = tpu.matmul %198, %9, %cst_87 {dimension_numbers = #tpu.dot_dimension_numbers<[1], [0], [0], [1], [0, 0, 1, 1], [], []>} : vector<34x136xbf16>, vector<136x32xbf16>, vector<34x32xf32> -> vector<34x32xf32>
    %202 = tpu.reciprocal %201 {approx = true} : vector<34x32xf32> -> vector<34x32xf32>
    %203 = arith.mulf %200, %202 : vector<34x32xf32>
    %204 = arith.truncf %203 : vector<34x32xf32> to vector<34x32xbf16>
    %c1_88 = arith.constant 1 : index
    %c3_89 = arith.constant 3 : index
    %c0_90 = arith.constant 0 : index
    %c0_91 = arith.constant 0 : index
    %205 = vector.load %arg6[%c1_88, %c3_89, %c0_90, %c0_91] : memref<2x4x32x32xbf16, #tpu.memory_space<vmem>>, vector<1x1x32x32xbf16>
    %206 = vector.shape_cast %205 : vector<1x1x32x32xbf16> to vector<32x32xbf16>
    %cst_92 = arith.constant dense<0.000000e+00> : vector<34x32xf32>
    %207 = tpu.matmul %204, %206, %cst_92 {dimension_numbers = #tpu.dot_dimension_numbers<[1], [0], [0], [1], [0, 0, 1, 1], [], []>} : vector<34x32xbf16>, vector<32x32xbf16>, vector<34x32xf32> -> vector<34x32xf32>
    %208 = arith.addf %133, %207 : vector<34x32xf32>
    %209 = vector.broadcast %141 : vector<1x32xf32> to vector<34x32xf32>
    %210 = arith.addf %208, %209 : vector<34x32xf32>
    %cst_93 = arith.constant dense<0.000000e+00> : vector<34xf32>
    %211 = vector.multi_reduction <add>, %210, %cst_93 [1] : vector<34x32xf32> to vector<34xf32>
    %212 = vector.shape_cast %211 : vector<34xf32> to vector<34x1xf32>
    %cst_94 = arith.constant 3.200000e+01 : f32
    %213 = vector.broadcast %cst_94 : f32 to vector<34x1xf32>
    %214 = arith.divf %212, %213 : vector<34x1xf32>
    %215 = vector.broadcast %214 : vector<34x1xf32> to vector<34x32xf32>
    %216 = arith.subf %210, %215 : vector<34x32xf32>
    %217 = vector.broadcast %214 : vector<34x1xf32> to vector<34x32xf32>
    %218 = arith.subf %210, %217 : vector<34x32xf32>
    %219 = arith.mulf %216, %218 : vector<34x32xf32>
    %cst_95 = arith.constant dense<0.000000e+00> : vector<34xf32>
    %220 = vector.multi_reduction <add>, %219, %cst_95 [1] : vector<34x32xf32> to vector<34xf32>
    %221 = vector.shape_cast %220 : vector<34xf32> to vector<34x1xf32>
    %cst_96 = arith.constant 3.200000e+01 : f32
    %222 = vector.broadcast %cst_96 : f32 to vector<34x1xf32>
    %223 = arith.divf %221, %222 : vector<34x1xf32>
    %224 = vector.broadcast %214 : vector<34x1xf32> to vector<34x32xf32>
    %225 = arith.subf %210, %224 : vector<34x32xf32>
    %cst_97 = arith.constant 9.99999997E-7 : f32
    %226 = vector.broadcast %cst_97 : f32 to vector<34x1xf32>
    %227 = arith.addf %223, %226 : vector<34x1xf32>
    %228 = math.rsqrt %227 : vector<34x1xf32>
    %229 = vector.broadcast %228 : vector<34x1xf32> to vector<34x32xf32>
    %230 = arith.mulf %225, %229 : vector<34x32xf32>
    %231 = vector.broadcast %142 : vector<1x32xf32> to vector<34x32xf32>
    %232 = arith.mulf %230, %231 : vector<34x32xf32>
    %233 = vector.broadcast %143 : vector<1x32xf32> to vector<34x32xf32>
    %234 = arith.addf %232, %233 : vector<34x32xf32>
    %235 = arith.truncf %234 : vector<34x32xf32> to vector<34x32xbf16>
    %c1_98 = arith.constant 1 : index
    %c0_99 = arith.constant 0 : index
    %c0_100 = arith.constant 0 : index
    %236 = vector.load %arg7[%c1_98, %c0_99, %c0_100] : memref<2x32x128xbf16, #tpu.memory_space<vmem>>, vector<1x32x128xbf16>
    %237 = vector.shape_cast %236 : vector<1x32x128xbf16> to vector<32x128xbf16>
    %cst_101 = arith.constant dense<0.000000e+00> : vector<34x128xf32>
    %238 = tpu.matmul %235, %237, %cst_101 {dimension_numbers = #tpu.dot_dimension_numbers<[1], [0], [0], [1], [0, 0, 1, 1], [], []>} : vector<34x32xbf16>, vector<32x128xbf16>, vector<34x128xf32> -> vector<34x128xf32>
    %c1_102 = arith.constant 1 : index
    %c0_103 = arith.constant 0 : index
    %c0_104 = arith.constant 0 : index
    %239 = vector.load %arg10[%c1_102, %c0_103, %c0_104] : memref<2x1x128xf32, #tpu.memory_space<vmem>>, vector<1x1x128xf32>
    %240 = vector.shape_cast %239 : vector<1x1x128xf32> to vector<1x128xf32>
    %241 = vector.broadcast %240 : vector<1x128xf32> to vector<34x128xf32>
    %242 = arith.addf %238, %241 : vector<34x128xf32>
    %cst_105 = arith.constant 5.000000e-01 : f32
    %243 = vector.broadcast %cst_105 : f32 to vector<34x128xf32>
    %244 = arith.mulf %243, %242 : vector<34x128xf32>
    %cst_106 = arith.constant 0.707106769 : f32
    %245 = vector.broadcast %cst_106 : f32 to vector<34x128xf32>
    %246 = arith.mulf %242, %245 : vector<34x128xf32>
    %247 = math.erf %246 : vector<34x128xf32>
    %cst_107 = arith.constant 1.000000e+00 : f32
    %248 = vector.broadcast %cst_107 : f32 to vector<34x128xf32>
    %249 = arith.addf %248, %247 : vector<34x128xf32>
    %250 = arith.mulf %244, %249 : vector<34x128xf32>
    %251 = arith.truncf %250 : vector<34x128xf32> to vector<34x128xbf16>
    %c1_108 = arith.constant 1 : index
    %c0_109 = arith.constant 0 : index
    %c0_110 = arith.constant 0 : index
    %252 = vector.load %arg8[%c1_108, %c0_109, %c0_110] : memref<2x128x32xbf16, #tpu.memory_space<vmem>>, vector<1x128x32xbf16>
    %253 = vector.shape_cast %252 : vector<1x128x32xbf16> to vector<128x32xbf16>
    %cst_111 = arith.constant dense<0.000000e+00> : vector<34x32xf32>
    %254 = tpu.matmul %251, %253, %cst_111 {dimension_numbers = #tpu.dot_dimension_numbers<[1], [0], [0], [1], [0, 0, 1, 1], [], []>} : vector<34x128xbf16>, vector<128x32xbf16>, vector<34x32xf32> -> vector<34x32xf32>
    %255 = arith.addf %210, %254 : vector<34x32xf32>
    %256 = vector.broadcast %144 : vector<1x32xf32> to vector<34x32xf32>
    %257 = arith.addf %255, %256 : vector<34x32xf32>
    %258 = vector.extract_strided_slice %257 {offsets = [0, 0], sizes = [2, 32], strides = [1, 1]} : vector<34x32xf32> to vector<2x32xf32>
    %c34 = arith.constant 34 : index
    %c0_112 = arith.constant 0 : index
    %259 = vector.load %arg2[%c34, %c0_112] : memref<37x32xf32, #tpu.memory_space<vmem>>, vector<1x32xf32>
    %c35 = arith.constant 35 : index
    %c0_113 = arith.constant 0 : index
    %260 = vector.load %arg2[%c35, %c0_113] : memref<37x32xf32, #tpu.memory_space<vmem>>, vector<1x32xf32>
    %cst_114 = arith.constant dense<0.000000e+00> : vector<2xf32>
    %261 = vector.multi_reduction <add>, %258, %cst_114 [1] : vector<2x32xf32> to vector<2xf32>
    %262 = vector.shape_cast %261 : vector<2xf32> to vector<2x1xf32>
    %cst_115 = arith.constant 3.200000e+01 : f32
    %263 = vector.broadcast %cst_115 : f32 to vector<2x1xf32>
    %264 = arith.divf %262, %263 : vector<2x1xf32>
    %265 = vector.broadcast %264 : vector<2x1xf32> to vector<2x32xf32>
    %266 = arith.subf %258, %265 : vector<2x32xf32>
    %267 = vector.broadcast %264 : vector<2x1xf32> to vector<2x32xf32>
    %268 = arith.subf %258, %267 : vector<2x32xf32>
    %269 = arith.mulf %266, %268 : vector<2x32xf32>
    %cst_116 = arith.constant dense<0.000000e+00> : vector<2xf32>
    %270 = vector.multi_reduction <add>, %269, %cst_116 [1] : vector<2x32xf32> to vector<2xf32>
    %271 = vector.shape_cast %270 : vector<2xf32> to vector<2x1xf32>
    %cst_117 = arith.constant 3.200000e+01 : f32
    %272 = vector.broadcast %cst_117 : f32 to vector<2x1xf32>
    %273 = arith.divf %271, %272 : vector<2x1xf32>
    %274 = vector.broadcast %264 : vector<2x1xf32> to vector<2x32xf32>
    %275 = arith.subf %258, %274 : vector<2x32xf32>
    %cst_118 = arith.constant 9.99999997E-7 : f32
    %276 = vector.broadcast %cst_118 : f32 to vector<2x1xf32>
    %277 = arith.addf %273, %276 : vector<2x1xf32>
    %278 = math.rsqrt %277 : vector<2x1xf32>
    %279 = vector.broadcast %278 : vector<2x1xf32> to vector<2x32xf32>
    %280 = arith.mulf %275, %279 : vector<2x32xf32>
    %281 = vector.broadcast %259 : vector<1x32xf32> to vector<2x32xf32>
    %282 = arith.mulf %280, %281 : vector<2x32xf32>
    %283 = vector.broadcast %260 : vector<1x32xf32> to vector<2x32xf32>
    %284 = arith.addf %282, %283 : vector<2x32xf32>
    %285 = arith.truncf %284 : vector<2x32xf32> to vector<2x32xbf16>
    %c0_119 = arith.constant 0 : index
    %c0_120 = arith.constant 0 : index
    %286 = vector.load %arg11[%c0_119, %c0_120] : memref<32x10xbf16, #tpu.memory_space<vmem>>, vector<32x10xbf16>
    %cst_121 = arith.constant dense<0.000000e+00> : vector<2x10xf32>
    %287 = tpu.matmul %285, %286, %cst_121 {dimension_numbers = #tpu.dot_dimension_numbers<[1], [0], [0], [1], [0, 0, 1, 1], [], []>} : vector<2x32xbf16>, vector<32x10xbf16>, vector<2x10xf32> -> vector<2x10xf32>
    %c36 = arith.constant 36 : index
    %c0_122 = arith.constant 0 : index
    %288 = vector.load %arg2[%c36, %c0_122] : memref<37x32xf32, #tpu.memory_space<vmem>>, vector<1x10xf32>
    %289 = vector.broadcast %288 : vector<1x10xf32> to vector<2x10xf32>
    %290 = arith.addf %287, %289 : vector<2x10xf32>
    %c0_123 = arith.constant 0 : index
    %c0_124 = arith.constant 0 : index
    %291 = vector.load %arg12[%c0_123, %c0_124] : memref<2x10xf32, #tpu.memory_space<vmem>>, vector<2x10xf32>
    tpu.vector_store %arg12[%c0_123, %c0_124], %290 {strides = array<i32>} : memref<2x10xf32, #tpu.memory_space<vmem>>, vector<2x10xf32>,
    return
  }
}

</mosaic_0001>

<bundles_post_ra>
// kernel: vit_forward.1
= control target key start
LH: loop header
LB: loop body
LE: loop exit
PB: predicated region body
PF: predicated region fallthrough
CT: control target
= control target key end

     0   :  { %v5543_v1 = vmov 0.0   ;;  %vm4058_vm0 = vmmov 0   ;;  %vm80_vm1 = vcmask 392192   ;;  %s5525_s0 = inlined_call_operand.vmem [shape: f32[34,48], index: 0, kind: input, shape index: {}]   ;;  %s5526_s1 = inlined_call_operand.vmem [shape: bf16[48,32], index: 1, kind: input, shape index: {}]   ;;  %s5527_s2 = inlined_call_operand.vmem [shape: f32[37,32], index: 2, kind: input, shape index: {}]   ;;  %s5528_s3 = inlined_call_operand.vmem [shape: f32[34,136], index: 3, kind: input, shape index: {}]   ;;  %s5529_s4 = inlined_call_operand.vmem [shape: bf16[136,34], index: 4, kind: input, shape index: {}]   ;;  %s5530_s5 = inlined_call_operand.vmem [shape: f32[136,32], index: 5, kind: input, shape index: {}]   ;;  %s5531_s6 = inlined_call_operand.vmem [shape: bf16[2,4,32,32], index: 6, kind: input, shape index: {}]   ;;  %s5532_s7 = inlined_call_operand.vmem [shape: bf16[2,32,128], index: 7, kind: input, shape index: {}]   ;;  %s5533_s8 = inlined_call_operand.vmem [shape: bf16[2,128,32], index: 8, kind: input, shape index: {}]   ;;  %s5534_s9 = inlined_call_operand.vmem [shape: f32[2,9,32], index: 9, kind: input, shape index: {}]   ;;  %s5535_s10 = inlined_call_operand.vmem [shape: f32[2,1,128], index: 10, kind: input, shape index: {}]   ;;  %s5536_s11 = inlined_call_operand.vmem [shape: bf16[32,10], index: 11, kind: input, shape index: {}]   ;;  %s5537_s12 = inlined_call_operand.hbm [shape: f32[2,10], index: 12, kind: output, shape index: {}]  }
   0x1   :  { %v3823_v0 = vld [vmem:[%s5526_s1] sm:$0xff]   ;;  %3397 = vmatprep.subr.bf16.mxu0 %v5543_v1  ;;  %3415 = vmatprep.subr.bf16.mxu1 %v5543_v1  ;;  %v3824_v2 = vld [vmem:[%s5526_s1 + $0x8] sm:$0xff]   ;;  %v3825_v3 = vld [vmem:[%s5526_s1 + $0x10] sm:$0xff]  }
   0x2   :  { %3398 = vmatpush3.bf16.msra.mxu0 %v3823_v0  ;;  %3403 = vmatprep.mubr.msk.bf16.mxu0 %vm4058_vm0, %v5543_v1  ;;  %v43_v4 = vld [vmem:[%s5525_s0] sm:$0xff]  ;;  %v44_v5 = vld [vmem:[%s5525_s0 + $0x8] sm:$0xff]  ;;  %v45_v7 = vld [vmem:[%s5525_s0 + $0x10] sm:$0xff] }
   0x3   :  { %3399 = vmatprep.subr.bf16.mxu0 %v5543_v1  ;;  %3419 = vmatprep.mubr.msk.bf16.mxu1 %vm4058_vm0, %v5543_v1  ;;  %v48_v6 = vpack.c.bf16 %v44_v5, %v43_v4  ;;  %v46_v8 = vld [vmem:[%s5525_s0 + $0x18] sm:$0xff]  ;;  %v47_v10 = vld [vmem:[%s5525_s0 + $0x20] sm:$0x3] }
   0x4   :  { %v49_v9 = vpack.c.bf16 %v46_v8, %v45_v7  ;;  %v50_v11 = vpack.c.bf16 %v47_v10, %v47_v10 }
   0x6   :  { %3400 = vmatpush3.bf16.msra.mxu0 %v3824_v2 }
   0x7   :  { %3401 = vmatprep.subr.bf16.mxu0 %v5543_v1 }
   0xa   :  { %3402 = vmatpush3.bf16.msra.mxu0 %v3825_v3 }
   0xb   :  { %3473 = vmatprep.subr.bf16.mxu0 %v5543_v1 }
   0xd   :  { %3404 = vmatmul.mubr.msk.bf16.vlgmr.msra.gmra.mrb[0].mxu0 %vm80_vm1, %v48_v6 }
   0xe   :  { %3407 = vmatprep.mubr.msk.bf16.mxu0 %vm4058_vm0, %v5543_v1 }
  0x15   :  { %3408 = vmatmul.mubr.msk.bf16.gmra.mrb[4].mxu0 %vm80_vm1, %v49_v9 }
  0x16   :  { %3411 = vmatprep.mubr.msk.bf16.mxu0 %vm4058_vm0, %v5543_v1 }
  0x1d   :  { %3412 = vmatmul.mubr.msk.bf16.gmra.mrb[8].mxu0 %vm80_vm1, %v50_v11 }
  0x1e   :  { %3477 = vmatprep.mubr.msk.bf16.mxu0 %vm4058_vm0, %v5543_v1 }
  0x1f   :  { %17 = vsyncpa [#allocation3], 0  ;;  %v57_v12 = vld [vmem:[%s5527_s2] sm:$0xff]  ;;  %v58_v14 = vld [vmem:[%s5527_s2 + $0x8] sm:$0xff]  ;;  %vm201_vm2 = vcmask 261120   ;;  %vm214_vm3 = vcmask 254976   ;;  %v269_v7 = vlaneseq }
  0x20   :  { %v59_v21 = vld [vmem:[%s5527_s2 + $0x10] sm:$0xff]  ;;  %v60_v24 = vld [vmem:[%s5527_s2 + $0x18] sm:$0xff]  ;;  %v61_v31 = vld [vmem:[%s5527_s2 + $0x20] sm:$0x3]  ;;  %vm446_vm4 = vcmask 1040384   ;;  %vm418_vm5 = vcmask 277504  }
  0x21   :  { %v3826_v0 = vld [vmem:[%s5531_s6] sm:$0xff]   ;;  %v3827_v2 = vld [vmem:[%s5531_s6 + $0x8] sm:$0xff]   ;;  %v4218_v11 = vshrl.u32 %v269_v7, 7  ;;  %vm1060_vm6 = vcmask 1043456   ;;  %vm982_vm7 = vcmask 64512   ;;  %vm999_vm8 = vcmask 1041408  }
  0x22   :  { %3416 = vmatpush3.bf16.msra.mxu1 %v3826_v0  ;;  %v3838_v0 = vld [vmem:[%s5531_s6 + $0x20] sm:$0xff]   ;;  %vm1001_vm9 = vcmask 58368   ;;  %s4060_s13 = smov [#allocation2]   ;;  %vm3050_vm10 = vcmask 74752  }
  0x23   :  { %3417 = vmatprep.subr.bf16.mxu1 %v5543_v1  ;;  %s3058_s14 = sshll.u32 %s4060_s13, 4  ;;  %s3059_s14 = int_to_ptr.vmem [resolvable:$true] %s3058_s14 }
  0x24   :  { %s4033_s1 = scalar_lea.vmem %s3059_s14, 32  ;;  %p4038_p1 = scmp.lt.s32.totalorder %s3059_s14, %s3059_s14 }
  0x25   :  { %p4034_p0 = scmp.ne.s32.totalorder %s3059_s14, %s4033_s1  ;;  %p4039_p2 = scmp.lt.s32.totalorder %s4033_s1, %s4033_s1 }
  0x26   :  { %3418 = vmatpush3.bf16.msra.mxu1 %v3827_v2  ;;  %v3839_v2 = vld [vmem:[%s5531_s6 + $0x18] sm:$0xff]  }
  0x27   :  { %3431 = vmatprep.subr.bf16.mxu1 %v5543_v1  ;;  %p4040_p3 = por %p4039_p2, %p4038_p1 }
  0x29   :  { %p4041_p4 = pnand %p4040_p3, %p4034_p0 }
  0xe0   :  { %v124_v13 = vpop.f32.mrb[0].mxu0 }
  0xe1   :  { %v4171_v15 = vadd.f32 %v124_v13, %v57_v12  ;;  %v3405_v16 = vpop.f32.mrb[1].mxu0 }
  0xe2   :  { %v127_v17 = vpop.f32.mrb[2].mxu0  ;;  %v5542_v16 = vsub.s32 0, %v4218_v11 }
  0xe3   :  { %v4173_v18 = vadd.f32 %v127_v17, %v58_v14  ;;  %v3406_v19 = vpop.f32.mrb[3].mxu0  ;;  %v202_v20 = vsel %vm201_vm2, %v4171_v15, 0.0 }
  0xe4   :  { %203 = vadd.xlane.f32.xlu0 %v202_v20  ;;  %v4224_v19 = vld [vmem:[%s5534_s9] sm:$0xff] }
  0xe5   :  { %v205_v22 = vsel %vm201_vm2, %v4173_v18, 0.0 }
  0xe8   :  { %206 = vadd.xlane.f32.xlu0 %v205_v22  ;;  %v132_v23 = vpop.f32.mrb[4].mxu0 }
  0xe9   :  { %v4185_v25 = vadd.f32 %v132_v23, %v59_v21  ;;  %v3409_v26 = vpop.f32.mrb[5].mxu0 }
  0xea   :  { %v135_v27 = vpop.f32.mrb[6].mxu0  ;;  %v5541_v26 = vsub.s32 1, %v4218_v11 }
  0xeb   :  { %v4187_v28 = vadd.f32 %v135_v27, %v60_v24  ;;  %v3410_v29 = vpop.f32.mrb[7].mxu0  ;;  %v208_v30 = vsel %vm201_vm2, %v4185_v25, 0.0  ;;  %v272_v24 = vrot.slane %v4224_v19, %v5542_v16 }
  0xec   :  { %209 = vadd.xlane.f32.xlu1 %v208_v30 }
  0xed   :  { %v211_v32 = vsel %vm201_vm2, %v4187_v28, 0.0 }
  0xf0   :  { %212 = vadd.xlane.f32.xlu1 %v211_v32  ;;  %v140_v33 = vpop.f32.mrb[8].mxu0 }
  0xf1   :  { %v4196_v34 = vadd.f32 %v140_v33, %v61_v31  ;;  %v3413_v35 = vpop.f32.mrb[9].mxu0  ;;  %v281_v33 = vrot.slane %v4224_v19, %v5541_v26 }
  0xf2   :  { %v143_v36 = vpop.f32.mrb[10].mxu0 }
  0xf3   :  { %v215_v37 = vsel %vm214_vm3, %v4196_v34, 0.0  ;;  %v3414_v38 = vpop.f32.mrb[11].mxu0 }
  0xf4   :  { %216 = vadd.xlane.f32.xlu0 %v215_v37 }
 0x171   :  { %v204_v39 = vpop.xlane.xlu0 %203 }
 0x172   :  { %v219_v40 = vmul.f32 0.03125, %v204_v39 }
 0x174   :  { %v224_v41 = vsub.f32 %v4171_v15, %v219_v40 }
 0x175   :  { %v207_v42 = vpop.xlane.xlu0 %206 }
 0x176   :  { %v220_v43 = vmul.f32 0.03125, %v207_v42  ;;  %v229_v44 = vmul.f32 %v224_v41, %v224_v41 }
 0x178   :  { %v225_v45 = vsub.f32 %v4173_v18, %v220_v43  ;;  %v234_v46 = vsel %vm201_vm2, %v229_v44, 0.0 }
 0x179   :  { %v210_v47 = vpop.xlane.xlu1 %209  ;;  %235 = vadd.xlane.f32.xlu1 %v234_v46 }
 0x17a   :  { %v221_v48 = vmul.f32 0.03125, %v210_v47  ;;  %v230_v49 = vmul.f32 %v225_v45, %v225_v45 }
 0x17c   :  { %v226_v50 = vsub.f32 %v4185_v25, %v221_v48  ;;  %v237_v51 = vsel %vm201_vm2, %v230_v49, 0.0 }
 0x17d   :  { %v213_v52 = vpop.xlane.xlu1 %212  ;;  %238 = vadd.xlane.f32.xlu0 %v237_v51 }
 0x17e   :  { %v222_v53 = vmul.f32 0.03125, %v213_v52  ;;  %v231_v54 = vmul.f32 %v226_v50, %v226_v50 }
 0x180   :  { %v227_v55 = vsub.f32 %v4187_v28, %v222_v53  ;;  %v240_v56 = vsel %vm201_vm2, %v231_v54, 0.0  ;;  %v3828_v54 = vld [vmem:[%s5529_s4] sm:$0xff]  }
 0x181   :  { %241 = vadd.xlane.f32.xlu1 %v240_v56  ;;  %v217_v57 = vpop.xlane.xlu0 %216  ;;  %v3830_v56 = vld [vmem:[%s5529_s4 + $0x10] sm:$0xff]  }
 0x182   :  { %v223_v58 = vmul.f32 0.03125, %v217_v57  ;;  %v232_v59 = vmul.f32 %v227_v55, %v227_v55  ;;  %v3831_v57 = vld [vmem:[%s5529_s4 + $0x18] sm:$0xff]  }
 0x184   :  { %v228_v60 = vsub.f32 %v4196_v34, %v223_v58  ;;  %v243_v61 = vsel %vm201_vm2, %v232_v59, 0.0  ;;  %v3832_v58 = vld [vmem:[%s5529_s4 + $0x20] sm:$0xff]   ;;  %v3833_v59 = vld [vmem:[%s5529_s4 + $0x28] sm:$0xff]  }
 0x185   :  { %244 = vadd.xlane.f32.xlu0 %v243_v61  ;;  %v3835_v61 = vld [vmem:[%s5529_s4 + $0x38] sm:$0xff]  }
 0x186   :  { %v233_v62 = vmul.f32 %v228_v60, %v228_v60 }
 0x188   :  { %v246_v63 = vsel %vm214_vm3, %v233_v62, 0.0  ;;  %v3836_v62 = vld [vmem:[%s5529_s4 + $0x40] ss:$0 sps:$4 sm:$0xff]  }
 0x189   :  { %247 = vadd.xlane.f32.xlu1 %v246_v63  ;;  %v3837_v63 = vld [vmem:[%s5531_s6 + $0x10] sm:$0xff]  }
 0x18a   :  { %3474 = vmatpush3.bf16.msra.mxu0 %v3837_v63 }
 0x18b   :  { %3475 = vmatprep.subr.bf16.mxu0 %v5543_v1 }
 0x18e   :  { %3476 = vmatpush3.bf16.msra.mxu0 %v3839_v2 }
 0x206   :  { %v236_v3 = vpop.xlane.xlu1 %235 }
 0x207   :  { %v249_v4 = vmul.f32 0.03125, %v236_v3  ;;  %v3840_v3 = vld [vmem:[%s5531_s6 + $0x28] sm:$0xff]  }
 0x209   :  { %v254_v5 = vadd.f32 1e-06, %v249_v4  ;;  %v5540_v4 = vsub.s32 2, %v4218_v11 }
 0x20a   :  { %v239_v6 = vpop.xlane.xlu0 %238 }
 0x20b   :  { %3873 = vrsqrt.f32 %v254_v5  ;;  %v250_v8 = vmul.f32 0.03125, %v239_v6  ;;  %v4318_v5 = vrot.slane %v4224_v19, %v5540_v4 }
 0x20d   :  { %v255_v9 = vadd.f32 1e-06, %v250_v8 }
 0x20e   :  { %v242_v10 = vpop.xlane.xlu1 %241 }
 0x20f   :  { %3875 = vrsqrt.f32 %v255_v9  ;;  %v251_v12 = vmul.f32 0.03125, %v242_v10 }
 0x211   :  { %v256_v13 = vadd.f32 1e-06, %v251_v12 }
 0x212   :  { %v245_v14 = vpop.xlane.xlu0 %244 }
 0x213   :  { %3877 = vrsqrt.f32 %v256_v13  ;;  %v252_v17 = vmul.f32 0.03125, %v245_v14 }
 0x215   :  { %v3874_v20 = vpop.eup %3873  ;;  %v257_v21 = vadd.f32 1e-06, %v252_v17 }
 0x216   :  { %v264_v22 = vmul.f32 %v3874_v20, %v224_v41  ;;  %v248_v23 = vpop.xlane.xlu1 %247 }
 0x217   :  { %3879 = vrsqrt.f32 %v257_v21  ;;  %v253_v27 = vmul.f32 0.03125, %v248_v23 }
 0x218   :  { %v273_v32 = vmul.f32 %v272_v24, %v264_v22 }
 0x219   :  { %v3876_v29 = vpop.eup %3875  ;;  %v258_v30 = vadd.f32 1e-06, %v253_v27 }
 0x21a   :  { %v265_v31 = vmul.f32 %v3876_v29, %v225_v45  ;;  %v282_v38 = vadd.f32 %v281_v33, %v273_v32 }
 0x21b   :  { %3881 = vrsqrt.f32 %v258_v30 }
 0x21c   :  { %v274_v35 = vmul.f32 %v272_v24, %v265_v31 }
 0x21d   :  { %v3878_v36 = vpop.eup %3877 }
 0x21e   :  { %v266_v37 = vmul.f32 %v3878_v36, %v226_v50  ;;  %v283_v39 = vadd.f32 %v281_v33, %v274_v35 }
 0x220   :  { %v287_v40 = vpack.c.bf16 %v283_v39, %v282_v38  ;;  %v275_v43 = vmul.f32 %v272_v24, %v266_v37 }
 0x221   :  { %v3880_v41 = vpop.eup %3879 }
 0x222   :  { %v267_v42 = vmul.f32 %v3880_v41, %v227_v55  ;;  %3420 = vmatmul.mubr.msk.bf16.vlgmr.msra.gmra.mrb[0].mxu1 %vm201_vm2, %v287_v40  ;;  %v284_v46 = vadd.f32 %v281_v33, %v275_v43  ;;  %v3829_v55 = vld [vmem:[%s5529_s4 + $0x8] sm:$0xff]  }
 0x223   :  { %3432 = vmatpush3.bf16.msra.mxu1 %v287_v40  ;;  %3423 = vmatprep.mubr.msk.bf16.mxu1 %vm4058_vm0, %v5543_v1 }
 0x224   :  { %3433 = vmatprep.subr.bf16.mxu1 %v5543_v1  ;;  %v276_v44 = vmul.f32 %v272_v24, %v267_v42 }
 0x225   :  { %v3882_v45 = vpop.eup %3881 }
 0x226   :  { %v285_v47 = vadd.f32 %v281_v33, %v276_v44  ;;  %v268_v48 = vmul.f32 %v3882_v45, %v228_v60  ;;  %v3834_v60 = vld [vmem:[%s5529_s4 + $0x30] sm:$0xff]  }
 0x228   :  { %v288_v49 = vpack.c.bf16 %v285_v47, %v284_v46  ;;  %v277_v50 = vmul.f32 %v272_v24, %v268_v48 }
 0x22a   :  { %3424 = vmatmul.mubr.msk.bf16.gmra.mrb[4].mxu1 %vm201_vm2, %v288_v49  ;;  %v286_v51 = vadd.f32 %v281_v33, %v277_v50 }
 0x22b   :  { %3434 = vmatpush3.bf16.msra.mxu1 %v288_v49  ;;  %3427 = vmatprep.mubr.msk.bf16.mxu1 %vm4058_vm0, %v5543_v1 }
 0x22c   :  { %3435 = vmatprep.subr.bf16.mxu1 %v5543_v1  ;;  %v289_v52 = vpack.c.bf16 %v286_v51, %v286_v51 }
 0x22e   :  { %v447_v53 = vsel %vm446_vm4, %v289_v52, 0 }
 0x22f   :  { %3436 = vmatpush3.bf16.msra.mxu1 %v447_v53 }
 0x230   :  { %3513 = vmatprep.subr.bf16.mxu1 %v5543_v1 }
 0x232   :  { %3428 = vmatmul.mubr.msk.bf16.gmra.mrb[8].mxu1 %vm201_vm2, %v289_v52 }
 0x233   :  { %3437 = vmatprep.mubr.msk.bf16.mxu1 %vm4058_vm0, %v5543_v1 }
 0x23a   :  { %3438 = vmatmul.mubr.msk.bf16.vlgmr.msra.gmra.mrb[12].mxu1 %vm418_vm5, %v3828_v54 }
 0x23b   :  { %3441 = vmatprep.mubr.msk.bf16.mxu1 %vm4058_vm0, %v5543_v1  ;;  %3514 = vmatpush3.bf16.msra.mxu1 %v3838_v0 }
 0x23c   :  { %3515 = vmatprep.subr.bf16.mxu1 %v5543_v1 }
 0x23f   :  { %3516 = vmatpush3.bf16.msra.mxu1 %v3840_v3 }
 0x242   :  { %3442 = vmatmul.mubr.msk.bf16.gmra.mrb[16].mxu1 %vm418_vm5, %v3829_v55 }
 0x243   :  { %3445 = vmatprep.mubr.msk.bf16.mxu1 %vm4058_vm0, %v5543_v1 }
 0x24a   :  { %3446 = vmatmul.mubr.msk.bf16.gmra.mrb[20].mxu1 %vm418_vm5, %v3830_v56 }
 0x24b   :  { %3449 = vmatprep.mubr.msk.bf16.mxu1 %vm4058_vm0, %v5543_v1 }
 0x252   :  { %3450 = vmatmul.mubr.msk.bf16.gmra.mrb[24].mxu1 %vm418_vm5, %v3831_v57 }
 0x253   :  { %3453 = vmatprep.mubr.msk.bf16.mxu1 %vm4058_vm0, %v5543_v1 }
 0x25a   :  { %3454 = vmatmul.mubr.msk.bf16.gmra.mrb[28].mxu1 %vm418_vm5, %v3832_v58 }
 0x25b   :  { %3457 = vmatprep.mubr.msk.bf16.mxu1 %vm4058_vm0, %v5543_v1 }
 0x262   :  { %3458 = vmatmul.mubr.msk.bf16.gmra.mrb[32].mxu1 %vm418_vm5, %v3833_v59 }
 0x263   :  { %3461 = vmatprep.mubr.msk.bf16.mxu1 %vm4058_vm0, %v5543_v1 }
 0x26a   :  { %3462 = vmatmul.mubr.msk.bf16.gmra.mrb[36].mxu1 %vm418_vm5, %v3834_v60 }
 0x26b   :  { %3465 = vmatprep.mubr.msk.bf16.mxu1 %vm4058_vm0, %v5543_v1 }
 0x272   :  { %3466 = vmatmul.mubr.msk.bf16.gmra.mrb[40].mxu1 %vm418_vm5, %v3835_v61 }
 0x273   :  { %3469 = vmatprep.mubr.msk.bf16.mxu1 %vm4058_vm0, %v5543_v1 }
 0x27a   :  { %3470 = vmatmul.mubr.msk.bf16.gmra.mrb[44].mxu1 %vm418_vm5, %v3836_v62 }
 0x27b   :  { %3517 = vmatprep.mubr.msk.bf16.mxu1 %vm4058_vm0, %v5543_v1 }
 0x2f5   :  { %v353_v6 = vpop.f32.mrb[0].mxu1 }
 0x2f6   :  { %v3421_v7 = vpop.f32.mrb[1].mxu1  ;;  %v4321_v9 = vadd.f32 %v353_v6, %v4318_v5 }
 0x2f7   :  { %v356_v8 = vpop.f32.mrb[2].mxu1 }
 0x2f8   :  { %v4324_v10 = vadd.f32 %v356_v8, %v4318_v5  ;;  %v3422_v12 = vpop.f32.mrb[3].mxu1 }
 0x2fa   :  { %v873_v13 = vpack.c.bf16 %v4324_v10, %v4321_v9 }
 0x2fd   :  { %v361_v14 = vpop.f32.mrb[4].mxu1 }
 0x2fe   :  { %v3425_v17 = vpop.f32.mrb[5].mxu1  ;;  %v4329_v21 = vadd.f32 %v361_v14, %v4318_v5 }
 0x2ff   :  { %v364_v20 = vpop.f32.mrb[6].mxu1 }
 0x300   :  { %v4332_v22 = vadd.f32 %v364_v20, %v4318_v5  ;;  %v3426_v23 = vpop.f32.mrb[7].mxu1 }
 0x305   :  { %v4336_v27 = vpop.f32.mrb[8].mxu1 }
 0x306   :  { %v3429_v29 = vpop.f32.mrb[9].mxu1  ;;  %v370_v10 = vadd.f32 %v4336_v27, %v4318_v5 }
 0x307   :  { %v372_v30 = vpop.f32.mrb[10].mxu1 }
 0x308   :  { %v3430_v31 = vpop.f32.mrb[11].mxu1 }
 0x30d   :  { %v483_v32 = vpop.f32.mrb[12].mxu1 }
 0x30e   :  { %v3439_v33 = vpop.f32.mrb[13].mxu1 }
 0x30f   :  { %v486_v35 = vpop.f32.mrb[14].mxu1  ;;  %v5539_v33 = vsub.s32 3, %v4218_v11 }
 0x310   :  { %v553_v36 = vpack.c.bf16 %v486_v35, %v483_v32  ;;  %v3440_v37 = vpop.f32.mrb[15].mxu1  ;;  %v4059_v32 = vmov 0   ;;  %v5538_v35 = vsub.s32 4, %v4218_v11 }
 0x311   :  { %921 = vmatprep.subr.bf16.mxu0 %v4059_v32  ;;  %1123 = vmatprep.subr.bf16.mxu1 %v4059_v32 }
 0x312   :  { %3478 = vmatmul.mubr.msk.bf16.vlgmr.msra.gmra.mrb[12].mxu0 %vm201_vm2, %v553_v36  ;;  %3518 = vmatmul.mubr.msk.bf16.vlgmr.msra.gmra.mrb[48].mxu1 %vm201_vm2, %v553_v36  ;;  %v4396_v36 = vrot.slane %v4224_v19, %v5539_v33  ;;  %v4401_v37 = vrot.slane %v4224_v19, %v5538_v35 }
 0x313   :  { %3481 = vmatprep.mubr.msk.bf16.mxu0 %vm4058_vm0, %v5543_v1  ;;  %3521 = vmatprep.mubr.msk.bf16.mxu1 %vm4058_vm0, %v5543_v1 }
 0x315   :  { %v491_v38 = vpop.f32.mrb[16].mxu1 }
 0x316   :  { %v3443_v39 = vpop.f32.mrb[17].mxu1 }
 0x317   :  { %v494_v40 = vpop.f32.mrb[18].mxu1 }
 0x318   :  { %v554_v41 = vpack.c.bf16 %v494_v40, %v491_v38  ;;  %v3444_v42 = vpop.f32.mrb[19].mxu1 }
 0x31a   :  { %3482 = vmatmul.mubr.msk.bf16.gmra.mrb[16].mxu0 %vm201_vm2, %v554_v41  ;;  %3522 = vmatmul.mubr.msk.bf16.gmra.mrb[52].mxu1 %vm201_vm2, %v554_v41 }
 0x31b   :  { %3485 = vmatprep.mubr.msk.bf16.mxu0 %vm4058_vm0, %v5543_v1  ;;  %3525 = vmatprep.mubr.msk.bf16.mxu1 %vm4058_vm0, %v5543_v1 }
 0x31d   :  { %v499_v43 = vpop.f32.mrb[20].mxu1 }
 0x31e   :  { %v3447_v44 = vpop.f32.mrb[21].mxu1 }
 0x31f   :  { %v502_v45 = vpop.f32.mrb[22].mxu1  ;;  %v4408_v44 = vld [vmem:[%s5530_s5] sm:$0xff] }
 0x320   :  { %v555_v46 = vpack.c.bf16 %v502_v45, %v499_v43  ;;  %v3448_v47 = vpop.f32.mrb[23].mxu1  ;;  %v4413_v45 = vld [vmem:[%s5530_s5 + $0x8] sm:$0xff] }
 0x322   :  { %3486 = vmatmul.mubr.msk.bf16.gmra.mrb[20].mxu0 %vm201_vm2, %v555_v46  ;;  %3526 = vmatmul.mubr.msk.bf16.gmra.mrb[56].mxu1 %vm201_vm2, %v555_v46 }
 0x323   :  { %3489 = vmatprep.mubr.msk.bf16.mxu0 %vm4058_vm0, %v5543_v1  ;;  %3529 = vmatprep.mubr.msk.bf16.mxu1 %vm4058_vm0, %v5543_v1 }
 0x325   :  { %v507_v48 = vpop.f32.mrb[24].mxu1 }
 0x326   :  { %v3451_v49 = vpop.f32.mrb[25].mxu1 }
 0x327   :  { %v510_v50 = vpop.f32.mrb[26].mxu1 }
 0x328   :  { %v556_v51 = vpack.c.bf16 %v510_v50, %v507_v48  ;;  %v3452_v52 = vpop.f32.mrb[27].mxu1 }
 0x32a   :  { %3490 = vmatmul.mubr.msk.bf16.gmra.mrb[24].mxu0 %vm201_vm2, %v556_v51  ;;  %3530 = vmatmul.mubr.msk.bf16.gmra.mrb[60].mxu1 %vm201_vm2, %v556_v51 }
 0x32b   :  { %3493 = vmatprep.mubr.msk.bf16.mxu0 %vm4058_vm0, %v5543_v1  ;;  %3533 = vmatprep.mubr.msk.bf16.mxu1 %vm4058_vm0, %v5543_v1 }
 0x32d   :  { %v515_v53 = vpop.f32.mrb[28].mxu1 }
 0x32e   :  { %v3455_v54 = vpop.f32.mrb[29].mxu1 }
 0x32f   :  { %v518_v55 = vpop.f32.mrb[30].mxu1 }
 0x330   :  { %v557_v56 = vpack.c.bf16 %v518_v55, %v515_v53  ;;  %v3456_v57 = vpop.f32.mrb[31].mxu1 }
 0x332   :  { %3494 = vmatmul.mubr.msk.bf16.gmra.mrb[28].mxu0 %vm201_vm2, %v557_v56  ;;  %3534 = vmatmul.mubr.msk.bf16.gmra.mrb[64].mxu1 %vm201_vm2, %v557_v56 }
 0x333   :  { %3497 = vmatprep.mubr.msk.bf16.mxu0 %vm4058_vm0, %v5543_v1  ;;  %3537 = vmatprep.mubr.msk.bf16.mxu1 %vm4058_vm0, %v5543_v1 }
 0x335   :  { %v523_v58 = vpop.f32.mrb[32].mxu1 }
 0x336   :  { %v3459_v59 = vpop.f32.mrb[33].mxu1 }
 0x337   :  { %v526_v60 = vpop.f32.mrb[34].mxu1 }
 0x338   :  { %v558_v61 = vpack.c.bf16 %v526_v60, %v523_v58  ;;  %v3460_v62 = vpop.f32.mrb[35].mxu1 }
 0x33a   :  { %3498 = vmatmul.mubr.msk.bf16.gmra.mrb[32].mxu0 %vm201_vm2, %v558_v61  ;;  %3538 = vmatmul.mubr.msk.bf16.gmra.mrb[68].mxu1 %vm201_vm2, %v558_v61 }
 0x33b   :  { %3501 = vmatprep.mubr.msk.bf16.mxu0 %vm4058_vm0, %v5543_v1  ;;  %3541 = vmatprep.mubr.msk.bf16.mxu1 %vm4058_vm0, %v5543_v1 }
 0x33d   :  { %v531_v63 = vpop.f32.mrb[36].mxu1 }
 0x33e   :  { %v3463_v0 = vpop.f32.mrb[37].mxu1 }
 0x33f   :  { %v534_v2 = vpop.f32.mrb[38].mxu1  ;;  %v4433_v0 = vld [vmem:[%s5530_s5 + $0x10] sm:$0xff] }
 0x340   :  { %v559_v3 = vpack.c.bf16 %v534_v2, %v531_v63  ;;  %v3464_v6 = vpop.f32.mrb[39].mxu1  ;;  %v4438_v2 = vld [vmem:[%s5530_s5 + $0x18] sm:$0xff] }
 0x342   :  { %3502 = vmatmul.mubr.msk.bf16.gmra.mrb[36].mxu0 %vm201_vm2, %v559_v3  ;;  %3542 = vmatmul.mubr.msk.bf16.gmra.mrb[72].mxu1 %vm201_vm2, %v559_v3 }
 0x343   :  { %3505 = vmatprep.mubr.msk.bf16.mxu0 %vm4058_vm0, %v5543_v1  ;;  %3545 = vmatprep.mubr.msk.bf16.mxu1 %vm4058_vm0, %v5543_v1 }
 0x345   :  { %v539_v7 = vpop.f32.mrb[40].mxu1 }
 0x346   :  { %v3467_v8 = vpop.f32.mrb[41].mxu1 }
 0x347   :  { %v542_v12 = vpop.f32.mrb[42].mxu1 }
 0x348   :  { %v560_v14 = vpack.c.bf16 %v542_v12, %v539_v7  ;;  %v3468_v17 = vpop.f32.mrb[43].mxu1 }
 0x34a   :  { %3506 = vmatmul.mubr.msk.bf16.gmra.mrb[40].mxu0 %vm201_vm2, %v560_v14  ;;  %3546 = vmatmul.mubr.msk.bf16.gmra.mrb[76].mxu1 %vm201_vm2, %v560_v14 }
 0x34b   :  { %3509 = vmatprep.mubr.msk.bf16.mxu0 %vm4058_vm0, %v5543_v1  ;;  %3549 = vmatprep.mubr.msk.bf16.mxu1 %vm4058_vm0, %v5543_v1 }
 0x34d   :  { %v547_v20 = vpop.f32.mrb[44].mxu1 }
 0x34e   :  { %v561_v23 = vpack.c.bf16 %v547_v20, %v547_v20  ;;  %v3471_v29 = vpop.f32.mrb[45].mxu1 }
 0x34f   :  { %v550_v30 = vpop.f32.mrb[46].mxu1 }
 0x350   :  { %v3472_v31 = vpop.f32.mrb[47].mxu1 }
 0x352   :  { %3510 = vmatmul.mubr.msk.bf16.gmra.mrb[44].mxu0 %vm201_vm2, %v561_v23  ;;  %3550 = vmatmul.mubr.msk.bf16.gmra.mrb[80].mxu1 %vm201_vm2, %v561_v23 }
 0x353   :  { %953 = vmatprep.mubr.bf16.mxu0 %v4059_v32 }
 0x3e5   :  { %v644_v38 = vpop.f32.mrb[12].mxu0  ;;  %v786_v39 = vpop.f32.mrb[48].mxu1 }
 0x3e6   :  { %v645_v40 = vadd.f32 %v644_v38, %v4396_v36  ;;  %v787_v41 = vadd.f32 %v786_v39, %v4401_v37  ;;  %v3479_v42 = vpop.f32.mrb[13].mxu0  ;;  %v3519_v43 = vpop.f32.mrb[49].mxu1 }
 0x3e7   :  { %v647_v19 = vpop.f32.mrb[14].mxu0  ;;  %v789_v46 = vpop.f32.mrb[50].mxu1 }
 0x3e8   :  { %v648_v47 = vadd.f32 %v647_v19, %v4396_v36  ;;  %v790_v48 = vadd.f32 %v789_v46, %v4401_v37  ;;  %v3480_v49 = vpop.f32.mrb[15].mxu0  ;;  %v3520_v50 = vpop.f32.mrb[51].mxu1  ;;  %v714_v51 = vmul.f32 %v645_v40, %v4408_v44  ;;  %v4419_v52 = vmul.f32 %v787_v41, %v4408_v44  ;;  %v4459_v46 = vld [vmem:[%s5530_s5 + $0x20] sm:$0xff] }
 0x3ea   :  { %v715_v53 = vmul.f32 %v648_v47, %v4413_v45  ;;  %v4423_v54 = vmul.f32 %v790_v48, %v4413_v45  ;;  %v4464_v47 = vld [vmem:[%s5530_s5 + $0x28] sm:$0xff] }
 0x3ec   :  { %v876_v55 = vpack.c.bf16 %v715_v53, %v714_v51  ;;  %v1042_v56 = vpack.c.bf16 %v4423_v54, %v4419_v52  ;;  %v875_v52 = vpack.c.bf16 %v370_v10, %v370_v10 }
 0x3ed   :  { %v652_v57 = vpop.f32.mrb[16].mxu0  ;;  %v794_v58 = vpop.f32.mrb[52].mxu1 }
 0x3ee   :  { %v653_v59 = vadd.f32 %v652_v57, %v4396_v36  ;;  %v795_v60 = vadd.f32 %v794_v58, %v4401_v37  ;;  %v3483_v61 = vpop.f32.mrb[17].mxu0  ;;  %v3523_v62 = vpop.f32.mrb[53].mxu1  ;;  %v895_v63 = vsel %vm201_vm2, %v876_v55, 0 }
 0x3ef   :  { %v655_v3 = vpop.f32.mrb[18].mxu0  ;;  %v797_v6 = vpop.f32.mrb[54].mxu1  ;;  %922 = vmatpush1.bf16.xpose.msra.mxu0 %v895_v63 }
 0x3f0   :  { %v656_v7 = vadd.f32 %v655_v3, %v4396_v36  ;;  %v798_v8 = vadd.f32 %v797_v6, %v4401_v37  ;;  %v3484_v12 = vpop.f32.mrb[19].mxu0  ;;  %v3524_v14 = vpop.f32.mrb[55].mxu1  ;;  %923 = vmatprep.subr.bf16.mxu0 %v4059_v32  ;;  %v716_v17 = vmul.f32 %v653_v59, %v4433_v0  ;;  %v4445_v20 = vmul.f32 %v795_v60, %v4433_v0 }
 0x3f2   :  { %v717_v23 = vmul.f32 %v656_v7, %v4438_v2  ;;  %v4449_v29 = vmul.f32 %v798_v8, %v4438_v2 }
 0x3f4   :  { %v877_v30 = vpack.c.bf16 %v717_v23, %v716_v17  ;;  %v4485_v17 = vld [vmem:[%s5530_s5 + $0x30] sm:$0xff]  ;;  %v4490_v23 = vld [vmem:[%s5530_s5 + $0x38] sm:$0xff] }
 0x3f5   :  { %v660_v38 = vpop.f32.mrb[20].mxu0  ;;  %v802_v39 = vpop.f32.mrb[56].mxu1 }
 0x3f6   :  { %v661_v40 = vadd.f32 %v660_v38, %v4396_v36  ;;  %v803_v41 = vadd.f32 %v802_v39, %v4401_v37  ;;  %v3487_v42 = vpop.f32.mrb[21].mxu0  ;;  %v3527_v43 = vpop.f32.mrb[57].mxu1  ;;  %v898_v19 = vsel %vm201_vm2, %v877_v30, 0 }
 0x3f7   :  { %v663_v48 = vpop.f32.mrb[22].mxu0  ;;  %v805_v49 = vpop.f32.mrb[58].mxu1  ;;  %924 = vmatpush1.bf16.xpose.msra.mxu0 %v898_v19 }
 0x3f8   :  { %v664_v50 = vadd.f32 %v663_v48, %v4396_v36  ;;  %v806_v51 = vadd.f32 %v805_v49, %v4401_v37  ;;  %v3488_v53 = vpop.f32.mrb[23].mxu0  ;;  %v3528_v55 = vpop.f32.mrb[59].mxu1  ;;  %925 = vmatprep.subr.bf16.mxu0 %v4059_v32  ;;  %v718_v57 = vmul.f32 %v661_v40, %v4459_v46  ;;  %v4471_v58 = vmul.f32 %v803_v41, %v4459_v46 }
 0x3fa   :  { %v719_v59 = vmul.f32 %v664_v50, %v4464_v47  ;;  %v4475_v60 = vmul.f32 %v806_v51, %v4464_v47 }
 0x3fc   :  { %v878_v61 = vpack.c.bf16 %v719_v59, %v718_v57  ;;  %v5547_v9 = vpack.c.bf16 %v4475_v60, %v4471_v58  ;;  %v149_v58 = vld [vmem:[%s5528_s3 + $0x18] sm:$0xff] }
 0x3fd   :  { %v668_v63 = vpop.f32.mrb[24].mxu0  ;;  %v810_v3 = vpop.f32.mrb[60].mxu1 }
 0x3fe   :  { %v669_v6 = vadd.f32 %v668_v63, %v4396_v36  ;;  %v811_v7 = vadd.f32 %v810_v3, %v4401_v37  ;;  %v3491_v8 = vpop.f32.mrb[25].mxu0  ;;  %v3531_v12 = vpop.f32.mrb[61].mxu1  ;;  %v901_v14 = vsel %vm201_vm2, %v878_v61, 0 }
 0x3ff   :  { %v671_v30 = vpop.f32.mrb[26].mxu0  ;;  %v813_v38 = vpop.f32.mrb[62].mxu1  ;;  %926 = vmatpush1.bf16.xpose.msra.mxu0 %v901_v14 }
 0x400   :  { %v672_v39 = vadd.f32 %v671_v30, %v4396_v36  ;;  %v814_v40 = vadd.f32 %v813_v38, %v4401_v37  ;;  %v3492_v41 = vpop.f32.mrb[27].mxu0  ;;  %v3532_v42 = vpop.f32.mrb[63].mxu1  ;;  %927 = vmatprep.subr.bf16.mxu0 %v4059_v32  ;;  %v720_v43 = vmul.f32 %v669_v6, %v4485_v17  ;;  %v4497_v19 = vmul.f32 %v811_v7, %v4485_v17  ;;  %v4511_v6 = vld [vmem:[%s5530_s5 + $0x40] sm:$0xff]  ;;  %v4516_v7 = vld [vmem:[%s5530_s5 + $0x48] sm:$0xff] }
 0x402   :  { %v721_v48 = vmul.f32 %v672_v39, %v4490_v23  ;;  %v4501_v49 = vmul.f32 %v814_v40, %v4490_v23 }
 0x404   :  { %v879_v50 = vpack.c.bf16 %v721_v48, %v720_v43 }
 0x405   :  { %v676_v53 = vpop.f32.mrb[28].mxu0  ;;  %v818_v55 = vpop.f32.mrb[64].mxu1 }
 0x406   :  { %v677_v57 = vadd.f32 %v676_v53, %v4396_v36  ;;  %v819_v59 = vadd.f32 %v818_v55, %v4401_v37  ;;  %v3495_v61 = vpop.f32.mrb[29].mxu0  ;;  %v3535_v63 = vpop.f32.mrb[65].mxu1  ;;  %v904_v3 = vsel %vm201_vm2, %v879_v50, 0 }
 0x407   :  { %v679_v8 = vpop.f32.mrb[30].mxu0  ;;  %v821_v12 = vpop.f32.mrb[66].mxu1  ;;  %928 = vmatpush1.bf16.xpose.msra.mxu0 %v904_v3 }
 0x408   :  { %v680_v14 = vadd.f32 %v679_v8, %v4396_v36  ;;  %v822_v30 = vadd.f32 %v821_v12, %v4401_v37  ;;  %v3496_v38 = vpop.f32.mrb[31].mxu0  ;;  %v3536_v39 = vpop.f32.mrb[67].mxu1  ;;  %929 = vmatprep.subr.bf16.mxu0 %v4059_v32  ;;  %v722_v40 = vmul.f32 %v677_v57, %v4511_v6  ;;  %v4523_v41 = vmul.f32 %v819_v59, %v4511_v6  ;;  %v4537_v8 = vld [vmem:[%s5530_s5 + $0x50] sm:$0xff]  ;;  %v4542_v12 = vld [vmem:[%s5530_s5 + $0x58] sm:$0xff] }
 0x40a   :  { %v723_v42 = vmul.f32 %v680_v14, %v4516_v7  ;;  %v4527_v43 = vmul.f32 %v822_v30, %v4516_v7 }
 0x40c   :  { %v880_v48 = vpack.c.bf16 %v723_v42, %v722_v40 }
 0x40d   :  { %v684_v53 = vpop.f32.mrb[32].mxu0  ;;  %v826_v55 = vpop.f32.mrb[68].mxu1 }
 0x40e   :  { %v685_v61 = vadd.f32 %v684_v53, %v4396_v36  ;;  %v827_v63 = vadd.f32 %v826_v55, %v4401_v37  ;;  %v3499_v3 = vpop.f32.mrb[33].mxu0  ;;  %v3539_v57 = vpop.f32.mrb[69].mxu1  ;;  %v907_v59 = vsel %vm201_vm2, %v880_v48, 0 }
 0x40f   :  { %v687_v14 = vpop.f32.mrb[34].mxu0  ;;  %v829_v30 = vpop.f32.mrb[70].mxu1  ;;  %930 = vmatpush1.bf16.xpose.msra.mxu0 %v907_v59 }
 0x410   :  { %v688_v38 = vadd.f32 %v687_v14, %v4396_v36  ;;  %v830_v39 = vadd.f32 %v829_v30, %v4401_v37  ;;  %v3500_v40 = vpop.f32.mrb[35].mxu0  ;;  %v3540_v42 = vpop.f32.mrb[71].mxu1  ;;  %931 = vmatprep.subr.bf16.mxu0 %v4059_v32  ;;  %v724_v48 = vmul.f32 %v685_v61, %v4537_v8  ;;  %v4549_v53 = vmul.f32 %v827_v63, %v4537_v8 }
 0x412   :  { %v725_v55 = vmul.f32 %v688_v38, %v4542_v12  ;;  %v4553_v3 = vmul.f32 %v830_v39, %v4542_v12  ;;  %v4563_v38 = vld [vmem:[%s5530_s5 + $0x60] sm:$0xff]  ;;  %v4568_v39 = vld [vmem:[%s5530_s5 + $0x68] sm:$0xff] }
 0x414   :  { %v881_v57 = vpack.c.bf16 %v725_v55, %v724_v48  ;;  %v5550_v5 = vpack.c.bf16 %v4553_v3, %v4549_v53 }
 0x415   :  { %v692_v14 = vpop.f32.mrb[36].mxu0  ;;  %v834_v30 = vpop.f32.mrb[72].mxu1 }
 0x416   :  { %v693_v40 = vadd.f32 %v692_v14, %v4396_v36  ;;  %v835_v42 = vadd.f32 %v834_v30, %v4401_v37  ;;  %v3503_v35 = vpop.f32.mrb[37].mxu0  ;;  %v3543_v61 = vpop.f32.mrb[73].mxu1  ;;  %v910_v63 = vsel %vm201_vm2, %v881_v57, 0 }
 0x417   :  { %v695_v48 = vpop.f32.mrb[38].mxu0  ;;  %v837_v55 = vpop.f32.mrb[74].mxu1  ;;  %932 = vmatpush1.bf16.xpose.msra.mxu0 %v910_v63 }
 0x418   :  { %v696_v14 = vadd.f32 %v695_v48, %v4396_v36  ;;  %v838_v35 = vadd.f32 %v837_v55, %v4401_v37  ;;  %v3504_v30 = vpop.f32.mrb[39].mxu0  ;;  %v3544_v61 = vpop.f32.mrb[75].mxu1  ;;  %933 = vmatprep.subr.bf16.mxu0 %v4059_v32  ;;  %v726_v57 = vmul.f32 %v693_v40, %v4563_v38  ;;  %v4575_v33 = vmul.f32 %v835_v42, %v4563_v38 }
 0x41a   :  { %v727_v4 = vmul.f32 %v696_v14, %v4568_v39  ;;  %v4579_v26 = vmul.f32 %v838_v35, %v4568_v39  ;;  %v4589_v14 = vld [vmem:[%s5530_s5 + $0x70] sm:$0xff] }
 0x41c   :  { %v882_v16 = vpack.c.bf16 %v727_v4, %v726_v57  ;;  %v4594_v4 = vld [vmem:[%s5530_s5 + $0x78] sm:$0xff]  ;;  %v5551_v54 = vpack.c.bf16 %v4579_v26, %v4575_v33  ;;  %v4667_v26 = vpack.c.bf16 %v4438_v2, %v4433_v0  ;;  %v4673_v33 = vpack.c.bf16 %v4464_v47, %v4459_v46  ;;  %v147_v2 = vld [vmem:[%s5528_s3 + $0x8] sm:$0xff] }
 0x41d   :  { %v700_v48 = vpop.f32.mrb[40].mxu0  ;;  %v842_v55 = vpop.f32.mrb[76].mxu1  ;;  %v4691_v0 = vpack.c.bf16 %v4542_v12, %v4537_v8  ;;  %v150_v12 = vld [vmem:[%s5528_s3 + $0x20] sm:$0xff] }
 0x41e   :  { %v701_v30 = vadd.f32 %v700_v48, %v4396_v36  ;;  %v843_v61 = vadd.f32 %v842_v55, %v4401_v37  ;;  %v3507_v1 = vpop.f32.mrb[41].mxu0  ;;  %v3547_v40 = vpop.f32.mrb[77].mxu1  ;;  %v913_v42 = vsel %vm201_vm2, %v882_v16, 0 }
 0x41f   :  { %v703_v35 = vpop.f32.mrb[42].mxu0  ;;  %v845_v57 = vpop.f32.mrb[78].mxu1  ;;  %934 = vmatpush1.bf16.xpose.msra.mxu0 %v913_v42  ;;  %v4606_v42 = vld [vmem:[%s5530_s5 + $0x80] sm:$0xff] }
 0x420   :  { %v704_v48 = vadd.f32 %v703_v35, %v4396_v36  ;;  %v846_v1 = vadd.f32 %v845_v57, %v4401_v37  ;;  %v3508_v55 = vpop.f32.mrb[43].mxu0  ;;  %v3548_v40 = vpop.f32.mrb[79].mxu1  ;;  %935 = vmatprep.subr.bf16.mxu0 %v4059_v32  ;;  %v728_v16 = vmul.f32 %v701_v30, %v4589_v14  ;;  %v870_v63 = vmul.f32 %v843_v61, %v4589_v14 }
 0x422   :  { %v729_v59 = vmul.f32 %v704_v48, %v4594_v4  ;;  %v871_v50 = vmul.f32 %v846_v1, %v4594_v4 }
 0x424   :  { %v883_v51 = vpack.c.bf16 %v729_v59, %v728_v16  ;;  %v1049_v62 = vpack.c.bf16 %v871_v50, %v870_v63  ;;  %v153_v16 = vld [vmem:[%s5528_s3 + $0x38] sm:$0xff] }
 0x425   :  { %v708_v35 = vpop.f32.mrb[44].mxu0  ;;  %v850_v57 = vpop.f32.mrb[80].mxu1 }
 0x426   :  { %v709_v55 = vadd.f32 %v708_v35, %v4396_v36  ;;  %v3511_v40 = vpop.f32.mrb[45].mxu0  ;;  %v3551_v24 = vpop.f32.mrb[81].mxu1  ;;  %v916_v30 = vsel %vm201_vm2, %v883_v51, 0  ;;  %v5546_v36 = vpack.c.bf16 %v4332_v22, %v4329_v21  ;;  %v5549_v21 = vpack.c.bf16 %v4527_v43, %v4523_v41  ;;  %v151_v43 = vld [vmem:[%s5528_s3 + $0x28] sm:$0xff] }
 0x427   :  { %v711_v61 = vpop.f32.mrb[46].mxu0  ;;  %v853_v31 = vpop.f32.mrb[82].mxu1  ;;  %936 = vmatpush1.bf16.xpose.msra.mxu0 %v916_v30  ;;  %v5545_v24 = vpack.c.bf16 %v4449_v29, %v4445_v20  ;;  %v851_v22 = vadd.f32 %v850_v57, %v4401_v37  ;;  %v5552_v20 = vmov 0.0   ;;  %v4662_v29 = vpack.c.bf16 %v4413_v45, %v4408_v44  ;;  %v152_v57 = vld [vmem:[%s5528_s3 + $0x30] sm:$0xff] }
 0x428   :  { %v730_v48 = vmul.f32 %v709_v55, %v4606_v42  ;;  %v3512_v59 = vpop.f32.mrb[47].mxu0  ;;  %v3552_v50 = vpop.f32.mrb[83].mxu1  ;;  %937 = vmatprep.subr.bf16.mxu0 %v4059_v32  ;;  %v4679_v44 = vpack.c.bf16 %v4490_v23, %v4485_v17  ;;  %v4685_v45 = vpack.c.bf16 %v4516_v7, %v4511_v6  ;;  %v146_v31 = vld [vmem:[%s5528_s3] sm:$0xff] }
 0x429   :  { %v872_v27 = vmul.f32 %v851_v22, %v4606_v42  ;;  %1124 = vmatpush1.bf16.msra.mxu1 %v4662_v29 }
 0x42a   :  { %v884_v63 = vpack.c.bf16 %v730_v48, %v730_v48  ;;  %1125 = vmatprep.subr.bf16.mxu1 %v4059_v32 }
 0x42c   :  { %v919_v1 = vsel %vm201_vm2, %v884_v63, 0  ;;  %v154_v63 = vld [vmem:[%s5528_s3 + $0x40] sm:$0x3] }
 0x42d   :  { %1126 = vmatpush1.bf16.msra.mxu1 %v4667_v26 }
 0x42e   :  { %1127 = vmatprep.subr.bf16.mxu1 %v4059_v32 }
 0x42f   :  { %938 = vmatpush1.bf16.xpose.msra.mxu0 %v919_v1 }
 0x430   :  { %1064 = vmatprep.subr.bf16.mxu0 %v4059_v32 }
 0x431   :  { %1128 = vmatpush1.bf16.msra.mxu1 %v4673_v33 }
 0x432   :  { %1129 = vmatprep.subr.bf16.mxu1 %v4059_v32 }
 0x435   :  { %1130 = vmatpush1.bf16.msra.mxu1 %v4679_v44 }
 0x436   :  { %3125 = vmatmul.mubr.msk.bf16.vlgmr.msra.gmra.mrb[48].mxu0 %vm201_vm2, %v873_v13  ;;  %v5548_v13 = vpack.c.bf16 %v4501_v49, %v4497_v19  ;;  %1131 = vmatprep.subr.bf16.mxu1 %v4059_v32 }
 0x437   :  { %1065 = vmatpush1.bf16.msra.mxu0 %v1042_v56  ;;  %963 = vmatprep.mubr.bf16.mxu0 %v4059_v32  ;;  %v1050_v56 = vpack.c.bf16 %v872_v27, %v872_v27 }
 0x438   :  { %1066 = vmatprep.subr.bf16.mxu0 %v4059_v32 }
 0x439   :  { %v1062_v37 = vsel %vm1060_vm6, %v1050_v56, 0  ;;  %1132 = vmatpush1.bf16.msra.mxu1 %v4685_v45  ;;  %v4734_v56 = vpack.c.bf16 %v4568_v39, %v4563_v38 }
 0x43a   :  { %1133 = vmatprep.subr.bf16.mxu1 %v4059_v32 }
 0x43b   :  { %1067 = vmatpush1.bf16.msra.mxu0 %v5545_v24  ;;  %v155_v24 = vld [vmem:[%s5528_s3 + $0x48] sm:$0x3] }
 0x43c   :  { %1068 = vmatprep.subr.bf16.mxu0 %v4059_v32 }
 0x43d   :  { %1134 = vmatpush1.bf16.msra.mxu1 %v4691_v0 }
 0x43e   :  { %3126 = vmatmul.mubr.msk.bf16.gmra.mrb[52].mxu0 %vm201_vm2, %v5546_v36  ;;  %1135 = vmatprep.subr.bf16.mxu1 %v4059_v32 }
 0x43f   :  { %1069 = vmatpush1.bf16.msra.mxu0 %v5547_v9  ;;  %973 = vmatprep.mubr.bf16.mxu0 %v4059_v32 }
 0x440   :  { %1070 = vmatprep.subr.bf16.mxu0 %v4059_v32 }
 0x441   :  { %1136 = vmatpush1.bf16.msra.mxu1 %v4734_v56 }
 0x442   :  { %1137 = vmatprep.subr.bf16.mxu1 %v4059_v32 }
 0x443   :  { %1071 = vmatpush1.bf16.msra.mxu0 %v5548_v13 }
 0x444   :  { %1072 = vmatprep.subr.bf16.mxu0 %v4059_v32 }
 0x446   :  { %3127 = vmatmul.mubr.msk.bf16.gmra.mrb[56].mxu0 %vm201_vm2, %v875_v52 }
 0x447   :  { %1073 = vmatpush1.bf16.msra.mxu0 %v5549_v21 }
 0x448   :  { %1074 = vmatprep.subr.bf16.mxu0 %v4059_v32 }
 0x44b   :  { %1075 = vmatpush1.bf16.msra.mxu0 %v5550_v5 }
 0x44c   :  { %1076 = vmatprep.subr.bf16.mxu0 %v4059_v32 }
 0x44f   :  { %1077 = vmatpush1.bf16.msra.mxu0 %v5551_v54 }
 0x450   :  { %1078 = vmatprep.subr.bf16.mxu0 %v4059_v32 }
 0x453   :  { %1079 = vmatpush1.bf16.msra.mxu0 %v1049_v62  ;;  %v148_v62 = vld [vmem:[%s5528_s3 + $0x10] sm:$0xff] }
 0x454   :  { %1080 = vmatprep.subr.bf16.mxu0 %v4059_v32 }
 0x457   :  { %1081 = vmatpush1.bf16.msra.mxu0 %v1062_v37  ;;  %v4740_v37 = vpack.c.bf16 %v4594_v4, %v4589_v14 }
 0x458   :  { %3553 = vmatprep.subr.bf16.mxu0 %v5552_v20 }
 0x459   :  { %1138 = vmatpush1.bf16.msra.mxu1 %v4740_v37 }
 0x45a   :  { %1139 = vmatprep.subr.bf16.mxu1 %v4059_v32 }
 0x509   :  { %v955_v46 = vpop.f32.mrb[48].mxu0 }
 0x50a   :  { %v957_v47 = vpop.f32.mrb[49].mxu0  ;;  %v956_v23 = vadd.f32 %v955_v46, %v146_v31 }
 0x50b   :  { %v958_v60 = vadd.f32 %v957_v47, %v147_v2  ;;  %v959_v17 = vpop.f32.mrb[50].mxu0  ;;  %v198_v2 = vpack.c.bf16 %v4606_v42, %v4606_v42 }
 0x50c   :  { %v961_v19 = vpop.f32.mrb[51].mxu0  ;;  %v960_v6 = vadd.f32 %v959_v17, %v148_v62 }
 0x50d   :  { %v962_v49 = vadd.f32 %v961_v19, %v149_v58  ;;  %v983_v51 = vsel %vm982_vm7, %v958_v60, -inf  ;;  %v4747_v31 = vsel %vm1060_vm6, %v198_v2, 0 }
 0x50e   :  { %v984_v7 = vmax.f32 %v956_v23, %v983_v51  ;;  %1140 = vmatpush1.bf16.msra.mxu1 %v4747_v31 }
 0x50f   :  { %v987_v41 = vsel %vm982_vm7, %v962_v49, -inf  ;;  %3585 = vmatprep.subr.bf16.mxu1 %v5552_v20 }
 0x510   :  { %985 = vmax.xlane.f32.xlu0 %v984_v7  ;;  %v988_v8 = vmax.f32 %v960_v6, %v987_v41 }
 0x511   :  { %v965_v53 = vpop.f32.mrb[52].mxu0 }
 0x512   :  { %v967_v3 = vpop.f32.mrb[53].mxu0  ;;  %989 = vmax.xlane.f32.xlu1 %v988_v8  ;;  %v966_v40 = vadd.f32 %v965_v53, %v150_v12 }
 0x513   :  { %v968_v35 = vadd.f32 %v967_v3, %v151_v43  ;;  %v969_v55 = vpop.f32.mrb[54].mxu0 }
 0x514   :  { %v971_v30 = vpop.f32.mrb[55].mxu0  ;;  %v970_v59 = vadd.f32 %v969_v55, %v152_v57 }
 0x515   :  { %v972_v61 = vadd.f32 %v971_v30, %v153_v16  ;;  %v991_v48 = vsel %vm982_vm7, %v968_v35, -inf }
 0x516   :  { %v992_v50 = vmax.f32 %v966_v40, %v991_v48 }
 0x517   :  { %v995_v1 = vsel %vm982_vm7, %v972_v61, -inf }
 0x518   :  { %993 = vmax.xlane.f32.xlu0 %v992_v50  ;;  %v996_v36 = vmax.f32 %v970_v59, %v995_v1 }
 0x519   :  { %v975_v9 = vpop.f32.mrb[56].mxu0 }
 0x51a   :  { %v976_v10 = vadd.f32 %v975_v9, %v154_v63  ;;  %v977_v13 = vpop.f32.mrb[57].mxu0  ;;  %997 = vmax.xlane.f32.xlu1 %v996_v36 }
 0x51b   :  { %v978_v52 = vadd.f32 %v977_v13, %v155_v24  ;;  %v979_v21 = vpop.f32.mrb[58].mxu0 }
 0x51c   :  { %v980_v22 = vpop.f32.mrb[59].mxu0  ;;  %v1000_v5 = vsel %vm999_vm8, %v976_v10, -inf  ;;  %v3841_v21 = vld [vmem:[%s5531_s6 + $0x30] sm:$0xff]  }
 0x51d   :  { %v1002_v27 = vsel %vm1001_vm9, %v978_v52, -inf  ;;  %v3842_v22 = vld [vmem:[%s5531_s6 + $0x38] sm:$0xff]  }
 0x51e   :  { %v1003_v54 = vmax.f32 %v1000_v5, %v1002_v27 }
 0x520   :  { %1004 = vmax.xlane.f32.xlu0 %v1003_v54 }
 0x59d   :  { %v986_v38 = vpop.xlane.xlu0 %985 }
 0x59e   :  { %v1006_v39 = vsub.f32 %v956_v23, %v986_v38  ;;  %v1007_v46 = vsub.f32 %v958_v60, %v986_v38 }
 0x59f   :  { %v990_v47 = vpop.xlane.xlu1 %989 }
 0x5a0   :  { %v1016_v14 = vmul.f32 1.442695, %v1006_v39  ;;  %v1018_v4 = vmul.f32 1.442695, %v1007_v46  ;;  %v1008_v58 = vsub.f32 %v960_v6, %v990_v47  ;;  %v1009_v62 = vsub.f32 %v962_v49, %v990_v47 }
 0x5a2   :  { %3883 = vpow2.f32 %v1016_v14  ;;  %v1020_v17 = vmul.f32 1.442695, %v1008_v58  ;;  %v1022_v19 = vmul.f32 1.442695, %v1009_v62 }
 0x5a3   :  { %3885 = vpow2.f32 %v1018_v4 }
 0x5a4   :  { %3887 = vpow2.f32 %v1020_v17 }
 0x5a5   :  { %3889 = vpow2.f32 %v1022_v19  ;;  %v994_v42 = vpop.xlane.xlu0 %993 }
 0x5a6   :  { %v1010_v51 = vsub.f32 %v966_v40, %v994_v42  ;;  %v1011_v7 = vsub.f32 %v968_v35, %v994_v42 }
 0x5a7   :  { %v998_v41 = vpop.xlane.xlu1 %997 }
 0x5a8   :  { %v1024_v43 = vmul.f32 1.442695, %v1010_v51  ;;  %v1026_v8 = vmul.f32 1.442695, %v1011_v7  ;;  %v1012_v12 = vsub.f32 %v970_v59, %v998_v41  ;;  %v1013_v23 = vsub.f32 %v972_v61, %v998_v41 }
 0x5aa   :  { %3891 = vpow2.f32 %v1024_v43  ;;  %v1028_v60 = vmul.f32 1.442695, %v1012_v12  ;;  %v1030_v53 = vmul.f32 1.442695, %v1013_v23 }
 0x5ab   :  { %3893 = vpow2.f32 %v1026_v8 }
 0x5ac   :  { %v3884_v6 = vpop.eup %3883  ;;  %3895 = vpow2.f32 %v1028_v60 }
 0x5ad   :  { %v3886_v49 = vpop.eup %3885  ;;  %3897 = vpow2.f32 %v1030_v53  ;;  %v1005_v3 = vpop.xlane.xlu0 %1004 }
 0x5ae   :  { %v3888_v16 = vpop.eup %3887  ;;  %v1014_v57 = vsub.f32 %v976_v10, %v1005_v3  ;;  %v1015_v55 = vsub.f32 %v978_v52, %v1005_v3 }
 0x5af   :  { %v3890_v30 = vpop.eup %3889  ;;  %v1036_v40 = vpack.c.bf16 %v3888_v16, %v3884_v6 }
 0x5b0   :  { %v1032_v35 = vmul.f32 1.442695, %v1014_v57  ;;  %v1034_v48 = vmul.f32 1.442695, %v1015_v55  ;;  %v1037_v50 = vpack.c.bf16 %v3890_v30, %v3886_v49 }
 0x5b2   :  { %3128 = vmatprep.mubr.msk.bf16.mxu0 %vm982_vm7, %v1037_v50  ;;  %3131 = vmatprep.mubr.msk.bf16.mxu1 %vm982_vm7, %v1037_v50  ;;  %3899 = vpow2.f32 %v1034_v48 }
 0x5b3   :  { %1097 = vmatmul.mubr.bf16.vlgmr.msra.gmra.mrb[60].mxu0 %v1036_v40  ;;  %1156 = vmatmul.mubr.bf16.vlgmr.msra.gmra.mrb[84].mxu1 %v1036_v40  ;;  %3901 = vpow2.f32 %v1032_v35 }
 0x5b4   :  { %v3892_v61 = vpop.eup %3891  ;;  %3554 = vmatpush3.bf16.msra.mxu0 %v3841_v21 }
 0x5b5   :  { %v3894_v59 = vpop.eup %3893  ;;  %3555 = vmatprep.subr.bf16.mxu0 %v5552_v20 }
 0x5b6   :  { %v3896_v63 = vpop.eup %3895 }
 0x5b7   :  { %v3898_v1 = vpop.eup %3897  ;;  %v1038_v24 = vpack.c.bf16 %v3896_v63, %v3892_v61  ;;  %v1281_v63 = vsub.s32 5, %v4218_v11 }
 0x5b8   :  { %v1039_v36 = vpack.c.bf16 %v3898_v1, %v3894_v59  ;;  %3556 = vmatpush3.bf16.msra.mxu0 %v3842_v22  ;;  %v4782_v1 = vld [vmem:[%s5534_s9] sm:$0xff] }
 0x5b9   :  { %3569 = vmatprep.subr.bf16.mxu0 %v5552_v20 }
 0x5ba   :  { %3129 = vmatprep.mubr.msk.bf16.mxu0 %vm982_vm7, %v1039_v36  ;;  %3132 = vmatprep.mubr.msk.bf16.mxu1 %vm982_vm7, %v1039_v36 }
 0x5bb   :  { %1105 = vmatmul.mubr.bf16.gmra.mrb[64].mxu0 %v1038_v24  ;;  %1164 = vmatmul.mubr.bf16.gmra.mrb[88].mxu1 %v1038_v24  ;;  %v1282_v24 = vrot.slane %v4782_v1, %v1281_v63 }
 0x5bc   :  { %v3900_v9 = vpop.eup %3899 }
 0x5bd   :  { %v3902_v10 = vpop.eup %3901  ;;  %v1041_v13 = vpack.c.bf16 %v3900_v9, %v3900_v9 }
 0x5be   :  { %v1040_v52 = vpack.c.bf16 %v3902_v10, %v3902_v10 }
 0x5bf   :  { %3130 = vmatprep.mubr.msk.bf16.mxu0 %vm982_vm7, %v1041_v13  ;;  %3133 = vmatprep.mubr.msk.bf16.mxu1 %vm982_vm7, %v1041_v13 }
 0x5c3   :  { %1113 = vmatmul.mubr.bf16.gmra.mrb[68].mxu0 %v1040_v52  ;;  %1172 = vmatmul.mubr.bf16.gmra.mrb[92].mxu1 %v1040_v52 }
 0x5c4   :  { %3557 = vmatprep.mubr.msk.bf16.mxu0 %vm4058_vm0, %v5552_v20  ;;  %3601 = vmatprep.mubr.msk.bf16.mxu1 %vm4058_vm0, %v5552_v20 }
 0x686   :  { %v1098_v5 = vpop.f32.mrb[60].mxu0  ;;  %v1157_v27 = vpop.f32.mrb[84].mxu1 }
 0x687   :  { %3903 = vrcp.f32 %v1157_v27  ;;  %v1100_v54 = vpop.f32.mrb[61].mxu0  ;;  %v1159_v2 = vpop.f32.mrb[85].mxu1 }
 0x688   :  { %v1101_v38 = vpop.f32.mrb[62].mxu0  ;;  %v1160_v39 = vpop.f32.mrb[86].mxu1 }
 0x689   :  { %3905 = vrcp.f32 %v1160_v39  ;;  %v1103_v46 = vpop.f32.mrb[63].mxu0  ;;  %v1162_v47 = vpop.f32.mrb[87].mxu1 }
 0x68e   :  { %v1106_v14 = vpop.f32.mrb[64].mxu0  ;;  %v1165_v4 = vpop.f32.mrb[88].mxu1 }
 0x68f   :  { %3907 = vrcp.f32 %v1165_v4  ;;  %v1108_v58 = vpop.f32.mrb[65].mxu0  ;;  %v1167_v62 = vpop.f32.mrb[89].mxu1 }
 0x690   :  { %v1109_v17 = vpop.f32.mrb[66].mxu0  ;;  %v1168_v19 = vpop.f32.mrb[90].mxu1 }
 0x691   :  { %v3904_v42 = vpop.eup %3903  ;;  %3909 = vrcp.f32 %v1168_v19  ;;  %v1111_v51 = vpop.f32.mrb[67].mxu0 }
 0x692   :  { %v1170_v7 = vpop.f32.mrb[91].mxu1  ;;  %v1184_v41 = vmul.f32 %v3904_v42, %v1098_v5 }
 0x693   :  { %v3906_v43 = vpop.eup %3905 }
 0x694   :  { %v1185_v8 = vmul.f32 %v3906_v43, %v1101_v38 }
 0x696   :  { %v1189_v12 = vpack.c.bf16 %v1185_v8, %v1184_v41  ;;  %v1114_v23 = vpop.f32.mrb[68].mxu0  ;;  %v1173_v60 = vpop.f32.mrb[92].mxu1 }
 0x697   :  { %3911 = vrcp.f32 %v1173_v60  ;;  %v1116_v53 = vpop.f32.mrb[69].mxu0  ;;  %v1175_v6 = vpop.f32.mrb[93].mxu1 }
 0x698   :  { %v1117_v49 = vpop.f32.mrb[70].mxu0  ;;  %v1176_v3 = vpop.f32.mrb[94].mxu1  ;;  %3558 = vmatmul.mubr.msk.bf16.vlgmr.msra.gmra.mrb[72].mxu0 %vm201_vm2, %v1189_v12 }
 0x699   :  { %v3908_v16 = vpop.eup %3907  ;;  %v1118_v57 = vpop.f32.mrb[71].mxu0  ;;  %3561 = vmatprep.mubr.msk.bf16.mxu0 %vm4058_vm0, %v5552_v20 }
 0x69a   :  { %v1177_v55 = vpop.f32.mrb[95].mxu1  ;;  %v1186_v30 = vmul.f32 %v3908_v16, %v1106_v14 }
 0x69b   :  { %v3910_v40 = vpop.eup %3909 }
 0x69c   :  { %v1187_v35 = vmul.f32 %v3910_v40, %v1109_v17 }
 0x69e   :  { %v1190_v48 = vpack.c.bf16 %v1187_v35, %v1186_v30 }
 0x6a0   :  { %3562 = vmatmul.mubr.msk.bf16.gmra.mrb[76].mxu0 %vm201_vm2, %v1190_v48 }
 0x6a1   :  { %v3912_v50 = vpop.eup %3911  ;;  %3565 = vmatprep.mubr.msk.bf16.mxu0 %vm4058_vm0, %v5552_v20 }
 0x6a2   :  { %v1188_v61 = vmul.f32 %v3912_v50, %v1114_v23 }
 0x6a4   :  { %v1191_v59 = vpack.c.bf16 %v1188_v61, %v1188_v61 }
 0x6a8   :  { %3566 = vmatmul.mubr.msk.bf16.gmra.mrb[80].mxu0 %vm201_vm2, %v1191_v59 }
 0x6a9   :  { %3573 = vmatprep.mubr.msk.bf16.mxu0 %vm4058_vm0, %v5552_v20 }
 0x76b   :  { %v1252_v36 = vpop.f32.mrb[72].mxu0 }
 0x76c   :  { %v1274_v9 = vadd.f32 %v1252_v36, %v4171_v15  ;;  %v3559_v10 = vpop.f32.mrb[73].mxu0 }
 0x76d   :  { %v1255_v13 = vpop.f32.mrb[74].mxu0  ;;  %v3843_v10 = vld [vmem:[%s5532_s7] sm:$0xff]  }
 0x76e   :  { %v4788_v52 = vadd.f32 %v1282_v24, %v1274_v9  ;;  %v1275_v21 = vadd.f32 %v1255_v13, %v4173_v18  ;;  %v3560_v22 = vpop.f32.mrb[75].mxu0  ;;  %3570 = vmatpush3.bf16.msra.mxu0 %v3843_v10  ;;  %v3844_v13 = vld [vmem:[%s5532_s7 + $0x8] sm:$0xff]  }
 0x76f   :  { %3571 = vmatprep.subr.bf16.mxu0 %v5552_v20  ;;  %v3846_v22 = vld [vmem:[%s5533_s8 + $0x8] sm:$0xff]  }
 0x770   :  { %v4791_v5 = vadd.f32 %v1282_v24, %v1275_v21  ;;  %v1288_v27 = vsel %vm201_vm2, %v4788_v52, 0.0  ;;  %v3845_v21 = vld [vmem:[%s5533_s8] sm:$0xff]  }
 0x771   :  { %1289 = vadd.xlane.f32.xlu1 %v1288_v27  ;;  %3586 = vmatpush3.bf16.msra.mxu1 %v3845_v21  ;;  %v3849_v21 = vld [vmem:[%s5533_s8 + $0x20] sm:$0xff]  }
 0x772   :  { %v1291_v54 = vsel %vm201_vm2, %v4791_v5, 0.0  ;;  %3572 = vmatpush3.bf16.msra.mxu0 %v3844_v13  ;;  %3587 = vmatprep.subr.bf16.mxu1 %v5552_v20  ;;  %v3847_v13 = vld [vmem:[%s5533_s8 + $0x10] sm:$0xff]  }
 0x773   :  { %1292 = vadd.xlane.f32.xlu0 %v1291_v54  ;;  %v1260_v2 = vpop.f32.mrb[76].mxu0  ;;  %3613 = vmatprep.subr.bf16.mxu0 %v5552_v20 }
 0x774   :  { %v1276_v15 = vadd.f32 %v1260_v2, %v4185_v25  ;;  %v3563_v38 = vpop.f32.mrb[77].mxu0 }
 0x775   :  { %v1263_v39 = vpop.f32.mrb[78].mxu0  ;;  %3588 = vmatpush3.bf16.msra.mxu1 %v3846_v22  ;;  %v3850_v22 = vld [vmem:[%s5533_s8 + $0x28] sm:$0xff]  }
 0x776   :  { %v4798_v46 = vadd.f32 %v1282_v24, %v1276_v15  ;;  %v1277_v18 = vadd.f32 %v1263_v39, %v4187_v28  ;;  %v3564_v47 = vpop.f32.mrb[79].mxu0  ;;  %3589 = vmatprep.subr.bf16.mxu1 %v5552_v20 }
 0x778   :  { %v4801_v14 = vadd.f32 %v1282_v24, %v1277_v18  ;;  %v1294_v4 = vsel %vm201_vm2, %v4798_v46, 0.0 }
 0x779   :  { %1295 = vadd.xlane.f32.xlu1 %v1294_v4  ;;  %v1355_v4 = vsub.s32 6, %v4218_v11  ;;  %3590 = vmatpush3.bf16.msra.mxu1 %v3847_v13 }
 0x77a   :  { %v1297_v58 = vsel %vm201_vm2, %v4801_v14, 0.0  ;;  %3591 = vmatprep.subr.bf16.mxu1 %v5552_v20 }
 0x77b   :  { %1298 = vadd.xlane.f32.xlu0 %v1297_v58  ;;  %v1268_v62 = vpop.f32.mrb[80].mxu0 }
 0x77c   :  { %v1278_v25 = vadd.f32 %v1268_v62, %v4196_v34  ;;  %v3567_v17 = vpop.f32.mrb[81].mxu0 }
 0x77d   :  { %v1271_v19 = vpop.f32.mrb[82].mxu0 }
 0x77e   :  { %v4808_v42 = vadd.f32 %v1282_v24, %v1278_v25  ;;  %v3568_v51 = vpop.f32.mrb[83].mxu0  ;;  %v1356_v19 = vrot.slane %v4782_v1, %v1355_v4 }
 0x77f   :  { %v1364_v51 = vsub.s32 7, %v4218_v11 }
 0x780   :  { %v1300_v28 = vsel %vm214_vm3, %v4808_v42, 0.0 }
 0x781   :  { %1301 = vadd.xlane.f32.xlu1 %v1300_v28 }
 0x7fe   :  { %v1290_v7 = vpop.xlane.xlu1 %1289 }
 0x7ff   :  { %v1303_v41 = vmul.f32 0.03125, %v1290_v7 }
 0x800   :  { %v1293_v43 = vpop.xlane.xlu0 %1292 }
 0x801   :  { %v1308_v8 = vsub.f32 %v4788_v52, %v1303_v41  ;;  %v1304_v12 = vmul.f32 0.03125, %v1293_v43 }
 0x803   :  { %v4814_v23 = vsub.f32 %v4791_v5, %v1304_v12  ;;  %v1313_v60 = vmul.f32 %v1308_v8, %v1308_v8 }
 0x805   :  { %v1318_v34 = vsel %vm201_vm2, %v1313_v60, 0.0  ;;  %v1314_v53 = vmul.f32 %v4814_v23, %v4814_v23  ;;  %v1365_v60 = vrot.slane %v4782_v1, %v1364_v51 }
 0x806   :  { %v1296_v6 = vpop.xlane.xlu1 %1295  ;;  %1319 = vadd.xlane.f32.xlu0 %v1318_v34 }
 0x807   :  { %v1305_v49 = vmul.f32 0.03125, %v1296_v6  ;;  %v1321_v3 = vsel %vm201_vm2, %v1314_v53, 0.0 }
 0x808   :  { %v1299_v16 = vpop.xlane.xlu0 %1298  ;;  %1322 = vadd.xlane.f32.xlu1 %v1321_v3 }
 0x809   :  { %v1310_v57 = vsub.f32 %v4798_v46, %v1305_v49  ;;  %v1306_v55 = vmul.f32 0.03125, %v1299_v16 }
 0x80b   :  { %v1311_v30 = vsub.f32 %v4801_v14, %v1306_v55  ;;  %v1315_v40 = vmul.f32 %v1310_v57, %v1310_v57 }
 0x80d   :  { %v1324_v35 = vsel %vm201_vm2, %v1315_v40, 0.0  ;;  %v1316_v48 = vmul.f32 %v1311_v30, %v1311_v30 }
 0x80e   :  { %1325 = vadd.xlane.f32.xlu0 %v1324_v35  ;;  %v1302_v50 = vpop.xlane.xlu1 %1301 }
 0x80f   :  { %v1307_v61 = vmul.f32 0.03125, %v1302_v50  ;;  %v1327_v59 = vsel %vm201_vm2, %v1316_v48, 0.0 }
 0x810   :  { %1328 = vadd.xlane.f32.xlu1 %v1327_v59 }
 0x811   :  { %v1312_v24 = vsub.f32 %v4808_v42, %v1307_v61 }
 0x813   :  { %v1317_v36 = vmul.f32 %v1312_v24, %v1312_v24 }
 0x815   :  { %v1330_v9 = vsel %vm214_vm3, %v1317_v36, 0.0 }
 0x816   :  { %1331 = vadd.xlane.f32.xlu0 %v1330_v9 }
 0x893   :  { %v1320_v27 = vpop.xlane.xlu0 %1319 }
 0x894   :  { %v1333_v54 = vmul.f32 0.03125, %v1320_v27  ;;  %v3851_v27 = vld [vmem:[%s5533_s8 + $0x30] sm:$0xff]  }
 0x895   :  { %v1323_v2 = vpop.xlane.xlu1 %1322 }
 0x896   :  { %v1338_v15 = vadd.f32 1e-06, %v1333_v54  ;;  %v1334_v38 = vmul.f32 0.03125, %v1323_v2  ;;  %v3852_v54 = vld [vmem:[%s5533_s8 + $0x38] sm:$0xff]   ;;  %v3143_v2 = vld [vmem:[%s5535_s10] ss:$0 sm:$0xff] }
 0x898   :  { %3913 = vrsqrt.f32 %v1338_v15  ;;  %v1339_v39 = vadd.f32 1e-06, %v1334_v38 }
 0x89a   :  { %3915 = vrsqrt.f32 %v1339_v39 }
 0x89b   :  { %v1326_v18 = vpop.xlane.xlu0 %1325 }
 0x89c   :  { %v1335_v47 = vmul.f32 0.03125, %v1326_v18 }
 0x89d   :  { %v1329_v58 = vpop.xlane.xlu1 %1328 }
 0x89e   :  { %v1340_v62 = vadd.f32 1e-06, %v1335_v47  ;;  %v1336_v25 = vmul.f32 0.03125, %v1329_v58 }
 0x8a0   :  { %3917 = vrsqrt.f32 %v1340_v62  ;;  %v1341_v17 = vadd.f32 1e-06, %v1336_v25 }
 0x8a2   :  { %v3914_v28 = vpop.eup %3913  ;;  %3919 = vrsqrt.f32 %v1341_v17 }
 0x8a3   :  { %v1348_v7 = vmul.f32 %v3914_v28, %v1308_v8  ;;  %v1332_v41 = vpop.xlane.xlu0 %1331 }
 0x8a4   :  { %v3916_v43 = vpop.eup %3915  ;;  %v1337_v12 = vmul.f32 0.03125, %v1332_v41 }
 0x8a5   :  { %v1357_v34 = vmul.f32 %v1356_v19, %v1348_v7  ;;  %v1349_v53 = vmul.f32 %v3916_v43, %v4814_v23 }
 0x8a6   :  { %v1342_v6 = vadd.f32 1e-06, %v1337_v12 }
 0x8a7   :  { %v1358_v49 = vmul.f32 %v1356_v19, %v1349_v53  ;;  %v1366_v3 = vadd.f32 %v1365_v60, %v1357_v34 }
 0x8a8   :  { %3921 = vrsqrt.f32 %v1342_v6 }
 0x8a9   :  { %v1367_v16 = vadd.f32 %v1365_v60, %v1358_v49 }
 0x8aa   :  { %v3918_v55 = vpop.eup %3917 }
 0x8ab   :  { %v1350_v40 = vmul.f32 %v3918_v55, %v1310_v57  ;;  %v1371_v35 = vpack.c.bf16 %v1367_v16, %v1366_v3 }
 0x8ac   :  { %v3920_v48 = vpop.eup %3919 }
 0x8ad   :  { %v1351_v8 = vmul.f32 %v3920_v48, %v1311_v30  ;;  %3574 = vmatmul.mubr.msk.bf16.vlgmr.msra.gmra.mrb[84].mxu0 %vm201_vm2, %v1371_v35  ;;  %v1359_v50 = vmul.f32 %v1356_v19, %v1350_v40 }
 0x8ae   :  { %3577 = vmatprep.mubr.msk.bf16.mxu0 %vm4058_vm0, %v5552_v20 }
 0x8af   :  { %v1360_v1 = vmul.f32 %v1356_v19, %v1351_v8  ;;  %v1368_v61 = vadd.f32 %v1365_v60, %v1359_v50 }
 0x8b1   :  { %v1369_v59 = vadd.f32 %v1365_v60, %v1360_v1 }
 0x8b2   :  { %v3922_v23 = vpop.eup %3921 }
 0x8b3   :  { %v1372_v36 = vpack.c.bf16 %v1369_v59, %v1368_v61  ;;  %v1352_v9 = vmul.f32 %v3922_v23, %v1312_v24  ;;  %v3848_v24 = vld [vmem:[%s5533_s8 + $0x18] sm:$0xff]  }
 0x8b4   :  { %3592 = vmatpush3.bf16.msra.mxu1 %v3848_v24 }
 0x8b5   :  { %3578 = vmatmul.mubr.msk.bf16.gmra.mrb[88].mxu0 %vm201_vm2, %v1372_v36  ;;  %v1361_v10 = vmul.f32 %v1356_v19, %v1352_v9  ;;  %3593 = vmatprep.subr.bf16.mxu1 %v5552_v20 }
 0x8b6   :  { %3581 = vmatprep.mubr.msk.bf16.mxu0 %vm4058_vm0, %v5552_v20 }
 0x8b7   :  { %v1370_v57 = vadd.f32 %v1365_v60, %v1361_v10 }
 0x8b8   :  { %3594 = vmatpush3.bf16.msra.mxu1 %v3849_v21 }
 0x8b9   :  { %v1373_v30 = vpack.c.bf16 %v1370_v57, %v1370_v57  ;;  %3595 = vmatprep.subr.bf16.mxu1 %v5552_v20 }
 0x8bc   :  { %3596 = vmatpush3.bf16.msra.mxu1 %v3850_v22 }
 0x8bd   :  { %3582 = vmatmul.mubr.msk.bf16.gmra.mrb[92].mxu0 %vm201_vm2, %v1373_v30  ;;  %3597 = vmatprep.subr.bf16.mxu1 %v5552_v20 }
 0x8be   :  { %3617 = vmatprep.mubr.msk.bf16.mxu0 %vm4058_vm0, %v5552_v20 }
 0x8c0   :  { %3598 = vmatpush3.bf16.msra.mxu1 %v3851_v27 }
 0x8c1   :  { %3599 = vmatprep.subr.bf16.mxu1 %v5552_v20 }
 0x8c4   :  { %3600 = vmatpush3.bf16.msra.mxu1 %v3852_v54 }
 0x8c5   :  { %3629 = vmatprep.subr.bf16.mxu1 %v5552_v20 }
 0x980   :  { %v1440_v15 = vpop.f32.mrb[84].mxu0 }
 0x981   :  { %v1441_v38 = vadd.f32 %v3143_v2, %v1440_v15  ;;  %v3575_v39 = vpop.f32.mrb[85].mxu0 }
 0x982   :  { %v1443_v18 = vpop.f32.mrb[86].mxu0 }
 0x983   :  { %v1467_v47 = vmul.f32 0.70710677, %v1441_v38  ;;  %v1444_v58 = vadd.f32 %v3143_v2, %v1443_v18  ;;  %v3576_v62 = vpop.f32.mrb[87].mxu0  ;;  %v1462_v55 = vmul.f32 0.5, %v1441_v38  ;;  %v3157_v38 = vld [vmem:[%s5534_s9 + $0x8] ss:$0 sm:$0xff] }
 0x985   :  { %3923 = verf.f32 %v1467_v47  ;;  %v1468_v25 = vmul.f32 0.70710677, %v1444_v58  ;;  %v1463_v40 = vmul.f32 0.5, %v1444_v58 }
 0x987   :  { %3925 = verf.f32 %v1468_v25 }
 0x988   :  { %v1448_v17 = vpop.f32.mrb[88].mxu0 }
 0x989   :  { %v1449_v19 = vadd.f32 %v3143_v2, %v1448_v17  ;;  %v3579_v28 = vpop.f32.mrb[89].mxu0 }
 0x98a   :  { %v1451_v7 = vpop.f32.mrb[90].mxu0 }
 0x98b   :  { %v1469_v41 = vmul.f32 0.70710677, %v1449_v19  ;;  %v1452_v43 = vadd.f32 %v3143_v2, %v1451_v7  ;;  %v3580_v12 = vpop.f32.mrb[91].mxu0  ;;  %v1464_v10 = vmul.f32 0.5, %v1449_v19 }
 0x98d   :  { %3927 = verf.f32 %v1469_v41  ;;  %v1470_v60 = vmul.f32 0.70710677, %v1452_v43  ;;  %v1465_v57 = vmul.f32 0.5, %v1452_v43 }
 0x98f   :  { %v3924_v34 = vpop.eup %3923  ;;  %3929 = verf.f32 %v1470_v60 }
 0x990   :  { %v1477_v53 = vadd.f32 1.0, %v3924_v34  ;;  %v1456_v6 = vpop.f32.mrb[92].mxu0 }
 0x991   :  { %v3926_v49 = vpop.eup %3925  ;;  %v1457_v3 = vadd.f32 %v3143_v2, %v1456_v6  ;;  %v3583_v16 = vpop.f32.mrb[93].mxu0 }
 0x992   :  { %v1478_v35 = vadd.f32 1.0, %v3926_v49  ;;  %v1459_v48 = vpop.f32.mrb[94].mxu0  ;;  %v1482_v1 = vmul.f32 %v1477_v53, %v1462_v55 }
 0x993   :  { %v1471_v8 = vmul.f32 0.70710677, %v1457_v3  ;;  %v3584_v50 = vpop.f32.mrb[95].mxu0  ;;  %v1466_v27 = vmul.f32 0.5, %v1457_v3 }
 0x994   :  { %v1483_v61 = vmul.f32 %v1478_v35, %v1463_v40 }
 0x995   :  { %3931 = verf.f32 %v1471_v8 }
 0x996   :  { %v1487_v59 = vpack.c.bf16 %v1483_v61, %v1482_v1 }
 0x997   :  { %v3928_v23 = vpop.eup %3927 }
 0x998   :  { %v1479_v36 = vadd.f32 1.0, %v3928_v23  ;;  %3602 = vmatmul.mubr.bf16.vlgmr.msra.gmra.mrb[96].mxu1 %v1487_v59 }
 0x999   :  { %v3930_v9 = vpop.eup %3929  ;;  %3605 = vmatprep.mubr.msk.bf16.mxu1 %vm4058_vm0, %v5552_v20 }
 0x99a   :  { %v1480_v30 = vadd.f32 1.0, %v3930_v9  ;;  %v1484_v13 = vmul.f32 %v1479_v36, %v1464_v10 }
 0x99c   :  { %v1485_v24 = vmul.f32 %v1480_v30, %v1465_v57 }
 0x99e   :  { %v1488_v21 = vpack.c.bf16 %v1485_v24, %v1484_v13 }
 0x99f   :  { %v3932_v22 = vpop.eup %3931 }
 0x9a0   :  { %v1481_v54 = vadd.f32 1.0, %v3932_v22  ;;  %3606 = vmatmul.mubr.bf16.gmra.mrb[100].mxu1 %v1488_v21 }
 0x9a1   :  { %3609 = vmatprep.mubr.msk.bf16.mxu1 %vm4058_vm0, %v5552_v20 }
 0x9a2   :  { %v1486_v2 = vmul.f32 %v1481_v54, %v1466_v27 }
 0x9a4   :  { %v1489_v15 = vpack.c.bf16 %v1486_v2, %v1486_v2 }
 0x9a8   :  { %3610 = vmatmul.mubr.bf16.gmra.mrb[104].mxu1 %v1489_v15 }
 0x9a9   :  { %3635 = vmatprep.mubr.msk.bf16.mxu1 %vm4058_vm0, %v5552_v20 }
 0xa6b   :  { %v1588_v39 = vpop.f32.mrb[96].mxu1 }
 0xa6c   :  { %v1610_v18 = vadd.f32 %v1588_v39, %v4788_v52  ;;  %v3603_v47 = vpop.f32.mrb[97].mxu1 }
 0xa6d   :  { %v1591_v58 = vpop.f32.mrb[98].mxu1 }
 0xa6e   :  { %v4897_v62 = vadd.f32 %v3157_v38, %v1610_v18  ;;  %v1611_v25 = vadd.f32 %v1591_v58, %v4791_v5  ;;  %v3604_v17 = vpop.f32.mrb[99].mxu1  ;;  %v3853_v58 = vld [vmem:[%s5531_s6 + $0x40] sm:$0xff]  }
 0xa6f   :  { %3614 = vmatpush3.bf16.msra.mxu0 %v3853_v58 }
 0xa70   :  { %v4900_v19 = vadd.f32 %v3157_v38, %v1611_v25  ;;  %v1627_v28 = vsel %vm201_vm2, %v4897_v62, 0.0  ;;  %3615 = vmatprep.subr.bf16.mxu0 %v5552_v20  ;;  %v3854_v25 = vld [vmem:[%s5531_s6 + $0x48] sm:$0xff]  }
 0xa71   :  { %1628 = vadd.xlane.f32.xlu1 %v1627_v28 }
 0xa72   :  { %v1630_v7 = vsel %vm201_vm2, %v4900_v19, 0.0 }
 0xa73   :  { %1631 = vadd.xlane.f32.xlu0 %v1630_v7  ;;  %v1596_v41 = vpop.f32.mrb[100].mxu1  ;;  %3616 = vmatpush3.bf16.msra.mxu0 %v3854_v25 }
 0xa74   :  { %v1612_v52 = vadd.f32 %v1596_v41, %v4798_v46  ;;  %v3607_v43 = vpop.f32.mrb[101].mxu1  ;;  %3671 = vmatprep.subr.bf16.mxu0 %v5552_v20 }
 0xa75   :  { %v1599_v12 = vpop.f32.mrb[102].mxu1 }
 0xa76   :  { %v4907_v60 = vadd.f32 %v3157_v38, %v1612_v52  ;;  %v1613_v5 = vadd.f32 %v1599_v12, %v4801_v14  ;;  %v3608_v34 = vpop.f32.mrb[103].mxu1 }
 0xa78   :  { %v4910_v53 = vadd.f32 %v3157_v38, %v1613_v5  ;;  %v1633_v6 = vsel %vm201_vm2, %v4907_v60, 0.0 }
 0xa79   :  { %1634 = vadd.xlane.f32.xlu1 %v1633_v6  ;;  %v4942_v6 = vld [vmem:[%s5534_s9 + $0x10] sm:$0xff] }
 0xa7a   :  { %v1636_v49 = vsel %vm201_vm2, %v4910_v53, 0.0 }
 0xa7b   :  { %1637 = vadd.xlane.f32.xlu0 %v1636_v49  ;;  %v1604_v3 = vpop.f32.mrb[104].mxu1 }
 0xa7c   :  { %v1614_v46 = vadd.f32 %v1604_v3, %v4808_v42  ;;  %v3611_v16 = vpop.f32.mrb[105].mxu1 }
 0xa7d   :  { %v1607_v55 = vpop.f32.mrb[106].mxu1  ;;  %v5553_v16 = vsub.s32 0, %v4218_v11 }
 0xa7e   :  { %v4917_v40 = vadd.f32 %v3157_v38, %v1614_v46  ;;  %v3612_v35 = vpop.f32.mrb[107].mxu1 }
 0xa7f   :  { %v1695_v55 = vrot.slane %v4942_v6, %v5553_v16  ;;  %v3858_v16 = vld [vmem:[%s5531_s6 + $0x68] sm:$0xff]  }
 0xa80   :  { %v1639_v14 = vsel %vm214_vm3, %v4917_v40, 0.0 }
 0xa81   :  { %1640 = vadd.xlane.f32.xlu1 %v1639_v14 }
 0xafe   :  { %v1629_v48 = vpop.xlane.xlu1 %1628 }
 0xaff   :  { %v1642_v8 = vmul.f32 0.03125, %v1629_v48 }
 0xb00   :  { %v1632_v50 = vpop.xlane.xlu0 %1631 }
 0xb01   :  { %v1647_v1 = vsub.f32 %v4897_v62, %v1642_v8  ;;  %v1643_v61 = vmul.f32 0.03125, %v1632_v50 }
 0xb03   :  { %v1648_v59 = vsub.f32 %v4900_v19, %v1643_v61  ;;  %v1652_v23 = vmul.f32 %v1647_v1, %v1647_v1  ;;  %v5554_v61 = vsub.s32 1, %v4218_v11 }
 0xb05   :  { %v1657_v42 = vsel %vm201_vm2, %v1652_v23, 0.0  ;;  %v1653_v36 = vmul.f32 %v1648_v59, %v1648_v59  ;;  %v1704_v23 = vrot.slane %v4942_v6, %v5554_v61 }
 0xb06   :  { %v1635_v9 = vpop.xlane.xlu1 %1634  ;;  %1658 = vadd.xlane.f32.xlu0 %v1657_v42 }
 0xb07   :  { %v1644_v10 = vmul.f32 0.03125, %v1635_v9  ;;  %v1660_v57 = vsel %vm201_vm2, %v1653_v36, 0.0 }
 0xb08   :  { %v1638_v30 = vpop.xlane.xlu0 %1637  ;;  %1661 = vadd.xlane.f32.xlu1 %v1660_v57 }
 0xb09   :  { %v1649_v13 = vsub.f32 %v4907_v60, %v1644_v10  ;;  %v1645_v24 = vmul.f32 0.03125, %v1638_v30 }
 0xb0b   :  { %v1650_v21 = vsub.f32 %v4910_v53, %v1645_v24  ;;  %v1654_v22 = vmul.f32 %v1649_v13, %v1649_v13 }
 0xb0d   :  { %v1663_v27 = vsel %vm201_vm2, %v1654_v22, 0.0  ;;  %v1655_v54 = vmul.f32 %v1650_v21, %v1650_v21 }
 0xb0e   :  { %1664 = vadd.xlane.f32.xlu0 %v1663_v27  ;;  %v1641_v2 = vpop.xlane.xlu1 %1640 }
 0xb0f   :  { %v1646_v15 = vmul.f32 0.03125, %v1641_v2  ;;  %v1666_v38 = vsel %vm201_vm2, %v1655_v54, 0.0 }
 0xb10   :  { %1667 = vadd.xlane.f32.xlu1 %v1666_v38 }
 0xb11   :  { %v1651_v39 = vsub.f32 %v4917_v40, %v1646_v15 }
 0xb13   :  { %v1656_v18 = vmul.f32 %v1651_v39, %v1651_v39 }
 0xb15   :  { %v1669_v47 = vsel %vm214_vm3, %v1656_v18, 0.0 }
 0xb16   :  { %1670 = vadd.xlane.f32.xlu0 %v1669_v47 }
 0xb93   :  { %v1659_v17 = vpop.xlane.xlu0 %1658 }
 0xb94   :  { %v1672_v28 = vmul.f32 0.03125, %v1659_v17 }
 0xb95   :  { %v1662_v7 = vpop.xlane.xlu1 %1661 }
 0xb96   :  { %v1677_v41 = vadd.f32 1e-06, %v1672_v28  ;;  %v1673_v52 = vmul.f32 0.03125, %v1662_v7  ;;  %v3997_v28 = vld [vmem:[%s5529_s4 + $0x8] sm:$0xff]   ;;  %v3998_v7 = vld [vmem:[%s5529_s4 + $0x10] sm:$0xff]  }
 0xb98   :  { %3933 = vrsqrt.f32 %v1677_v41  ;;  %v1678_v43 = vadd.f32 1e-06, %v1673_v52  ;;  %v3999_v41 = vld [vmem:[%s5529_s4 + $0x18] sm:$0xff]   ;;  %v4000_v52 = vld [vmem:[%s5529_s4 + $0x20] sm:$0xff]  }
 0xb9a   :  { %3935 = vrsqrt.f32 %v1678_v43  ;;  %v4001_v43 = vld [vmem:[%s5529_s4 + $0x28] sm:$0xff]  }
 0xb9b   :  { %v1665_v12 = vpop.xlane.xlu0 %1664 }
 0xb9c   :  { %v1674_v5 = vmul.f32 0.03125, %v1665_v12  ;;  %v4002_v12 = vld [vmem:[%s5529_s4 + $0x30] sm:$0xff]  }
 0xb9d   :  { %v1668_v34 = vpop.xlane.xlu1 %1667 }
 0xb9e   :  { %v1679_v49 = vadd.f32 1e-06, %v1674_v5  ;;  %v1675_v3 = vmul.f32 0.03125, %v1668_v34  ;;  %v4003_v5 = vld [vmem:[%s5529_s4 + $0x38] sm:$0xff]   ;;  %v4004_v34 = vld [vmem:[%s5529_s4 + $0x40] ss:$0 sps:$4 sm:$0xff]  }
 0xba0   :  { %3937 = vrsqrt.f32 %v1679_v49  ;;  %v1680_v46 = vadd.f32 1e-06, %v1675_v3  ;;  %v3855_v49 = vld [vmem:[%s5531_s6 + $0x50] sm:$0xff]   ;;  %v3856_v3 = vld [vmem:[%s5531_s6 + $0x60] sm:$0xff]  }
 0xba2   :  { %v3934_v35 = vpop.eup %3933  ;;  %3939 = vrsqrt.f32 %v1680_v46  ;;  %v3857_v46 = vld [vmem:[%s5531_s6 + $0x58] sm:$0xff]  }
 0xba3   :  { %v1687_v14 = vmul.f32 %v3934_v35, %v1647_v1  ;;  %v1671_v48 = vpop.xlane.xlu0 %1670 }
 0xba4   :  { %v3936_v8 = vpop.eup %3935  ;;  %v1676_v50 = vmul.f32 0.03125, %v1671_v48 }
 0xba5   :  { %v1696_v42 = vmul.f32 %v1695_v55, %v1687_v14  ;;  %v1688_v36 = vmul.f32 %v3936_v8, %v1648_v59 }
 0xba6   :  { %v1681_v9 = vadd.f32 1e-06, %v1676_v50 }
 0xba7   :  { %v1697_v10 = vmul.f32 %v1695_v55, %v1688_v36  ;;  %v1705_v57 = vadd.f32 %v1704_v23, %v1696_v42 }
 0xba8   :  { %3941 = vrsqrt.f32 %v1681_v9 }
 0xba9   :  { %v1706_v30 = vadd.f32 %v1704_v23, %v1697_v10 }
 0xbaa   :  { %v3938_v24 = vpop.eup %3937 }
 0xbab   :  { %v1689_v22 = vmul.f32 %v3938_v24, %v1649_v13  ;;  %v1710_v27 = vpack.c.bf16 %v1706_v30, %v1705_v57 }
 0xbac   :  { %v3940_v54 = vpop.eup %3939 }
 0xbad   :  { %v1690_v2 = vmul.f32 %v3940_v54, %v1650_v21  ;;  %3618 = vmatmul.mubr.msk.bf16.vlgmr.msra.gmra.mrb[96].mxu0 %vm201_vm2, %v1710_v27  ;;  %3630 = vmatpush3.bf16.msra.mxu1 %v1710_v27  ;;  %v1698_v1 = vmul.f32 %v1695_v55, %v1689_v22 }
 0xbae   :  { %3621 = vmatprep.mubr.msk.bf16.mxu0 %vm4058_vm0, %v5552_v20  ;;  %3631 = vmatprep.subr.bf16.mxu1 %v5552_v20 }
 0xbaf   :  { %v1699_v59 = vmul.f32 %v1695_v55, %v1690_v2  ;;  %v1707_v15 = vadd.f32 %v1704_v23, %v1698_v1  ;;  %3672 = vmatpush3.bf16.msra.mxu0 %v3855_v49 }
 0xbb0   :  { %3673 = vmatprep.subr.bf16.mxu0 %v5552_v20 }
 0xbb1   :  { %v1708_v38 = vadd.f32 %v1704_v23, %v1699_v59 }
 0xbb2   :  { %v3942_v18 = vpop.eup %3941 }
 0xbb3   :  { %v1711_v47 = vpack.c.bf16 %v1708_v38, %v1707_v15  ;;  %v1691_v58 = vmul.f32 %v3942_v18, %v1651_v39  ;;  %v3996_v39 = vld [vmem:[%s5529_s4] sm:$0xff]   ;;  %3674 = vmatpush3.bf16.msra.mxu0 %v3857_v46 }
 0xbb4   :  { %2273 = vmatprep.subr.bf16.mxu0 %v4059_v32 }
 0xbb5   :  { %3622 = vmatmul.mubr.msk.bf16.gmra.mrb[100].mxu0 %vm201_vm2, %v1711_v47  ;;  %3632 = vmatpush3.bf16.msra.mxu1 %v1711_v47  ;;  %v1700_v13 = vmul.f32 %v1695_v55, %v1691_v58  ;;  %v5555_v55 = vsub.s32 2, %v4218_v11 }
 0xbb6   :  { %3633 = vmatprep.subr.bf16.mxu1 %v5552_v20  ;;  %3625 = vmatprep.mubr.msk.bf16.mxu0 %vm4058_vm0, %v5552_v20 }
 0xbb7   :  { %v1709_v21 = vadd.f32 %v1704_v23, %v1700_v13  ;;  %v5036_v35 = vrot.slane %v4942_v6, %v5555_v55 }
 0xbb9   :  { %v1712_v25 = vpack.c.bf16 %v1709_v21, %v1709_v21 }
 0xbbb   :  { %v1799_v17 = vsel %vm446_vm4, %v1712_v25, 0 }
 0xbbc   :  { %3634 = vmatpush3.bf16.msra.mxu1 %v1799_v17 }
 0xbbd   :  { %3626 = vmatmul.mubr.msk.bf16.gmra.mrb[104].mxu0 %vm201_vm2, %v1712_v25  ;;  %3711 = vmatprep.subr.bf16.mxu1 %v5552_v20 }
 0xbbe   :  { %3675 = vmatprep.mubr.msk.bf16.mxu0 %vm4058_vm0, %v5552_v20 }
 0xbbf   :  { %3636 = vmatmul.mubr.msk.bf16.vlgmr.msra.gmra.mrb[108].mxu1 %vm418_vm5, %v3996_v39 }
 0xbc0   :  { %3639 = vmatprep.mubr.msk.bf16.mxu1 %vm4058_vm0, %v5552_v20  ;;  %3712 = vmatpush3.bf16.msra.mxu1 %v3856_v3 }
 0xbc1   :  { %3713 = vmatprep.subr.bf16.mxu1 %v5552_v20 }
 0xbc4   :  { %3714 = vmatpush3.bf16.msra.mxu1 %v3858_v16 }
 0xbc5   :  { %2468 = vmatprep.subr.bf16.mxu1 %v4059_v32 }
 0xbc7   :  { %3640 = vmatmul.mubr.msk.bf16.gmra.mrb[112].mxu1 %vm418_vm5, %v3997_v28 }
 0xbc8   :  { %3643 = vmatprep.mubr.msk.bf16.mxu1 %vm4058_vm0, %v5552_v20 }
 0xbcf   :  { %3644 = vmatmul.mubr.msk.bf16.gmra.mrb[116].mxu1 %vm418_vm5, %v3998_v7 }
 0xbd0   :  { %3647 = vmatprep.mubr.msk.bf16.mxu1 %vm4058_vm0, %v5552_v20 }
 0xbd7   :  { %3648 = vmatmul.mubr.msk.bf16.gmra.mrb[120].mxu1 %vm418_vm5, %v3999_v41 }
 0xbd8   :  { %3651 = vmatprep.mubr.msk.bf16.mxu1 %vm4058_vm0, %v5552_v20 }
 0xbdf   :  { %3652 = vmatmul.mubr.msk.bf16.gmra.mrb[124].mxu1 %vm418_vm5, %v4000_v52 }
 0xbe0   :  { %3655 = vmatprep.mubr.msk.bf16.mxu1 %vm4058_vm0, %v5552_v20 }
 0xbe7   :  { %3656 = vmatmul.mubr.msk.bf16.gmra.mrb[128].mxu1 %vm418_vm5, %v4001_v43 }
 0xbe8   :  { %3659 = vmatprep.mubr.msk.bf16.mxu1 %vm4058_vm0, %v5552_v20 }
 0xbef   :  { %3660 = vmatmul.mubr.msk.bf16.gmra.mrb[132].mxu1 %vm418_vm5, %v4002_v12 }
 0xbf0   :  { %3663 = vmatprep.mubr.msk.bf16.mxu1 %vm4058_vm0, %v5552_v20 }
 0xbf7   :  { %3664 = vmatmul.mubr.msk.bf16.gmra.mrb[136].mxu1 %vm418_vm5, %v4003_v5 }
 0xbf8   :  { %3667 = vmatprep.mubr.msk.bf16.mxu1 %vm4058_vm0, %v5552_v20 }
 0xbff   :  { %3668 = vmatmul.mubr.msk.bf16.gmra.mrb[140].mxu1 %vm418_vm5, %v4004_v34 }
 0xc00   :  { %3715 = vmatprep.mubr.msk.bf16.mxu1 %vm4058_vm0, %v5552_v20 }
 0xc80   :  { %v1777_v14 = vpop.f32.mrb[96].mxu0 }
 0xc81   :  { %v3619_v48 = vpop.f32.mrb[97].mxu0  ;;  %v5039_v50 = vadd.f32 %v1777_v14, %v5036_v35 }
 0xc82   :  { %v1780_v8 = vpop.f32.mrb[98].mxu0 }
 0xc83   :  { %v5042_v61 = vadd.f32 %v1780_v8, %v5036_v35  ;;  %v3620_v23 = vpop.f32.mrb[99].mxu0 }
 0xc85   :  { %v2225_v42 = vpack.c.bf16 %v5042_v61, %v5039_v50 }
 0xc88   :  { %v1785_v36 = vpop.f32.mrb[100].mxu0 }
 0xc89   :  { %v3623_v9 = vpop.f32.mrb[101].mxu0  ;;  %v5047_v57 = vadd.f32 %v1785_v36, %v5036_v35 }
 0xc8a   :  { %v1788_v10 = vpop.f32.mrb[102].mxu0 }
 0xc8b   :  { %v5050_v30 = vadd.f32 %v1788_v10, %v5036_v35  ;;  %v3624_v24 = vpop.f32.mrb[103].mxu0 }
 0xc8d   :  { %v2226_v22 = vpack.c.bf16 %v5050_v30, %v5047_v57 }
 0xc90   :  { %v5054_v27 = vpop.f32.mrb[104].mxu0 }
 0xc91   :  { %v3627_v54 = vpop.f32.mrb[105].mxu0  ;;  %v1794_v50 = vadd.f32 %v5054_v27, %v5036_v35 }
 0xc92   :  { %v1796_v2 = vpop.f32.mrb[106].mxu0  ;;  %v1835_v1 = vpop.f32.mrb[108].mxu1 }
 0xc93   :  { %v3628_v59 = vpop.f32.mrb[107].mxu0  ;;  %v3637_v15 = vpop.f32.mrb[109].mxu1  ;;  %v2227_v61 = vpack.c.bf16 %v1794_v50, %v1794_v50 }
 0xc94   :  { %v1838_v38 = vpop.f32.mrb[110].mxu1  ;;  %v5556_v15 = vsub.s32 3, %v4218_v11 }
 0xc95   :  { %v1905_v18 = vpack.c.bf16 %v1838_v38, %v1835_v1  ;;  %v3638_v47 = vpop.f32.mrb[111].mxu1 }
 0xc96   :  { %v5128_v38 = vrot.slane %v4942_v6, %v5556_v15 }
 0xc97   :  { %3676 = vmatmul.mubr.msk.bf16.vlgmr.msra.gmra.mrb[108].mxu0 %vm201_vm2, %v1905_v18  ;;  %3716 = vmatmul.mubr.msk.bf16.vlgmr.msra.gmra.mrb[144].mxu1 %vm201_vm2, %v1905_v18  ;;  %v5557_v18 = vsub.s32 4, %v4218_v11  ;;  %v3864_v11 = vld [vmem:[%s5533_s8 + $0x48] sm:$0xff]  }
 0xc98   :  { %3679 = vmatprep.mubr.msk.bf16.mxu0 %vm4058_vm0, %v5552_v20  ;;  %3719 = vmatprep.mubr.msk.bf16.mxu1 %vm4058_vm0, %v5552_v20 }
 0xc99   :  { %2469 = vmatpush1.bf16.msra.mxu1 %v4662_v29  ;;  %v5133_v47 = vrot.slane %v4942_v6, %v5557_v18  ;;  %v4005_v6 = vld [vmem:[%s5530_s5] sm:$0xff] }
 0xc9a   :  { %v1843_v58 = vpop.f32.mrb[112].mxu1  ;;  %2470 = vmatprep.subr.bf16.mxu1 %v4059_v32 }
 0xc9b   :  { %v3641_v13 = vpop.f32.mrb[113].mxu1 }
 0xc9c   :  { %v1846_v21 = vpop.f32.mrb[114].mxu1 }
 0xc9d   :  { %v1906_v25 = vpack.c.bf16 %v1846_v21, %v1843_v58  ;;  %v3642_v17 = vpop.f32.mrb[115].mxu1  ;;  %2471 = vmatpush1.bf16.msra.mxu1 %v4667_v26 }
 0xc9e   :  { %2472 = vmatprep.subr.bf16.mxu1 %v4059_v32 }
 0xc9f   :  { %3680 = vmatmul.mubr.msk.bf16.gmra.mrb[112].mxu0 %vm201_vm2, %v1906_v25  ;;  %3720 = vmatmul.mubr.msk.bf16.gmra.mrb[148].mxu1 %vm201_vm2, %v1906_v25 }
 0xca0   :  { %3683 = vmatprep.mubr.msk.bf16.mxu0 %vm4058_vm0, %v5552_v20  ;;  %3723 = vmatprep.mubr.msk.bf16.mxu1 %vm4058_vm0, %v5552_v20 }
 0xca1   :  { %2473 = vmatpush1.bf16.msra.mxu1 %v4673_v33 }
 0xca2   :  { %v1851_v29 = vpop.f32.mrb[116].mxu1  ;;  %2474 = vmatprep.subr.bf16.mxu1 %v4059_v32 }
 0xca3   :  { %v3645_v39 = vpop.f32.mrb[117].mxu1 }
 0xca4   :  { %v1854_v28 = vpop.f32.mrb[118].mxu1 }
 0xca5   :  { %v1907_v26 = vpack.c.bf16 %v1854_v28, %v1851_v29  ;;  %v3646_v7 = vpop.f32.mrb[119].mxu1  ;;  %2475 = vmatpush1.bf16.msra.mxu1 %v4679_v44 }
 0xca6   :  { %2476 = vmatprep.subr.bf16.mxu1 %v4059_v32 }
 0xca7   :  { %3684 = vmatmul.mubr.msk.bf16.gmra.mrb[116].mxu0 %vm201_vm2, %v1907_v26  ;;  %3724 = vmatmul.mubr.msk.bf16.gmra.mrb[152].mxu1 %vm201_vm2, %v1907_v26 }
 0xca8   :  { %3687 = vmatprep.mubr.msk.bf16.mxu0 %vm4058_vm0, %v5552_v20  ;;  %3727 = vmatprep.mubr.msk.bf16.mxu1 %vm4058_vm0, %v5552_v20 }
 0xca9   :  { %2477 = vmatpush1.bf16.msra.mxu1 %v4685_v45 }
 0xcaa   :  { %v1859_v33 = vpop.f32.mrb[120].mxu1  ;;  %2478 = vmatprep.subr.bf16.mxu1 %v4059_v32 }
 0xcab   :  { %v3649_v41 = vpop.f32.mrb[121].mxu1 }
 0xcac   :  { %v1862_v52 = vpop.f32.mrb[122].mxu1 }
 0xcad   :  { %v1908_v44 = vpack.c.bf16 %v1862_v52, %v1859_v33  ;;  %v3650_v43 = vpop.f32.mrb[123].mxu1  ;;  %2479 = vmatpush1.bf16.msra.mxu1 %v4691_v0 }
 0xcae   :  { %2480 = vmatprep.subr.bf16.mxu1 %v4059_v32  ;;  %v4006_v43 = vld [vmem:[%s5530_s5 + $0x8] sm:$0xff] }
 0xcaf   :  { %3688 = vmatmul.mubr.msk.bf16.gmra.mrb[120].mxu0 %vm201_vm2, %v1908_v44  ;;  %3728 = vmatmul.mubr.msk.bf16.gmra.mrb[156].mxu1 %vm201_vm2, %v1908_v44 }
 0xcb0   :  { %3691 = vmatprep.mubr.msk.bf16.mxu0 %vm4058_vm0, %v5552_v20  ;;  %3731 = vmatprep.mubr.msk.bf16.mxu1 %vm4058_vm0, %v5552_v20 }
 0xcb1   :  { %2481 = vmatpush1.bf16.msra.mxu1 %v4734_v56 }
 0xcb2   :  { %v1867_v45 = vpop.f32.mrb[124].mxu1  ;;  %2482 = vmatprep.subr.bf16.mxu1 %v4059_v32 }
 0xcb3   :  { %v3653_v12 = vpop.f32.mrb[125].mxu1 }
 0xcb4   :  { %v1870_v5 = vpop.f32.mrb[126].mxu1 }
 0xcb5   :  { %v1909_v0 = vpack.c.bf16 %v1870_v5, %v1867_v45  ;;  %v3654_v34 = vpop.f32.mrb[127].mxu1  ;;  %2483 = vmatpush1.bf16.msra.mxu1 %v4740_v37 }
 0xcb6   :  { %2484 = vmatprep.subr.bf16.mxu1 %v4059_v32 }
 0xcb7   :  { %3692 = vmatmul.mubr.msk.bf16.gmra.mrb[124].mxu0 %vm201_vm2, %v1909_v0  ;;  %3732 = vmatmul.mubr.msk.bf16.gmra.mrb[160].mxu1 %vm201_vm2, %v1909_v0 }
 0xcb8   :  { %3695 = vmatprep.mubr.msk.bf16.mxu0 %vm4058_vm0, %v5552_v20  ;;  %3735 = vmatprep.mubr.msk.bf16.mxu1 %vm4058_vm0, %v5552_v20 }
 0xcb9   :  { %2485 = vmatpush1.bf16.msra.mxu1 %v4747_v31 }
 0xcba   :  { %v1875_v56 = vpop.f32.mrb[128].mxu1  ;;  %3783 = vmatprep.subr.bf16.mxu1 %v5552_v20 }
 0xcbb   :  { %v3657_v49 = vpop.f32.mrb[129].mxu1 }
 0xcbc   :  { %v1878_v3 = vpop.f32.mrb[130].mxu1 }
 0xcbd   :  { %v1910_v37 = vpack.c.bf16 %v1878_v3, %v1875_v56  ;;  %v3658_v46 = vpop.f32.mrb[131].mxu1 }
 0xcbf   :  { %3696 = vmatmul.mubr.msk.bf16.gmra.mrb[128].mxu0 %vm201_vm2, %v1910_v37  ;;  %3736 = vmatmul.mubr.msk.bf16.gmra.mrb[164].mxu1 %vm201_vm2, %v1910_v37 }
 0xcc0   :  { %3699 = vmatprep.mubr.msk.bf16.mxu0 %vm4058_vm0, %v5552_v20  ;;  %3739 = vmatprep.mubr.msk.bf16.mxu1 %vm4058_vm0, %v5552_v20 }
 0xcc2   :  { %v1883_v16 = vpop.f32.mrb[132].mxu1 }
 0xcc3   :  { %v3661_v55 = vpop.f32.mrb[133].mxu1 }
 0xcc4   :  { %v1886_v31 = vpop.f32.mrb[134].mxu1 }
 0xcc5   :  { %v1911_v14 = vpack.c.bf16 %v1886_v31, %v1883_v16  ;;  %v3662_v48 = vpop.f32.mrb[135].mxu1 }
 0xcc7   :  { %3700 = vmatmul.mubr.msk.bf16.gmra.mrb[132].mxu0 %vm201_vm2, %v1911_v14  ;;  %3740 = vmatmul.mubr.msk.bf16.gmra.mrb[168].mxu1 %vm201_vm2, %v1911_v14 }
 0xcc8   :  { %3703 = vmatprep.mubr.msk.bf16.mxu0 %vm4058_vm0, %v5552_v20  ;;  %3743 = vmatprep.mubr.msk.bf16.mxu1 %vm4058_vm0, %v5552_v20 }
 0xcca   :  { %v1891_v8 = vpop.f32.mrb[136].mxu1 }
 0xccb   :  { %v3665_v23 = vpop.f32.mrb[137].mxu1 }
 0xccc   :  { %v1894_v36 = vpop.f32.mrb[138].mxu1 }
 0xccd   :  { %v1912_v9 = vpack.c.bf16 %v1894_v36, %v1891_v8  ;;  %v3666_v10 = vpop.f32.mrb[139].mxu1  ;;  %v4007_v36 = vld [vmem:[%s5530_s5 + $0x10] sm:$0xff] }
 0xccf   :  { %3704 = vmatmul.mubr.msk.bf16.gmra.mrb[136].mxu0 %vm201_vm2, %v1912_v9  ;;  %3744 = vmatmul.mubr.msk.bf16.gmra.mrb[172].mxu1 %vm201_vm2, %v1912_v9 }
 0xcd0   :  { %3707 = vmatprep.mubr.msk.bf16.mxu0 %vm4058_vm0, %v5552_v20  ;;  %3747 = vmatprep.mubr.msk.bf16.mxu1 %vm4058_vm0, %v5552_v20 }
 0xcd2   :  { %v1899_v24 = vpop.f32.mrb[140].mxu1 }
 0xcd3   :  { %v1913_v54 = vpack.c.bf16 %v1899_v24, %v1899_v24  ;;  %v3669_v2 = vpop.f32.mrb[141].mxu1  ;;  %v4008_v24 = vld [vmem:[%s5530_s5 + $0x18] sm:$0xff] }
 0xcd4   :  { %v1902_v1 = vpop.f32.mrb[142].mxu1 }
 0xcd5   :  { %v3670_v59 = vpop.f32.mrb[143].mxu1 }
 0xcd7   :  { %3708 = vmatmul.mubr.msk.bf16.gmra.mrb[140].mxu0 %vm201_vm2, %v1913_v54  ;;  %3748 = vmatmul.mubr.msk.bf16.gmra.mrb[176].mxu1 %vm201_vm2, %v1913_v54 }
 0xcd8   :  { %2305 = vmatprep.mubr.bf16.mxu0 %v4059_v32 }
 0xd6a   :  { %v1996_v58 = vpop.f32.mrb[108].mxu0  ;;  %v2138_v13 = vpop.f32.mrb[144].mxu1 }
 0xd6b   :  { %v1997_v21 = vadd.f32 %v1996_v58, %v5128_v38  ;;  %v2139_v25 = vadd.f32 %v2138_v13, %v5133_v47  ;;  %v3677_v17 = vpop.f32.mrb[109].mxu0  ;;  %v3717_v29 = vpop.f32.mrb[145].mxu1 }
 0xd6c   :  { %v1999_v39 = vpop.f32.mrb[110].mxu0  ;;  %v2141_v28 = vpop.f32.mrb[146].mxu1 }
 0xd6d   :  { %v2000_v26 = vadd.f32 %v1999_v39, %v5128_v38  ;;  %v2142_v7 = vadd.f32 %v2141_v28, %v5133_v47  ;;  %v3678_v33 = vpop.f32.mrb[111].mxu0  ;;  %v3718_v41 = vpop.f32.mrb[147].mxu1  ;;  %v2066_v52 = vmul.f32 %v4005_v6, %v1997_v21  ;;  %v5142_v44 = vmul.f32 %v4005_v6, %v2139_v25 }
 0xd6e   :  { %v4009_v41 = vld [vmem:[%s5530_s5 + $0x20] sm:$0xff] }
 0xd6f   :  { %v2067_v45 = vmul.f32 %v4006_v43, %v2000_v26  ;;  %v5147_v12 = vmul.f32 %v4006_v43, %v2142_v7  ;;  %v4010_v43 = vld [vmem:[%s5530_s5 + $0x28] sm:$0xff] }
 0xd71   :  { %v2228_v5 = vpack.c.bf16 %v2067_v45, %v2066_v52  ;;  %v2391_v0 = vpack.c.bf16 %v5147_v12, %v5142_v44  ;;  %v4023_v12 = vld [vmem:[%s5528_s3] sm:$0xff] }
 0xd72   :  { %v2004_v34 = vpop.f32.mrb[112].mxu0  ;;  %v2146_v56 = vpop.f32.mrb[148].mxu1 }
 0xd73   :  { %v2005_v49 = vadd.f32 %v2004_v34, %v5128_v38  ;;  %v2147_v3 = vadd.f32 %v2146_v56, %v5133_v47  ;;  %v3681_v37 = vpop.f32.mrb[113].mxu0  ;;  %v3721_v46 = vpop.f32.mrb[149].mxu1  ;;  %v2247_v16 = vsel %vm201_vm2, %v2228_v5, 0 }
 0xd74   :  { %v2007_v55 = vpop.f32.mrb[114].mxu0  ;;  %v2149_v31 = vpop.f32.mrb[150].mxu1  ;;  %2274 = vmatpush1.bf16.xpose.msra.mxu0 %v2247_v16 }
 0xd75   :  { %v2008_v14 = vadd.f32 %v2007_v55, %v5128_v38  ;;  %v2150_v48 = vadd.f32 %v2149_v31, %v5133_v47  ;;  %v3682_v8 = vpop.f32.mrb[115].mxu0  ;;  %v3722_v23 = vpop.f32.mrb[151].mxu1  ;;  %2275 = vmatprep.subr.bf16.mxu0 %v4059_v32  ;;  %v2068_v9 = vmul.f32 %v4007_v36, %v2005_v49  ;;  %v5160_v10 = vmul.f32 %v4007_v36, %v2147_v3 }
 0xd77   :  { %v2069_v54 = vmul.f32 %v4008_v24, %v2008_v14  ;;  %v5165_v2 = vmul.f32 %v4008_v24, %v2150_v48  ;;  %v4011_v24 = vld [vmem:[%s5530_s5 + $0x30] sm:$0xff] }
 0xd79   :  { %v2229_v1 = vpack.c.bf16 %v2069_v54, %v2068_v9  ;;  %v2392_v59 = vpack.c.bf16 %v5165_v2, %v5160_v10 }
 0xd7a   :  { %v2012_v15 = vpop.f32.mrb[116].mxu0  ;;  %v2154_v18 = vpop.f32.mrb[152].mxu1 }
 0xd7b   :  { %v2013_v58 = vadd.f32 %v2012_v15, %v5128_v38  ;;  %v2155_v13 = vadd.f32 %v2154_v18, %v5133_v47  ;;  %v3685_v21 = vpop.f32.mrb[117].mxu0  ;;  %v3725_v25 = vpop.f32.mrb[153].mxu1  ;;  %v2250_v17 = vsel %vm201_vm2, %v2229_v1, 0  ;;  %v4012_v15 = vld [vmem:[%s5530_s5 + $0x38] sm:$0xff] }
 0xd7c   :  { %v2015_v29 = vpop.f32.mrb[118].mxu0  ;;  %v2157_v39 = vpop.f32.mrb[154].mxu1  ;;  %2276 = vmatpush1.bf16.xpose.msra.mxu0 %v2250_v17 }
 0xd7d   :  { %v2016_v28 = vadd.f32 %v2015_v29, %v5128_v38  ;;  %v2158_v26 = vadd.f32 %v2157_v39, %v5133_v47  ;;  %v3686_v7 = vpop.f32.mrb[119].mxu0  ;;  %v3726_v33 = vpop.f32.mrb[155].mxu1  ;;  %2277 = vmatprep.subr.bf16.mxu0 %v4059_v32  ;;  %v2070_v6 = vmul.f32 %v4009_v41, %v2013_v58  ;;  %v5178_v52 = vmul.f32 %v4009_v41, %v2155_v13 }
 0xd7f   :  { %v2071_v45 = vmul.f32 %v4010_v43, %v2016_v28  ;;  %v5183_v5 = vmul.f32 %v4010_v43, %v2158_v26 }
 0xd81   :  { %v2230_v34 = vpack.c.bf16 %v2071_v45, %v2070_v6  ;;  %v2393_v56 = vpack.c.bf16 %v5183_v5, %v5178_v52  ;;  %v4025_v52 = vld [vmem:[%s5528_s3 + $0x10] sm:$0xff] }
 0xd82   :  { %v2020_v49 = vpop.f32.mrb[120].mxu0  ;;  %v2162_v3 = vpop.f32.mrb[156].mxu1 }
 0xd83   :  { %v2021_v37 = vadd.f32 %v2020_v49, %v5128_v38  ;;  %v2163_v46 = vadd.f32 %v2162_v3, %v5133_v47  ;;  %v3689_v16 = vpop.f32.mrb[121].mxu0  ;;  %v3729_v55 = vpop.f32.mrb[157].mxu1  ;;  %v2253_v31 = vsel %vm201_vm2, %v2230_v34, 0  ;;  %v4013_v49 = vld [vmem:[%s5530_s5 + $0x40] sm:$0xff] }
 0xd84   :  { %v2023_v14 = vpop.f32.mrb[122].mxu0  ;;  %v2165_v48 = vpop.f32.mrb[158].mxu1  ;;  %2278 = vmatpush1.bf16.xpose.msra.mxu0 %v2253_v31 }
 0xd85   :  { %v2024_v8 = vadd.f32 %v2023_v14, %v5128_v38  ;;  %v2166_v23 = vadd.f32 %v2165_v48, %v5133_v47  ;;  %v3690_v36 = vpop.f32.mrb[123].mxu0  ;;  %v3730_v9 = vpop.f32.mrb[159].mxu1  ;;  %2279 = vmatprep.subr.bf16.mxu0 %v4059_v32  ;;  %v2072_v54 = vmul.f32 %v4011_v24, %v2021_v37  ;;  %v5196_v1 = vmul.f32 %v4011_v24, %v2163_v46  ;;  %v4014_v46 = vld [vmem:[%s5530_s5 + $0x48] sm:$0xff] }
 0xd87   :  { %v2073_v18 = vmul.f32 %v4012_v15, %v2024_v8  ;;  %v5201_v58 = vmul.f32 %v4012_v15, %v2166_v23 }
 0xd89   :  { %v2231_v13 = vpack.c.bf16 %v2073_v18, %v2072_v54  ;;  %v2394_v21 = vpack.c.bf16 %v5201_v58, %v5196_v1 }
 0xd8a   :  { %v2028_v25 = vpop.f32.mrb[124].mxu0  ;;  %v2170_v17 = vpop.f32.mrb[160].mxu1 }
 0xd8b   :  { %v2029_v29 = vadd.f32 %v2028_v25, %v5128_v38  ;;  %v2171_v39 = vadd.f32 %v2170_v17, %v5133_v47  ;;  %v3693_v28 = vpop.f32.mrb[125].mxu0  ;;  %v3733_v26 = vpop.f32.mrb[161].mxu1  ;;  %v2256_v7 = vsel %vm201_vm2, %v2231_v13, 0 }
 0xd8c   :  { %v2031_v33 = vpop.f32.mrb[126].mxu0  ;;  %v2173_v41 = vpop.f32.mrb[162].mxu1  ;;  %2280 = vmatpush1.bf16.xpose.msra.mxu0 %v2256_v7  ;;  %v4016_v7 = vld [vmem:[%s5530_s5 + $0x58] sm:$0xff] }
 0xd8d   :  { %v2032_v6 = vadd.f32 %v2031_v33, %v5128_v38  ;;  %v2174_v43 = vadd.f32 %v2173_v41, %v5133_v47  ;;  %v3694_v45 = vpop.f32.mrb[127].mxu0  ;;  %v3734_v34 = vpop.f32.mrb[163].mxu1  ;;  %2281 = vmatprep.subr.bf16.mxu0 %v4059_v32  ;;  %v2074_v3 = vmul.f32 %v4013_v49, %v2029_v29  ;;  %v5214_v37 = vmul.f32 %v4013_v49, %v2171_v39  ;;  %v4015_v39 = vld [vmem:[%s5530_s5 + $0x50] sm:$0xff] }
 0xd8f   :  { %v2075_v16 = vmul.f32 %v4014_v46, %v2032_v6  ;;  %v5219_v55 = vmul.f32 %v4014_v46, %v2174_v43 }
 0xd91   :  { %v2232_v31 = vpack.c.bf16 %v2075_v16, %v2074_v3  ;;  %v2395_v14 = vpack.c.bf16 %v5219_v55, %v5214_v37  ;;  %v4026_v55 = vld [vmem:[%s5528_s3 + $0x28] sm:$0xff] }
 0xd92   :  { %v2036_v48 = vpop.f32.mrb[128].mxu0  ;;  %v2178_v8 = vpop.f32.mrb[164].mxu1 }
 0xd93   :  { %v2037_v23 = vadd.f32 %v2036_v48, %v5128_v38  ;;  %v2179_v36 = vadd.f32 %v2178_v8, %v5133_v47  ;;  %v3697_v9 = vpop.f32.mrb[129].mxu0  ;;  %v3737_v24 = vpop.f32.mrb[165].mxu1  ;;  %v2259_v54 = vsel %vm201_vm2, %v2232_v31, 0 }
 0xd94   :  { %v2039_v15 = vpop.f32.mrb[130].mxu0  ;;  %v2181_v18 = vpop.f32.mrb[166].mxu1  ;;  %2282 = vmatpush1.bf16.xpose.msra.mxu0 %v2259_v54  ;;  %v4017_v54 = vld [vmem:[%s5530_s5 + $0x60] sm:$0xff] }
 0xd95   :  { %v2040_v13 = vadd.f32 %v2039_v15, %v5128_v38  ;;  %v2182_v25 = vadd.f32 %v2181_v18, %v5133_v47  ;;  %v3698_v17 = vpop.f32.mrb[131].mxu0  ;;  %v3738_v29 = vpop.f32.mrb[167].mxu1  ;;  %2283 = vmatprep.subr.bf16.mxu0 %v4059_v32  ;;  %v2076_v28 = vmul.f32 %v4015_v39, %v2037_v23  ;;  %v5232_v26 = vmul.f32 %v4015_v39, %v2179_v36 }
 0xd97   :  { %v2077_v33 = vmul.f32 %v4016_v7, %v2040_v13  ;;  %v5237_v41 = vmul.f32 %v4016_v7, %v2182_v25  ;;  %v4018_v13 = vld [vmem:[%s5530_s5 + $0x68] sm:$0xff] }
 0xd99   :  { %v2233_v6 = vpack.c.bf16 %v2077_v33, %v2076_v28  ;;  %v2396_v43 = vpack.c.bf16 %v5237_v41, %v5232_v26  ;;  %v4027_v41 = vld [vmem:[%s5528_s3 + $0x20] sm:$0xff] }
 0xd9a   :  { %v2044_v45 = vpop.f32.mrb[132].mxu0  ;;  %v2186_v34 = vpop.f32.mrb[168].mxu1 }
 0xd9b   :  { %v2045_v49 = vadd.f32 %v2044_v45, %v5128_v38  ;;  %v2187_v3 = vadd.f32 %v2186_v34, %v5133_v47  ;;  %v3701_v46 = vpop.f32.mrb[133].mxu0  ;;  %v3741_v16 = vpop.f32.mrb[169].mxu1  ;;  %v2262_v31 = vsel %vm201_vm2, %v2233_v6, 0 }
 0xd9c   :  { %v2047_v48 = vpop.f32.mrb[134].mxu0  ;;  %v2189_v8 = vpop.f32.mrb[170].mxu1  ;;  %2284 = vmatpush1.bf16.xpose.msra.mxu0 %v2262_v31 }
 0xd9d   :  { %v2048_v23 = vadd.f32 %v2047_v48, %v5128_v38  ;;  %v2190_v36 = vadd.f32 %v2189_v8, %v5133_v47  ;;  %v3702_v9 = vpop.f32.mrb[135].mxu0  ;;  %v3742_v24 = vpop.f32.mrb[171].mxu1  ;;  %2285 = vmatprep.subr.bf16.mxu0 %v4059_v32  ;;  %v2078_v15 = vmul.f32 %v4017_v54, %v2045_v49  ;;  %v5250_v18 = vmul.f32 %v4017_v54, %v2187_v3 }
 0xd9e   :  { %v4020_v24 = vld [vmem:[%s5530_s5 + $0x78] sm:$0xff] }
 0xd9f   :  { %v2079_v25 = vmul.f32 %v4018_v13, %v2048_v23  ;;  %v5255_v17 = vmul.f32 %v4018_v13, %v2190_v36  ;;  %v4019_v23 = vld [vmem:[%s5530_s5 + $0x70] sm:$0xff] }
 0xda1   :  { %v2234_v29 = vpack.c.bf16 %v2079_v25, %v2078_v15  ;;  %v2397_v39 = vpack.c.bf16 %v5255_v17, %v5250_v18  ;;  %v4028_v17 = vld [vmem:[%s5528_s3 + $0x38] sm:$0xff] }
 0xda2   :  { %v2052_v28 = vpop.f32.mrb[136].mxu0  ;;  %v2194_v7 = vpop.f32.mrb[172].mxu1 }
 0xda3   :  { %v2053_v33 = vadd.f32 %v2052_v28, %v5128_v38  ;;  %v2195_v6 = vadd.f32 %v2194_v7, %v5133_v47  ;;  %v3705_v45 = vpop.f32.mrb[137].mxu0  ;;  %v3745_v34 = vpop.f32.mrb[173].mxu1  ;;  %v2265_v49 = vsel %vm201_vm2, %v2234_v29, 0 }
 0xda4   :  { %v2055_v3 = vpop.f32.mrb[138].mxu0  ;;  %v2197_v46 = vpop.f32.mrb[174].mxu1  ;;  %2286 = vmatpush1.bf16.xpose.msra.mxu0 %v2265_v49 }
 0xda5   :  { %v2056_v16 = vadd.f32 %v2055_v3, %v5128_v38  ;;  %v2198_v31 = vadd.f32 %v2197_v46, %v5133_v47  ;;  %v3706_v48 = vpop.f32.mrb[139].mxu0  ;;  %v3746_v8 = vpop.f32.mrb[175].mxu1  ;;  %2287 = vmatprep.subr.bf16.mxu0 %v4059_v32  ;;  %v2080_v36 = vmul.f32 %v4019_v23, %v2053_v33  ;;  %v2222_v9 = vmul.f32 %v4019_v23, %v2195_v6  ;;  %v4021_v6 = vld [vmem:[%s5530_s5 + $0x80] sm:$0xff] }
 0xda7   :  { %v2081_v54 = vmul.f32 %v4020_v24, %v2056_v16  ;;  %v2223_v15 = vmul.f32 %v4020_v24, %v2198_v31 }
 0xda9   :  { %v2235_v13 = vpack.c.bf16 %v2081_v54, %v2080_v36  ;;  %v2398_v25 = vpack.c.bf16 %v2223_v15, %v2222_v9  ;;  %v4029_v36 = vld [vmem:[%s5528_s3 + $0x30] sm:$0xff] }
 0xdaa   :  { %v2060_v29 = vpop.f32.mrb[140].mxu0  ;;  %v2202_v28 = vpop.f32.mrb[176].mxu1 }
 0xdab   :  { %v2061_v7 = vadd.f32 %v2060_v29, %v5128_v38  ;;  %v2268_v45 = vsel %vm201_vm2, %v2235_v13, 0  ;;  %v3709_v34 = vpop.f32.mrb[141].mxu0  ;;  %v3749_v49 = vpop.f32.mrb[177].mxu1  ;;  %v4022_v38 = vld [vmem:[%s5528_s3 + $0x8] sm:$0xff] }
 0xdac   :  { %2288 = vmatpush1.bf16.xpose.msra.mxu0 %v2268_v45  ;;  %v2063_v3 = vpop.f32.mrb[142].mxu0  ;;  %v2205_v33 = vpop.f32.mrb[178].mxu1 }
 0xdad   :  { %v2082_v46 = vmul.f32 %v4021_v6, %v2061_v7  ;;  %v3710_v16 = vpop.f32.mrb[143].mxu0  ;;  %v3750_v31 = vpop.f32.mrb[179].mxu1  ;;  %2289 = vmatprep.subr.bf16.mxu0 %v4059_v32  ;;  %v4031_v7 = vld [vmem:[%s5528_s3 + $0x48] sm:$0x3] }
 0xdaf   :  { %v2236_v48 = vpack.c.bf16 %v2082_v46, %v2082_v46 }
 0xdb1   :  { %v2271_v8 = vsel %vm201_vm2, %v2236_v48, 0 }
 0xdb4   :  { %2290 = vmatpush1.bf16.xpose.msra.mxu0 %v2271_v8 }
 0xdb5   :  { %2412 = vmatprep.subr.bf16.mxu0 %v4059_v32 }
 0xdbb   :  { %3208 = vmatmul.mubr.msk.bf16.vlgmr.msra.gmra.mrb[144].mxu0 %vm201_vm2, %v2225_v42  ;;  %v2203_v42 = vadd.f32 %v2202_v28, %v5133_v47 }
 0xdbc   :  { %2413 = vmatpush1.bf16.msra.mxu0 %v2391_v0  ;;  %2315 = vmatprep.mubr.bf16.mxu0 %v4059_v32 }
 0xdbd   :  { %2414 = vmatprep.subr.bf16.mxu0 %v4059_v32  ;;  %v2224_v35 = vmul.f32 %v4021_v6, %v2203_v42 }
 0xdbf   :  { %v2399_v57 = vpack.c.bf16 %v2224_v35, %v2224_v35 }
 0xdc0   :  { %2415 = vmatpush1.bf16.msra.mxu0 %v2392_v59 }
 0xdc1   :  { %2416 = vmatprep.subr.bf16.mxu0 %v4059_v32  ;;  %v2410_v30 = vsel %vm1060_vm6, %v2399_v57, 0 }
 0xdc3   :  { %3209 = vmatmul.mubr.msk.bf16.gmra.mrb[148].mxu0 %vm201_vm2, %v2226_v22 }
 0xdc4   :  { %2417 = vmatpush1.bf16.msra.mxu0 %v2393_v56  ;;  %2325 = vmatprep.mubr.bf16.mxu0 %v4059_v32 }
 0xdc5   :  { %2418 = vmatprep.subr.bf16.mxu0 %v4059_v32 }
 0xdc8   :  { %2419 = vmatpush1.bf16.msra.mxu0 %v2394_v21 }
 0xdc9   :  { %2420 = vmatprep.subr.bf16.mxu0 %v4059_v32 }
 0xdcb   :  { %3210 = vmatmul.mubr.msk.bf16.gmra.mrb[152].mxu0 %vm201_vm2, %v2227_v61 }
 0xdcc   :  { %2421 = vmatpush1.bf16.msra.mxu0 %v2395_v14 }
 0xdcd   :  { %2422 = vmatprep.subr.bf16.mxu0 %v4059_v32 }
 0xdd0   :  { %2423 = vmatpush1.bf16.msra.mxu0 %v2396_v43 }
 0xdd1   :  { %2424 = vmatprep.subr.bf16.mxu0 %v4059_v32 }
 0xdd4   :  { %2425 = vmatpush1.bf16.msra.mxu0 %v2397_v39 }
 0xdd5   :  { %2426 = vmatprep.subr.bf16.mxu0 %v4059_v32 }
 0xdd8   :  { %2427 = vmatpush1.bf16.msra.mxu0 %v2398_v25  ;;  %v4030_v25 = vld [vmem:[%s5528_s3 + $0x40] sm:$0x3] }
 0xdd9   :  { %2428 = vmatprep.subr.bf16.mxu0 %v4059_v32  ;;  %v4024_v32 = vld [vmem:[%s5528_s3 + $0x18] sm:$0xff] }
 0xddc   :  { %2429 = vmatpush1.bf16.msra.mxu0 %v2410_v30 }
 0xddd   :  { %3751 = vmatprep.subr.bf16.mxu0 %v5552_v20 }
 0xe8e   :  { %v2307_v22 = vpop.f32.mrb[144].mxu0 }
 0xe8f   :  { %v2309_v27 = vpop.f32.mrb[145].mxu0  ;;  %v2308_v0 = vadd.f32 %v4023_v12, %v2307_v22 }
 0xe90   :  { %v2310_v47 = vadd.f32 %v4022_v38, %v2309_v27  ;;  %v2311_v44 = vpop.f32.mrb[146].mxu0 }
 0xe91   :  { %v2313_v10 = vpop.f32.mrb[147].mxu0  ;;  %v2312_v5 = vadd.f32 %v4025_v52, %v2311_v44 }
 0xe92   :  { %v2314_v2 = vadd.f32 %v4024_v32, %v2313_v10  ;;  %v2334_v59 = vsel %vm982_vm7, %v2310_v47, -inf }
 0xe93   :  { %v2335_v56 = vmax.f32 %v2308_v0, %v2334_v59 }
 0xe94   :  { %v2338_v1 = vsel %vm982_vm7, %v2314_v2, -inf }
 0xe95   :  { %2336 = vmax.xlane.f32.xlu1 %v2335_v56  ;;  %v2339_v58 = vmax.f32 %v2312_v5, %v2338_v1 }
 0xe96   :  { %v2317_v21 = vpop.f32.mrb[148].mxu0 }
 0xe97   :  { %v2319_v37 = vpop.f32.mrb[149].mxu0  ;;  %2340 = vmax.xlane.f32.xlu0 %v2339_v58  ;;  %v2318_v43 = vadd.f32 %v4027_v41, %v2317_v21 }
 0xe98   :  { %v2320_v14 = vadd.f32 %v4026_v55, %v2319_v37  ;;  %v2321_v26 = vpop.f32.mrb[150].mxu0 }
 0xe99   :  { %v2323_v18 = vpop.f32.mrb[151].mxu0  ;;  %v2322_v9 = vadd.f32 %v4029_v36, %v2321_v26 }
 0xe9a   :  { %v2324_v39 = vadd.f32 %v4028_v17, %v2323_v18  ;;  %v2342_v23 = vsel %vm982_vm7, %v2320_v14, -inf }
 0xe9b   :  { %v2343_v24 = vmax.f32 %v2318_v43, %v2342_v23 }
 0xe9c   :  { %v2346_v54 = vsel %vm982_vm7, %v2324_v39, -inf }
 0xe9d   :  { %2344 = vmax.xlane.f32.xlu1 %v2343_v24  ;;  %v2347_v15 = vmax.f32 %v2322_v9, %v2346_v54  ;;  %v3859_v54 = vld [vmem:[%s5531_s6 + $0x70] sm:$0xff]  }
 0xe9e   :  { %v2327_v13 = vpop.f32.mrb[152].mxu0 }
 0xe9f   :  { %v2328_v29 = vadd.f32 %v4030_v25, %v2327_v13  ;;  %v2329_v28 = vpop.f32.mrb[153].mxu0  ;;  %2348 = vmax.xlane.f32.xlu0 %v2347_v15  ;;  %v3860_v15 = vld [vmem:[%s5531_s6 + $0x78] sm:$0xff]  }
 0xea0   :  { %v2330_v45 = vadd.f32 %v4031_v7, %v2329_v28  ;;  %v2331_v34 = vpop.f32.mrb[154].mxu0 }
 0xea1   :  { %v2332_v49 = vpop.f32.mrb[155].mxu0  ;;  %v2350_v3 = vsel %vm999_vm8, %v2328_v29, -inf }
 0xea2   :  { %v2351_v33 = vsel %vm1001_vm9, %v2330_v45, -inf }
 0xea3   :  { %v2352_v6 = vmax.f32 %v2350_v3, %v2351_v33 }
 0xea5   :  { %2353 = vmax.xlane.f32.xlu1 %v2352_v6 }
 0xf22   :  { %v2337_v46 = vpop.xlane.xlu1 %2336 }
 0xf23   :  { %v2355_v16 = vsub.f32 %v2308_v0, %v2337_v46  ;;  %v2356_v31 = vsub.f32 %v2310_v47, %v2337_v46 }
 0xf24   :  { %v2341_v48 = vpop.xlane.xlu0 %2340 }
 0xf25   :  { %v2365_v8 = vmul.f32 1.442695, %v2355_v16  ;;  %v2367_v50 = vmul.f32 1.442695, %v2356_v31  ;;  %v2357_v61 = vsub.f32 %v2312_v5, %v2341_v48  ;;  %v2358_v42 = vsub.f32 %v2314_v2, %v2341_v48 }
 0xf27   :  { %3943 = vpow2.f32 %v2365_v8  ;;  %v2369_v35 = vmul.f32 1.442695, %v2357_v61  ;;  %v2371_v57 = vmul.f32 1.442695, %v2358_v42 }
 0xf28   :  { %3945 = vpow2.f32 %v2367_v50 }
 0xf29   :  { %3947 = vpow2.f32 %v2369_v35 }
 0xf2a   :  { %3949 = vpow2.f32 %v2371_v57  ;;  %v2345_v30 = vpop.xlane.xlu1 %2344 }
 0xf2b   :  { %v2359_v22 = vsub.f32 %v2318_v43, %v2345_v30  ;;  %v2360_v27 = vsub.f32 %v2320_v14, %v2345_v30 }
 0xf2c   :  { %v2349_v38 = vpop.xlane.xlu0 %2348 }
 0xf2d   :  { %v2373_v44 = vmul.f32 1.442695, %v2359_v22  ;;  %v2375_v12 = vmul.f32 1.442695, %v2360_v27  ;;  %v2361_v10 = vsub.f32 %v2322_v9, %v2349_v38  ;;  %v2362_v0 = vsub.f32 %v2324_v39, %v2349_v38 }
 0xf2f   :  { %3951 = vpow2.f32 %v2373_v44  ;;  %v2377_v47 = vmul.f32 1.442695, %v2361_v10  ;;  %v2379_v32 = vmul.f32 1.442695, %v2362_v0 }
 0xf30   :  { %3953 = vpow2.f32 %v2375_v12 }
 0xf31   :  { %v3944_v59 = vpop.eup %3943  ;;  %3955 = vpow2.f32 %v2377_v47 }
 0xf32   :  { %v3946_v2 = vpop.eup %3945  ;;  %3957 = vpow2.f32 %v2379_v32  ;;  %v2354_v52 = vpop.xlane.xlu1 %2353 }
 0xf33   :  { %v3948_v5 = vpop.eup %3947  ;;  %v2363_v56 = vsub.f32 %v2328_v29, %v2354_v52  ;;  %v2364_v1 = vsub.f32 %v2330_v45, %v2354_v52 }
 0xf34   :  { %v3950_v58 = vpop.eup %3949  ;;  %v2385_v21 = vpack.c.bf16 %v3948_v5, %v3944_v59 }
 0xf35   :  { %v2381_v37 = vmul.f32 1.442695, %v2363_v56  ;;  %v2383_v55 = vmul.f32 1.442695, %v2364_v1  ;;  %v2386_v14 = vpack.c.bf16 %v3950_v58, %v3946_v2  ;;  %v5390_v58 = vld [vmem:[%s5534_s9 + $0x10] sm:$0xff] }
 0xf37   :  { %3211 = vmatprep.mubr.msk.bf16.mxu0 %vm982_vm7, %v2386_v14  ;;  %3214 = vmatprep.mubr.msk.bf16.mxu1 %vm982_vm7, %v2386_v14  ;;  %3959 = vpow2.f32 %v2383_v55 }
 0xf38   :  { %2445 = vmatmul.mubr.bf16.vlgmr.msra.gmra.mrb[156].mxu0 %v2385_v21  ;;  %2501 = vmatmul.mubr.bf16.vlgmr.msra.gmra.mrb[180].mxu1 %v2385_v21  ;;  %3961 = vpow2.f32 %v2381_v37  ;;  %v2627_v21 = vrot.slane %v5390_v58, %v1281_v63 }
 0xf39   :  { %v3952_v26 = vpop.eup %3951  ;;  %3752 = vmatpush3.bf16.msra.mxu0 %v3859_v54 }
 0xf3a   :  { %v3954_v41 = vpop.eup %3953  ;;  %3753 = vmatprep.subr.bf16.mxu0 %v5552_v20 }
 0xf3b   :  { %v3956_v43 = vpop.eup %3955 }
 0xf3c   :  { %v3958_v18 = vpop.eup %3957  ;;  %v2387_v17 = vpack.c.bf16 %v3956_v43, %v3952_v26 }
 0xf3d   :  { %v2388_v39 = vpack.c.bf16 %v3958_v18, %v3954_v41  ;;  %3754 = vmatpush3.bf16.msra.mxu0 %v3860_v15 }
 0xf3e   :  { %3767 = vmatprep.subr.bf16.mxu0 %v5552_v20 }
 0xf3f   :  { %3212 = vmatprep.mubr.msk.bf16.mxu0 %vm982_vm7, %v2388_v39  ;;  %3215 = vmatprep.mubr.msk.bf16.mxu1 %vm982_vm7, %v2388_v39 }
 0xf40   :  { %2453 = vmatmul.mubr.bf16.gmra.mrb[160].mxu0 %v2387_v17  ;;  %2509 = vmatmul.mubr.bf16.gmra.mrb[184].mxu1 %v2387_v17 }
 0xf41   :  { %v3960_v23 = vpop.eup %3959 }
 0xf42   :  { %v3962_v36 = vpop.eup %3961  ;;  %v2390_v9 = vpack.c.bf16 %v3960_v23, %v3960_v23 }
 0xf43   :  { %v2389_v24 = vpack.c.bf16 %v3962_v36, %v3962_v36 }
 0xf44   :  { %3213 = vmatprep.mubr.msk.bf16.mxu0 %vm982_vm7, %v2390_v9  ;;  %3216 = vmatprep.mubr.msk.bf16.mxu1 %vm982_vm7, %v2390_v9 }
 0xf48   :  { %2461 = vmatmul.mubr.bf16.gmra.mrb[164].mxu0 %v2389_v24  ;;  %2517 = vmatmul.mubr.bf16.gmra.mrb[188].mxu1 %v2389_v24 }
 0xf49   :  { %3755 = vmatprep.mubr.msk.bf16.mxu0 %vm4058_vm0, %v5552_v20  ;;  %3799 = vmatprep.mubr.msk.bf16.mxu1 %vm4058_vm0, %v5552_v20 }
0x100b   :  { %v2446_v13 = vpop.f32.mrb[156].mxu0  ;;  %v2502_v25 = vpop.f32.mrb[180].mxu1 }
0x100c   :  { %3963 = vrcp.f32 %v2502_v25  ;;  %v2448_v29 = vpop.f32.mrb[157].mxu0  ;;  %v2504_v28 = vpop.f32.mrb[181].mxu1 }
0x100d   :  { %v2449_v7 = vpop.f32.mrb[158].mxu0  ;;  %v2505_v45 = vpop.f32.mrb[182].mxu1 }
0x100e   :  { %3965 = vrcp.f32 %v2505_v45  ;;  %v2451_v34 = vpop.f32.mrb[159].mxu0  ;;  %v2507_v49 = vpop.f32.mrb[183].mxu1 }
0x1013   :  { %v2454_v3 = vpop.f32.mrb[160].mxu0  ;;  %v2510_v33 = vpop.f32.mrb[184].mxu1 }
0x1014   :  { %3967 = vrcp.f32 %v2510_v33  ;;  %v2456_v6 = vpop.f32.mrb[161].mxu0  ;;  %v2512_v46 = vpop.f32.mrb[185].mxu1 }
0x1015   :  { %v2457_v16 = vpop.f32.mrb[162].mxu0  ;;  %v2513_v31 = vpop.f32.mrb[186].mxu1 }
0x1016   :  { %v3964_v48 = vpop.eup %3963  ;;  %3969 = vrcp.f32 %v2513_v31  ;;  %v2459_v8 = vpop.f32.mrb[163].mxu0 }
0x1017   :  { %v2515_v50 = vpop.f32.mrb[187].mxu1  ;;  %v2529_v61 = vmul.f32 %v3964_v48, %v2446_v13 }
0x1018   :  { %v3966_v42 = vpop.eup %3965  ;;  %v3861_v50 = vld [vmem:[%s5532_s7 + $0x10] sm:$0xff]  }
0x1019   :  { %v2530_v35 = vmul.f32 %v3966_v42, %v2449_v7 }
0x101b   :  { %v2534_v57 = vpack.c.bf16 %v2530_v35, %v2529_v61  ;;  %v2462_v30 = vpop.f32.mrb[164].mxu0  ;;  %v2518_v22 = vpop.f32.mrb[188].mxu1  ;;  %v3862_v61 = vld [vmem:[%s5532_s7 + $0x18] sm:$0xff]  }
0x101c   :  { %3971 = vrcp.f32 %v2518_v22  ;;  %v2464_v27 = vpop.f32.mrb[165].mxu0  ;;  %v2520_v38 = vpop.f32.mrb[189].mxu1 }
0x101d   :  { %v2465_v44 = vpop.f32.mrb[166].mxu0  ;;  %v2521_v12 = vpop.f32.mrb[190].mxu1  ;;  %3756 = vmatmul.mubr.msk.bf16.vlgmr.msra.gmra.mrb[168].mxu0 %vm201_vm2, %v2534_v57 }
0x101e   :  { %v3968_v10 = vpop.eup %3967  ;;  %v2466_v0 = vpop.f32.mrb[167].mxu0  ;;  %3759 = vmatprep.mubr.msk.bf16.mxu0 %vm4058_vm0, %v5552_v20  ;;  %3768 = vmatpush3.bf16.msra.mxu0 %v3861_v50 }
0x101f   :  { %v2522_v47 = vpop.f32.mrb[191].mxu1  ;;  %v2531_v32 = vmul.f32 %v3968_v10, %v2454_v3  ;;  %3769 = vmatprep.subr.bf16.mxu0 %v5552_v20 }
0x1020   :  { %v3970_v59 = vpop.eup %3969 }
0x1021   :  { %v2532_v2 = vmul.f32 %v3970_v59, %v2457_v16 }
0x1022   :  { %3770 = vmatpush3.bf16.msra.mxu0 %v3862_v61 }
0x1023   :  { %v2535_v52 = vpack.c.bf16 %v2532_v2, %v2531_v32  ;;  %3811 = vmatprep.subr.bf16.mxu0 %v5552_v20 }
0x1025   :  { %3760 = vmatmul.mubr.msk.bf16.gmra.mrb[172].mxu0 %vm201_vm2, %v2535_v52 }
0x1026   :  { %v3972_v5 = vpop.eup %3971  ;;  %3763 = vmatprep.mubr.msk.bf16.mxu0 %vm4058_vm0, %v5552_v20 }
0x1027   :  { %v2533_v56 = vmul.f32 %v3972_v5, %v2462_v30 }
0x1029   :  { %v2536_v1 = vpack.c.bf16 %v2533_v56, %v2533_v56 }
0x102d   :  { %3764 = vmatmul.mubr.msk.bf16.gmra.mrb[176].mxu0 %vm201_vm2, %v2536_v1 }
0x102e   :  { %3771 = vmatprep.mubr.msk.bf16.mxu0 %vm4058_vm0, %v5552_v20 }
0x10f0   :  { %v2597_v37 = vpop.f32.mrb[168].mxu0 }
0x10f1   :  { %v2619_v55 = vadd.f32 %v2597_v37, %v4897_v62  ;;  %v3757_v14 = vpop.f32.mrb[169].mxu0  ;;  %v2701_v37 = vrot.slane %v5390_v58, %v1355_v4  ;;  %v3863_v4 = vld [vmem:[%s5533_s8 + $0x40] sm:$0xff]  }
0x10f2   :  { %v2600_v26 = vpop.f32.mrb[170].mxu0  ;;  %3784 = vmatpush3.bf16.msra.mxu1 %v3863_v4 }
0x10f3   :  { %v5396_v41 = vadd.f32 %v2627_v21, %v2619_v55  ;;  %v2620_v43 = vadd.f32 %v2600_v26, %v4900_v19  ;;  %v3758_v18 = vpop.f32.mrb[171].mxu0  ;;  %3785 = vmatprep.subr.bf16.mxu1 %v5552_v20 }
0x10f4   :  { %v2710_v18 = vrot.slane %v5390_v58, %v1364_v51  ;;  %v3865_v51 = vld [vmem:[%s5533_s8 + $0x50] sm:$0xff]   ;;  %v3866_v58 = vld [vmem:[%s5533_s8 + $0x58] sm:$0xff]  }
0x10f5   :  { %v2633_v17 = vsel %vm201_vm2, %v5396_v41, 0.0  ;;  %v2629_v39 = vadd.f32 %v2627_v21, %v2620_v43 }
0x10f6   :  { %2634 = vadd.xlane.f32.xlu0 %v2633_v17  ;;  %3786 = vmatpush3.bf16.msra.mxu1 %v3864_v11 }
0x10f7   :  { %v2636_v23 = vsel %vm201_vm2, %v2629_v39, 0.0  ;;  %3787 = vmatprep.subr.bf16.mxu1 %v5552_v20 }
0x10f8   :  { %2637 = vadd.xlane.f32.xlu1 %v2636_v23  ;;  %v2605_v36 = vpop.f32.mrb[172].mxu0 }
0x10f9   :  { %v2621_v63 = vadd.f32 %v2605_v36, %v4907_v60  ;;  %v3761_v9 = vpop.f32.mrb[173].mxu0 }
0x10fa   :  { %v2608_v62 = vpop.f32.mrb[174].mxu0  ;;  %3788 = vmatpush3.bf16.msra.mxu1 %v3865_v51 }
0x10fb   :  { %v2622_v24 = vadd.f32 %v2608_v62, %v4910_v53  ;;  %v3762_v54 = vpop.f32.mrb[175].mxu0  ;;  %v2630_v15 = vadd.f32 %v2627_v21, %v2621_v63  ;;  %3789 = vmatprep.subr.bf16.mxu1 %v5552_v20  ;;  %v3867_v62 = vld [vmem:[%s5533_s8 + $0x60] sm:$0xff]  }
0x10fc   :  { %v3869_v54 = vld [vmem:[%s5533_s8 + $0x70] sm:$0xff]  }
0x10fd   :  { %v2631_v13 = vadd.f32 %v2627_v21, %v2622_v24  ;;  %v3868_v24 = vld [vmem:[%s5533_s8 + $0x68] sm:$0xff]  }
0x10fe   :  { %3790 = vmatpush3.bf16.msra.mxu1 %v3866_v58 }
0x10ff   :  { %v2642_v48 = vsel %vm201_vm2, %v2631_v13, 0.0  ;;  %3791 = vmatprep.subr.bf16.mxu1 %v5552_v20 }
0x1100   :  { %v2613_v19 = vpop.f32.mrb[176].mxu0 }
0x1101   :  { %v2623_v25 = vadd.f32 %v2613_v19, %v4917_v40  ;;  %v3765_v29 = vpop.f32.mrb[177].mxu0  ;;  %v2639_v40 = vsel %vm201_vm2, %v2630_v15, 0.0 }
0x1102   :  { %v2616_v28 = vpop.f32.mrb[178].mxu0  ;;  %3792 = vmatpush3.bf16.msra.mxu1 %v3867_v62 }
0x1103   :  { %v3766_v7 = vpop.f32.mrb[179].mxu0  ;;  %v2632_v45 = vadd.f32 %v2627_v21, %v2623_v25  ;;  %3793 = vmatprep.subr.bf16.mxu1 %v5552_v20 }
0x1105   :  { %v2645_v8 = vsel %vm214_vm3, %v2632_v45, 0.0 }
0x1106   :  { %3794 = vmatpush3.bf16.msra.mxu1 %v3868_v24 }
0x1107   :  { %3795 = vmatprep.subr.bf16.mxu1 %v5552_v20 }
0x110a   :  { %3796 = vmatpush3.bf16.msra.mxu1 %v3869_v54 }
0x110b   :  { %3797 = vmatprep.subr.bf16.mxu1 %v5552_v20 }
0x1183   :  { %v2635_v34 = vpop.xlane.xlu0 %2634 }
0x1184   :  { %v2648_v49 = vmul.f32 0.03125, %v2635_v34 }
0x1185   :  { %v2638_v3 = vpop.xlane.xlu1 %2637 }
0x1186   :  { %v2653_v33 = vsub.f32 %v5396_v41, %v2648_v49  ;;  %v2649_v60 = vmul.f32 0.03125, %v2638_v3 }
0x1188   :  { %v2654_v6 = vsub.f32 %v2629_v39, %v2649_v60  ;;  %v2658_v46 = vmul.f32 %v2653_v33, %v2653_v33 }
0x118a   :  { %v2663_v53 = vsel %vm201_vm2, %v2658_v46, 0.0  ;;  %v2659_v16 = vmul.f32 %v2654_v6, %v2654_v6 }
0x118b   :  { %2664 = vadd.xlane.f32.xlu0 %v2663_v53 }
0x118c   :  { %v2666_v31 = vsel %vm201_vm2, %v2659_v16, 0.0 }
0x118d   :  { %2667 = vadd.xlane.f32.xlu1 %v2666_v31 }
0x118f   :  { %2640 = vadd.xlane.f32.xlu0 %v2639_v40 }
0x1191   :  { %2643 = vadd.xlane.f32.xlu1 %v2642_v48 }
0x1193   :  { %2646 = vadd.xlane.f32.xlu0 %v2645_v8 }
0x1218   :  { %v2665_v42 = vpop.xlane.xlu0 %2664 }
0x1219   :  { %v2678_v35 = vmul.f32 0.03125, %v2665_v42 }
0x121a   :  { %v2668_v57 = vpop.xlane.xlu1 %2667 }
0x121b   :  { %v2683_v30 = vadd.f32 1e-06, %v2678_v35  ;;  %v2679_v22 = vmul.f32 0.03125, %v2668_v57  ;;  %v3231_v35 = vld [vmem:[%s5535_s10 + $0x1] ss:$0 sm:$0xff] }
0x121c   :  { %v2641_v27 = vpop.xlane.xlu0 %2640 }
0x121d   :  { %3973 = vrsqrt.f32 %v2683_v30  ;;  %v2684_v38 = vadd.f32 1e-06, %v2679_v22  ;;  %v2650_v44 = vmul.f32 0.03125, %v2641_v27 }
0x121e   :  { %v2644_v12 = vpop.xlane.xlu1 %2643 }
0x121f   :  { %3975 = vrsqrt.f32 %v2684_v38  ;;  %v5419_v10 = vsub.f32 %v2630_v15, %v2650_v44  ;;  %v2651_v0 = vmul.f32 0.03125, %v2644_v12  ;;  %v3870_v15 = vld [vmem:[%s5533_s8 + $0x78] sm:$0xff]  }
0x1220   :  { %v2647_v47 = vpop.xlane.xlu0 %2646  ;;  %3798 = vmatpush3.bf16.msra.mxu1 %v3870_v15 }
0x1221   :  { %v5421_v32 = vsub.f32 %v2631_v13, %v2651_v0  ;;  %v2652_v59 = vmul.f32 0.03125, %v2647_v47  ;;  %v2660_v2 = vmul.f32 %v5419_v10, %v5419_v10 }
0x1223   :  { %v5425_v52 = vsub.f32 %v2632_v45, %v2652_v59  ;;  %v2669_v5 = vsel %vm201_vm2, %v2660_v2, 0.0  ;;  %v2661_v56 = vmul.f32 %v5421_v32, %v5421_v32 }
0x1224   :  { %2670 = vadd.xlane.f32.xlu1 %v2669_v5 }
0x1225   :  { %v2672_v1 = vsel %vm201_vm2, %v2661_v56, 0.0  ;;  %v2662_v21 = vmul.f32 %v5425_v52, %v5425_v52 }
0x1226   :  { %2673 = vadd.xlane.f32.xlu0 %v2672_v1 }
0x1227   :  { %v3974_v55 = vpop.eup %3973  ;;  %v2675_v14 = vsel %vm214_vm3, %v2662_v21, 0.0 }
0x1228   :  { %v2693_v26 = vmul.f32 %v3974_v55, %v2653_v33  ;;  %2676 = vadd.xlane.f32.xlu1 %v2675_v14 }
0x1229   :  { %v3976_v43 = vpop.eup %3975 }
0x122a   :  { %v2702_v17 = vmul.f32 %v2701_v37, %v2693_v26  ;;  %v2694_v39 = vmul.f32 %v3976_v43, %v2654_v6 }
0x122c   :  { %v2703_v23 = vmul.f32 %v2701_v37, %v2694_v39  ;;  %v2711_v36 = vadd.f32 %v2710_v18, %v2702_v17 }
0x122e   :  { %v2712_v63 = vadd.f32 %v2710_v18, %v2703_v23 }
0x1230   :  { %v2716_v9 = vpack.c.bf16 %v2712_v63, %v2711_v36 }
0x1232   :  { %3772 = vmatmul.mubr.msk.bf16.vlgmr.msra.gmra.mrb[180].mxu0 %vm201_vm2, %v2716_v9 }
0x1233   :  { %3775 = vmatprep.mubr.msk.bf16.mxu0 %vm4058_vm0, %v5552_v20 }
0x12b1   :  { %v2671_v13 = vpop.xlane.xlu1 %2670 }
0x12b2   :  { %v2680_v19 = vmul.f32 0.03125, %v2671_v13 }
0x12b3   :  { %v2674_v25 = vpop.xlane.xlu0 %2673 }
0x12b4   :  { %v2685_v29 = vadd.f32 1e-06, %v2680_v19  ;;  %v2681_v28 = vmul.f32 0.03125, %v2674_v25 }
0x12b5   :  { %v2677_v7 = vpop.xlane.xlu1 %2676 }
0x12b6   :  { %3977 = vrsqrt.f32 %v2685_v29  ;;  %v2686_v45 = vadd.f32 1e-06, %v2681_v28  ;;  %v2682_v34 = vmul.f32 0.03125, %v2677_v7 }
0x12b8   :  { %3979 = vrsqrt.f32 %v2686_v45  ;;  %v2687_v49 = vadd.f32 1e-06, %v2682_v34 }
0x12ba   :  { %3981 = vrsqrt.f32 %v2687_v49  ;;  %v3261_v49 = vld [vmem:[%s5534_s9 + $0x18] ss:$0 sm:$0xff] }
0x12c0   :  { %v3978_v3 = vpop.eup %3977 }
0x12c1   :  { %v2695_v33 = vmul.f32 %v3978_v3, %v5419_v10 }
0x12c2   :  { %v3980_v60 = vpop.eup %3979 }
0x12c3   :  { %v2696_v6 = vmul.f32 %v3980_v60, %v5421_v32  ;;  %v2704_v46 = vmul.f32 %v2701_v37, %v2695_v33 }
0x12c4   :  { %v3982_v53 = vpop.eup %3981 }
0x12c5   :  { %v2705_v16 = vmul.f32 %v2701_v37, %v2696_v6  ;;  %v2697_v31 = vmul.f32 %v3982_v53, %v5425_v52  ;;  %v2713_v40 = vadd.f32 %v2710_v18, %v2704_v46 }
0x12c7   :  { %v2714_v48 = vadd.f32 %v2710_v18, %v2705_v16  ;;  %v2706_v50 = vmul.f32 %v2701_v37, %v2697_v31 }
0x12c9   :  { %v2717_v8 = vpack.c.bf16 %v2714_v48, %v2713_v40  ;;  %v2715_v61 = vadd.f32 %v2710_v18, %v2706_v50 }
0x12cb   :  { %3776 = vmatmul.mubr.msk.bf16.gmra.mrb[184].mxu0 %vm201_vm2, %v2717_v8  ;;  %v2718_v42 = vpack.c.bf16 %v2715_v61, %v2715_v61 }
0x12cc   :  { %3779 = vmatprep.mubr.msk.bf16.mxu0 %vm4058_vm0, %v5552_v20 }
0x12d3   :  { %3780 = vmatmul.mubr.msk.bf16.gmra.mrb[188].mxu0 %vm201_vm2, %v2718_v42 }
0x12d4   :  { %3815 = vmatprep.mubr.msk.bf16.mxu0 %vm4058_vm0, %v5552_v20 }
0x1305   :  { %v2787_v57 = vpop.f32.mrb[180].mxu0 }
0x1306   :  { %v2788_v30 = vadd.f32 %v3231_v35, %v2787_v57  ;;  %v3773_v22 = vpop.f32.mrb[181].mxu0 }
0x1307   :  { %v2790_v27 = vpop.f32.mrb[182].mxu0 }
0x1308   :  { %v2814_v38 = vmul.f32 0.70710677, %v2788_v30  ;;  %v2791_v44 = vadd.f32 %v3231_v35, %v2790_v27  ;;  %v3774_v12 = vpop.f32.mrb[183].mxu0  ;;  %v2809_v59 = vmul.f32 0.5, %v2788_v30  ;;  %v3871_v27 = vld [vmem:[%s5536_s11] sm:$0xff]  }
0x1309   :  { %3812 = vmatpush3.bf16.msra.mxu0 %v3871_v27 }
0x130a   :  { %3983 = verf.f32 %v2814_v38  ;;  %v2815_v10 = vmul.f32 0.70710677, %v2791_v44  ;;  %v2810_v2 = vmul.f32 0.5, %v2791_v44  ;;  %3813 = vmatprep.subr.bf16.mxu0 %v5552_v20  ;;  %v3872_v38 = vld [vmem:[%s5536_s11 + $0x8] sm:$0xff]  }
0x130c   :  { %3985 = verf.f32 %v2815_v10 }
0x130d   :  { %3814 = vmatpush3.bf16.msra.mxu0 %v3872_v38 }
0x1314   :  { %v3984_v0 = vpop.eup %3983 }
0x1315   :  { %v2824_v47 = vadd.f32 1.0, %v3984_v0 }
0x1316   :  { %v3986_v32 = vpop.eup %3985 }
0x1317   :  { %v2825_v52 = vadd.f32 1.0, %v3986_v32  ;;  %v2829_v5 = vmul.f32 %v2824_v47, %v2809_v59  ;;  %v3262_v47 = vld [vmem:[%s5527_s2 + $0x22] ss:$0 sm:$0xff]  ;;  %v3263_v59 = vld [vmem:[%s5527_s2 + $0x23] ss:$0 sm:$0xff] }
0x1319   :  { %v2830_v56 = vmul.f32 %v2825_v52, %v2810_v2 }
0x131b   :  { %v2834_v1 = vpack.c.bf16 %v2830_v56, %v2829_v5  ;;  %v3264_v5 = vld [vmem:[%s5527_s2 + $0x24] ss:$0 sm:$0xff] }
0x131d   :  { %3800 = vmatmul.mubr.bf16.vlgmr.msra.gmra.mrb[192].mxu1 %v2834_v1 }
0x131e   :  { %3803 = vmatprep.mubr.msk.bf16.mxu1 %vm4058_vm0, %v5552_v20 }
0x139e   :  { %v2795_v21 = vpop.f32.mrb[184].mxu0 }
0x139f   :  { %v2796_v37 = vadd.f32 %v3231_v35, %v2795_v21  ;;  %v3777_v55 = vpop.f32.mrb[185].mxu0 }
0x13a0   :  { %v2798_v14 = vpop.f32.mrb[186].mxu0 }
0x13a1   :  { %v2816_v26 = vmul.f32 0.70710677, %v2796_v37  ;;  %v2799_v43 = vadd.f32 %v3231_v35, %v2798_v14  ;;  %v3778_v18 = vpop.f32.mrb[187].mxu0  ;;  %v2811_v62 = vmul.f32 0.5, %v2796_v37 }
0x13a3   :  { %3987 = verf.f32 %v2816_v26  ;;  %v2817_v17 = vmul.f32 0.70710677, %v2799_v43  ;;  %v2812_v24 = vmul.f32 0.5, %v2799_v43 }
0x13a5   :  { %3989 = verf.f32 %v2817_v17 }
0x13a6   :  { %v2803_v39 = vpop.f32.mrb[188].mxu0 }
0x13a7   :  { %v2804_v23 = vadd.f32 %v3231_v35, %v2803_v39  ;;  %v3781_v36 = vpop.f32.mrb[189].mxu0 }
0x13a8   :  { %v2806_v63 = vpop.f32.mrb[190].mxu0 }
0x13a9   :  { %v2818_v9 = vmul.f32 0.70710677, %v2804_v23  ;;  %v3782_v4 = vpop.f32.mrb[191].mxu0  ;;  %v2813_v29 = vmul.f32 0.5, %v2804_v23 }
0x13ab   :  { %3991 = verf.f32 %v2818_v9 }
0x13ad   :  { %v3988_v11 = vpop.eup %3987 }
0x13ae   :  { %v2826_v51 = vadd.f32 1.0, %v3988_v11 }
0x13af   :  { %v3990_v58 = vpop.eup %3989 }
0x13b0   :  { %v2827_v54 = vadd.f32 1.0, %v3990_v58  ;;  %v2831_v15 = vmul.f32 %v2826_v51, %v2811_v62 }
0x13b2   :  { %v2832_v13 = vmul.f32 %v2827_v54, %v2812_v24 }
0x13b4   :  { %v2835_v19 = vpack.c.bf16 %v2832_v13, %v2831_v15 }
0x13b5   :  { %v3992_v25 = vpop.eup %3991 }
0x13b6   :  { %v2828_v28 = vadd.f32 1.0, %v3992_v25  ;;  %3804 = vmatmul.mubr.bf16.gmra.mrb[196].mxu1 %v2835_v19 }
0x13b7   :  { %3807 = vmatprep.mubr.msk.bf16.mxu1 %vm4058_vm0, %v5552_v20 }
0x13b8   :  { %v2833_v7 = vmul.f32 %v2828_v28, %v2813_v29 }
0x13ba   :  { %v2836_v45 = vpack.c.bf16 %v2833_v7, %v2833_v7 }
0x13be   :  { %3808 = vmatmul.mubr.bf16.gmra.mrb[200].mxu1 %v2836_v45 }
0x13f0   :  { %v2936_v34 = vpop.f32.mrb[192].mxu1 }
0x13f1   :  { %v2954_v3 = vadd.f32 %v2936_v34, %v5396_v41  ;;  %v3801_v33 = vpop.f32.mrb[193].mxu1 }
0x13f2   :  { %v2939_v60 = vpop.f32.mrb[194].mxu1 }
0x13f3   :  { %v3802_v6 = vpop.f32.mrb[195].mxu1  ;;  %v2959_v46 = vadd.f32 %v3261_v49, %v2954_v3 }
0x13f5   :  { %v2962_v53 = vsel %vm214_vm3, %v2959_v46, 0.0 }
0x13f6   :  { %2963 = vadd.xlane.f32.xlu0 %v2962_v53 }
0x1483   :  { %v2964_v16 = vpop.xlane.xlu0 %2963 }
0x1484   :  { %v2965_v31 = vmul.f32 0.03125, %v2964_v16 }
0x1486   :  { %v2966_v40 = vsub.f32 %v2959_v46, %v2965_v31 }
0x1488   :  { %v2967_v48 = vmul.f32 %v2966_v40, %v2966_v40 }
0x1489   :  { %v2943_v8 = vpop.f32.mrb[196].mxu1 }
0x148a   :  { %v3805_v50 = vpop.f32.mrb[197].mxu1  ;;  %v2968_v61 = vsel %vm214_vm3, %v2967_v48, 0.0 }
0x148b   :  { %2969 = vadd.xlane.f32.xlu1 %v2968_v61  ;;  %v2945_v42 = vpop.f32.mrb[198].mxu1 }
0x148c   :  { %v3806_v35 = vpop.f32.mrb[199].mxu1 }
0x1491   :  { %v2949_v57 = vpop.f32.mrb[200].mxu1 }
0x1492   :  { %v3809_v41 = vpop.f32.mrb[201].mxu1 }
0x1493   :  { %v2951_v30 = vpop.f32.mrb[202].mxu1 }
0x1494   :  { %v3810_v22 = vpop.f32.mrb[203].mxu1 }
0x1518   :  { %v2970_v44 = vpop.xlane.xlu1 %2969 }
0x1519   :  { %v2971_v12 = vmul.f32 0.03125, %v2970_v44 }
0x151b   :  { %v2972_v10 = vadd.f32 1e-06, %v2971_v12 }
0x151d   :  { %3993 = vrsqrt.f32 %v2972_v10 }
0x1527   :  { %v3994_v0 = vpop.eup %3993 }
0x1528   :  { %v2974_v32 = vmul.f32 %v3994_v0, %v2966_v40 }
0x152a   :  { %v2979_v20 = vmul.f32 %v3262_v47, %v2974_v32 }
0x152c   :  { %v2984_v2 = vadd.f32 %v3263_v59, %v2979_v20 }
0x152e   :  { %v2985_v52 = vpack.c.bf16 %v2984_v2, %v2984_v2 }
0x1530   :  { %3816 = vmatmul.mubr.msk.bf16.vlgmr.msra.gmra.mrb[192].mxu0 %vm201_vm2, %v2985_v52 }
0x1603   :  { %v3044_v56 = vpop.f32.mrb[192].mxu0 }
0x1604   :  { %v3045_v1 = vadd.f32 %v3264_v5, %v3044_v56  ;;  %v3817_v21 = vpop.f32.mrb[193].mxu0 }
0x1605   :  { %v3047_v37 = vpop.f32.mrb[194].mxu0 }
0x1606   :  { %v3818_v55 = vpop.f32.mrb[195].mxu0  ;;  %3051 = vst.msk [vmem:[#allocation2] sm:$0x3] %vm3050_vm10, %v3045_v1 }
0x1607   :  { %4044 = shalt.err (!%p4041_p4)
}
0x1608   :  { %s4045_s2 = scalar_lea.hbm %s5537_s12, 32 }
0x1609   :  { %p4046_p5 = scmp.ne.s32.totalorder %s5537_s12, %s4045_s2  ;;  %p4049_p6 = scmp.lt.u32.totalorder %s4045_s2, %s5537_s12 }
0x160b   :  { %p4051_p7 = pnand %p4049_p6, %p4046_p5 }
0x160d   :  { %4054 = shalt.err (!%p4051_p7)
}
0x160e   :  { %3061 = dma.vmem_to_hbm [thread:$0]  %s3059_s14, 32, %s5537_s12, [#allocation3]  }
0x160f   :  { %4055 = dma.done.wait [#allocation3], 32  }
0x1610   :  { %4056 = vsyncadd [#allocation3], 4294967264 }
0x1611   :  { %3065 = vsyncpa [#allocation3], 1 }

</bundles_post_ra>
